<compile_context>
chip_gen: v5e
topology: v5e:2x2
jax: 0.10.0
libtpu: 0.0.40
codegen_flags: <defaults>
</compile_context>

<pallas_src>
import functools

import jax
import jax.numpy as jnp
import numpy as np
from jax import lax
from jax.experimental import pallas as pl
from jax.experimental.pallas import tpu as pltpu

CHUNK = 128  # intra-chunk tile (result is independent of chunk size)


def ceildiv(a, b):
    return -(a // -b)


# ----------------------------------------------------------------------------
# Pallas kernel: chunked causal linear attention, K chunks x G heads per step
# ----------------------------------------------------------------------------
def _chunk_linear_attn_kernel(q_ref, k_ref, v_ref, o_ref, kv_ref, *,
                              nheads, nchunks, chunk):
    n = pl.program_id(1)  # sequential ("arbitrary") time axis

    @pl.when(n == 0)
    def _():
        kv_ref[...] = jnp.zeros_like(kv_ref)

    dk = q_ref.shape[-1]
    dv = v_ref.shape[-1]
    scale = dk ** (-0.5)

    # Causal mask is chunk-index invariant -> hoisted out of the chunk loop.
    row = lax.broadcasted_iota(jnp.int32, (chunk, chunk), 0)
    col = lax.broadcasted_iota(jnp.int32, (chunk, chunk), 1)
    causal = row >= col

    def chunk_body(c, kvs):
        off = pl.multiple_of(c * chunk, chunk)
        outs = []
        new_kvs = []
        for h in range(nheads):  # static, small (G = 128 // head_dim)
            q = q_ref[0, h, pl.ds(off, chunk), :]          # (C, Dk) bf16
            k = k_ref[0, h, pl.ds(off, chunk), :]          # (C, Dk) bf16
            v = v_ref[0, h, pl.ds(off, chunk), :]          # (C, Dv) bf16
            kv = kvs[h]                                    # (Dk, Dv) f32

            # inter-chunk: q @ (running sum of k^T v over previous chunks)
            inter = jnp.dot(q, kv.astype(jnp.bfloat16),
                            preferred_element_type=jnp.float32)

            # intra-chunk: causal (q k^T) v
            s = lax.dot_general(q, k, (((1,), (1,)), ((), ())),
                                preferred_element_type=jnp.float32)
            s = jnp.where(causal, s, 0.0).astype(jnp.bfloat16)
            intra = jnp.dot(s, v, preferred_element_type=jnp.float32)

            outs.append((inter + intra) * scale)

            # state update for *later* chunks: kv += k^T v (f32 accumulator)
            new_kvs.append(kv + lax.dot_general(
                k, v, (((0,), (0,)), ((), ())),
                preferred_element_type=jnp.float32))

        # Lane-dense store: all G heads concatenated along the lane axis.
        o_ref[0, pl.ds(off, chunk), :] = jnp.concatenate(
            outs, axis=-1).astype(o_ref.dtype)
        return tuple(new_kvs)

    kvs0 = tuple(kv_ref[h] for h in range(nheads))
    kvs = lax.fori_loop(0, nchunks, chunk_body, kvs0, unroll=True)
    for h in range(nheads):
        kv_ref[h] = kvs[h]


def chunk_linear_attn_pallas(q, k, v, *, chunk=CHUNK, max_chunks_per_step=8):
    """q, k: (BG, G, T, Dk); v: (BG, G, T, Dv) -> (BG, T, G*Dv) float32."""
    BG, G, T, Dk = q.shape
    Dv = v.shape[-1]

    n_chunks_total = max(1, ceildiv(T, chunk))
    K = max(1, min(max_chunks_per_step, n_chunks_total))
    tblk = K * chunk
    Tp = ceildiv(T, tblk) * tblk
    if Tp != T:
        pad_cfg = ((0, 0), (0, 0), (0, Tp - T), (0, 0))
        q = jnp.pad(q, pad_cfg)
        k = jnp.pad(k, pad_cfg)
        v = jnp.pad(v, pad_cfg)

    # bf16 inputs: native MXU path and half the HBM DMA bytes; accumulation
    # (kv state, matmul outputs) stays f32.
    q = q.astype(jnp.bfloat16)
    k = k.astype(jnp.bfloat16)
    v = v.astype(jnp.bfloat16)

    n_steps = Tp // tblk

    kernel = functools.partial(_chunk_linear_attn_kernel,
                               nheads=G, nchunks=K, chunk=chunk)

    # VMEM budget: double-buffered q/k/v/out blocks + f32 state scratch,
    # clamped to v7x's 64 MiB physical VMEM.
    blk_bytes = 2 * (2 * G * tblk * Dk * 2 + G * tblk * Dv * 2
                     + tblk * G * Dv * 4) + G * Dk * max(Dv, 128) * 4
    vmem_limit = int(min(max(2 * blk_bytes, 32 * 1024 * 1024),
                         64 * 1024 * 1024))

    out = pl.pallas_call(
        kernel,
        out_shape=jax.ShapeDtypeStruct((BG, Tp, G * Dv), jnp.float32),
        grid_spec=pltpu.PrefetchScalarGridSpec(
            num_scalar_prefetch=0,
            grid=(BG, n_steps),
            in_specs=[
                pl.BlockSpec((1, G, tblk, Dk), lambda b, n: (b, 0, n, 0)),
                pl.BlockSpec((1, G, tblk, Dk), lambda b, n: (b, 0, n, 0)),
                pl.BlockSpec((1, G, tblk, Dv), lambda b, n: (b, 0, n, 0)),
            ],
            out_specs=pl.BlockSpec((1, tblk, G * Dv), lambda b, n: (b, n, 0)),
            scratch_shapes=[pltpu.VMEM((G, Dk, Dv), jnp.float32)],
        ),
        compiler_params=pltpu.CompilerParams(
            dimension_semantics=("parallel", "arbitrary"),
            vmem_limit_bytes=vmem_limit),
    )(q, k, v)
    return out[:, :T, :]


# ----------------------------------------------------------------------------
# Pure-JAX reference (torch semantics: chunk_size=64, f32) for correctness
# ----------------------------------------------------------------------------
def chunk_linear_attn_ref(q, k, v, chunk=64):
    BH, T, Dk = q.shape
    Dv = v.shape[-1]
    Tp = ceildiv(T, chunk) * chunk
    if Tp != T:
        pad_cfg = ((0, 0), (0, Tp - T), (0, 0))
        q = jnp.pad(q, pad_cfg)
        k = jnp.pad(k, pad_cfg)
        v = jnp.pad(v, pad_cfg)
    N = Tp // chunk
    qc = q.reshape(BH, N, chunk, Dk) * (Dk ** -0.5)
    kc = k.reshape(BH, N, chunk, Dk)
    vc = v.reshape(BH, N, chunk, Dv)
    kv = jnp.einsum('bncd,bnce->bnde', kc, vc)
    kv = jnp.cumsum(kv, axis=1)
    kv = jnp.concatenate([jnp.zeros_like(kv[:, :1]), kv[:, :-1]], axis=1)
    inter = jnp.einsum('bncd,bnde->bnce', qc, kv)
    s = jnp.einsum('bncd,bnkd->bnck', qc, kc)
    mask = jnp.tril(jnp.ones((chunk, chunk), dtype=bool))
    s = jnp.where(mask[None, None], s, 0.0)
    intra = jnp.einsum('bnck,bnke->bnce', s, vc)
    return (inter + intra).reshape(BH, Tp, Dv)[:, :T, :]


# ----------------------------------------------------------------------------
# Glue: projections, RoPE (Gemma convention), Hedgehog feature map
# ----------------------------------------------------------------------------
def rope_cos_sin(T, head_dim, theta=10000.0):
    inv_freq = 1.0 / (theta ** (jnp.arange(0, head_dim, 2, dtype=jnp.float32)
                                / head_dim))
    t = jnp.arange(T, dtype=jnp.float32)
    freqs = jnp.outer(t, inv_freq)                 # (T, head_dim//2)
    return jnp.cos(freqs), jnp.sin(freqs)


def apply_rotary_emb(x, cos, sin):
    # x: (B, T, H, D) — first half = real, second half = imag
    d2 = x.shape[-1] // 2
    x1, x2 = x[..., :d2], x[..., d2:]
    c = cos[None, :, None, :]
    s = sin[None, :, None, :]
    return jnp.concatenate([x1 * c - x2 * s, x1 * s + x2 * c], axis=-1)


def hedgehog_feature_map(x, w):
    # x: (B, H, T, D), w: (H, D, F) -> (B, H, T, 2F)
    y = jnp.einsum('bhtd,hdf->bhtf', x, w)
    return jnp.concatenate(
        [jax.nn.softmax(y, axis=-1), jax.nn.softmax(-y, axis=-1)], axis=-1)


def gemma_linear_attention_forward(hidden_states, params, *, num_heads,
                                   num_kv_heads, head_dim, use_pallas=True,
                                   max_chunks_per_step=8):
    B, T, _ = hidden_states.shape
    q = hidden_states @ params['wq']               # (B, T, H*D)
    k = hidden_states @ params['wk']               # (B, T, Hkv*D)
    v = hidden_states @ params['wv']               # (B, T, Hkv*D)

    q = q.reshape(B, T, num_heads, head_dim)
    k = k.reshape(B, T, num_kv_heads, head_dim)
    v = v.reshape(B, T, num_kv_heads, head_dim)

    cos, sin = rope_cos_sin(T, head_dim)
    q = apply_rotary_emb(q, cos, sin)
    k = apply_rotary_emb(k, cos, sin)

    group = num_heads // num_kv_heads
    if group != 1:
        k = jnp.repeat(k, group, axis=2)
        v = jnp.repeat(v, group, axis=2)

    q = q.transpose(0, 2, 1, 3)                    # (B, H, T, D)
    k = k.transpose(0, 2, 1, 3)
    v = v.transpose(0, 2, 1, 3)

    q = hedgehog_feature_map(q, params['fq'])      # (B, H, T, 2F)
    k = hedgehog_feature_map(k, params['fk'])      # (B, H, T, 2F)

    H = num_heads
    Dk = q.shape[-1]
    Dv = head_dim

    if use_pallas:
        # Pack G heads per grid step so the kernel output block is lane-dense
        # (G*Dv lanes, = 128 when head_dim divides 128 and H allows it).
        G = min(H, max(1, 128 // Dv))
        while H % G != 0:
            G -= 1
        Hg = H // G
        qf = q.reshape(B * Hg, G, T, Dk)
        kf = k.reshape(B * Hg, G, T, Dk)
        vf = v.reshape(B * Hg, G, T, Dv)
        o = chunk_linear_attn_pallas(qf, kf, vf,
                                     max_chunks_per_step=max_chunks_per_step)
        o = o.reshape(B, Hg, T, G, Dv).transpose(0, 2, 1, 3, 4)
        o = o.reshape(B, T, H * Dv)
    else:
        qf = q.reshape(B * H, T, Dk)
        kf = k.reshape(B * H, T, Dk)
        vf = v.reshape(B * H, T, Dv)
        o = chunk_linear_attn_ref(qf, kf, vf)
        o = o.reshape(B, H, T, Dv).transpose(0, 2, 1, 3).reshape(B, T, H * Dv)

    return o @ params['wo']


# ----------------------------------------------------------------------------
if __name__ == "__main__":
    B, T, hidden = 2, 300, 64
    num_heads, num_kv_heads, head_dim = 4, 2, 32
    feature_dim = 64  # fixed by the module (HedgehogFeatureMap feature_dim=64)

    key = jax.random.PRNGKey(0)
    ks = jax.random.split(key, 7)
    x = jax.random.normal(ks[0], (B, T, hidden), dtype=jnp.float32)

    params = {
        'wq': 0.02 * jax.random.normal(ks[1], (hidden, num_heads * head_dim),
                                       dtype=jnp.float32),
        'wk': 0.02 * jax.random.normal(ks[2], (hidden, num_kv_heads * head_dim),
                                       dtype=jnp.float32),
        'wv': 0.02 * jax.random.normal(ks[3], (hidden, num_kv_heads * head_dim),
                                       dtype=jnp.float32),
        'wo': 0.02 * jax.random.normal(ks[4], (num_heads * head_dim, hidden),
                                       dtype=jnp.float32),
        'fq': (head_dim ** -0.5) * jax.random.normal(
            ks[5], (num_heads, head_dim, feature_dim), dtype=jnp.float32),
        'fk': (head_dim ** -0.5) * jax.random.normal(
            ks[6], (num_heads, head_dim, feature_dim), dtype=jnp.float32),
    }

    fwd = functools.partial(gemma_linear_attention_forward,
                            num_heads=num_heads, num_kv_heads=num_kv_heads,
                            head_dim=head_dim)

    # max_chunks_per_step=2 so this small test exercises both the in-kernel
    # multi-chunk loop and the cross-grid-step kv-state carry.
    out_pallas = jax.jit(lambda h, p: fwd(h, p, use_pallas=True,
                                          max_chunks_per_step=2))(x, params)
    out_pallas = jax.block_until_ready(out_pallas)

    out_ref = jax.jit(lambda h, p: fwd(h, p, use_pallas=False))(x, params)
    out_ref = jax.block_until_ready(out_ref)

    assert out_pallas.shape == (B, T, hidden)
    assert np.allclose(np.asarray(out_pallas), np.asarray(out_ref),
                       atol=2e-2, rtol=2e-2), "mismatch vs pure-JAX reference"

    print("KERNEL_OK")
</pallas_src>

<mosaic_0001>
module attributes {stable_mosaic.version = 11 : i64} {
  func.func @_chunk_linear_attn_kernel(%arg0: i32, %arg1: i32, %arg2: memref<1x4x256x128xbf16, #tpu.memory_space<vmem>>, %arg3: memref<1x4x256x128xbf16, #tpu.memory_space<vmem>>, %arg4: memref<1x4x256x32xbf16, #tpu.memory_space<vmem>>, %arg5: memref<1x256x128xf32, #tpu.memory_space<vmem>>, %arg6: memref<4x128x32xf32, #tpu.memory_space<vmem>>) attributes {dimension_semantics = [#tpu.dimension_semantics<parallel>, #tpu.dimension_semantics<arbitrary>], iteration_bounds = array<i64: 2, 2>, scalar_prefetch = 0 : i64, scratch_operands = 1 : i64, tpu.core_type = #tpu.core_type<tc>, window_params = [{transform_indices = @transform_0, window_bounds = array<i64: 1, 4, 256, 128>}, {transform_indices = @transform_1, window_bounds = array<i64: 1, 4, 256, 128>}, {transform_indices = @transform_2, window_bounds = array<i64: 1, 4, 256, 32>}, {transform_indices = @transform_3, window_bounds = array<i64: 1, 256, 128>}]} {
    %c0_i32 = arith.constant 0 : i32
    %0 = arith.cmpi eq, %arg1, %c0_i32 : i32
    %1 = arith.extui %0 : i1 to i32
    %c0_i32_0 = arith.constant 0 : i32
    %2 = arith.cmpi ne, %1, %c0_i32_0 : i32
    scf.if %2 {
      %cst_146 = arith.constant 0.000000e+00 : f32
      %208 = vector.broadcast %cst_146 : f32 to vector<4x128x32xf32>
      %c0_147 = arith.constant 0 : index
      %c0_148 = arith.constant 0 : index
      %c0_149 = arith.constant 0 : index
      %209 = vector.load %arg6[%c0_147, %c0_148, %c0_149] : memref<4x128x32xf32, #tpu.memory_space<vmem>>, vector<4x128x32xf32>
      tpu.vector_store %arg6[%c0_147, %c0_148, %c0_149], %208 {strides = array<i32>} : memref<4x128x32xf32, #tpu.memory_space<vmem>>, vector<4x128x32xf32>,
    } else {
    }
    %3 = tpu.iota {dimensions = array<i32: 0>} : vector<128x128xi32>
    %4 = tpu.iota {dimensions = array<i32: 1>} : vector<128x128xi32>
    %5 = arith.cmpi sge, %3, %4 : vector<128x128xi32>
    %c0 = arith.constant 0 : index
    %c0_1 = arith.constant 0 : index
    %c0_2 = arith.constant 0 : index
    %6 = vector.load %arg6[%c0, %c0_1, %c0_2] : memref<4x128x32xf32, #tpu.memory_space<vmem>>, vector<1x128x32xf32>
    %7 = vector.shape_cast %6 : vector<1x128x32xf32> to vector<128x32xf32>
    %c1 = arith.constant 1 : index
    %c0_3 = arith.constant 0 : index
    %c0_4 = arith.constant 0 : index
    %8 = vector.load %arg6[%c1, %c0_3, %c0_4] : memref<4x128x32xf32, #tpu.memory_space<vmem>>, vector<1x128x32xf32>
    %9 = vector.shape_cast %8 : vector<1x128x32xf32> to vector<128x32xf32>
    %c2 = arith.constant 2 : index
    %c0_5 = arith.constant 0 : index
    %c0_6 = arith.constant 0 : index
    %10 = vector.load %arg6[%c2, %c0_5, %c0_6] : memref<4x128x32xf32, #tpu.memory_space<vmem>>, vector<1x128x32xf32>
    %11 = vector.shape_cast %10 : vector<1x128x32xf32> to vector<128x32xf32>
    %c3 = arith.constant 3 : index
    %c0_7 = arith.constant 0 : index
    %c0_8 = arith.constant 0 : index
    %12 = vector.load %arg6[%c3, %c0_7, %c0_8] : memref<4x128x32xf32, #tpu.memory_space<vmem>>, vector<1x128x32xf32>
    %13 = vector.shape_cast %12 : vector<1x128x32xf32> to vector<128x32xf32>
    %c0_i32_9 = arith.constant 0 : i32
    %c128_i32 = arith.constant 128 : i32
    %14 = arith.muli %c0_i32_9, %c128_i32 : i32
    %15 = tpu.assume_multiple %14, 128 : i32
    %c0_10 = arith.constant 0 : index
    %c0_11 = arith.constant 0 : index
    %16 = arith.index_cast %15 : i32 to index
    %c0_12 = arith.constant 0 : index
    %17 = vector.load %arg2[%c0_10, %c0_11, %16, %c0_12] : memref<1x4x256x128xbf16, #tpu.memory_space<vmem>>, vector<1x1x128x128xbf16>
    %18 = vector.shape_cast %17 : vector<1x1x128x128xbf16> to vector<128x128xbf16>
    %c0_13 = arith.constant 0 : index
    %c0_14 = arith.constant 0 : index
    %19 = arith.index_cast %15 : i32 to index
    %c0_15 = arith.constant 0 : index
    %20 = vector.load %arg3[%c0_13, %c0_14, %19, %c0_15] : memref<1x4x256x128xbf16, #tpu.memory_space<vmem>>, vector<1x1x128x128xbf16>
    %21 = vector.shape_cast %20 : vector<1x1x128x128xbf16> to vector<128x128xbf16>
    %c0_16 = arith.constant 0 : index
    %c0_17 = arith.constant 0 : index
    %22 = arith.index_cast %15 : i32 to index
    %c0_18 = arith.constant 0 : index
    %23 = vector.load %arg4[%c0_16, %c0_17, %22, %c0_18] : memref<1x4x256x32xbf16, #tpu.memory_space<vmem>>, vector<1x1x128x32xbf16>
    %24 = vector.shape_cast %23 : vector<1x1x128x32xbf16> to vector<128x32xbf16>
    %25 = arith.truncf %7 : vector<128x32xf32> to vector<128x32xbf16>
    %cst = arith.constant dense<0.000000e+00> : vector<128x32xf32>
    %26 = tpu.matmul %18, %25, %cst {dimension_numbers = #tpu.dot_dimension_numbers<[1], [0], [0], [1], [0, 0, 1, 1], [], []>} : vector<128x128xbf16>, vector<128x32xbf16>, vector<128x32xf32> -> vector<128x32xf32>
    %cst_19 = arith.constant dense<0.000000e+00> : vector<128x128xf32>
    %27 = tpu.matmul %18, %21, %cst_19 {dimension_numbers = #tpu.dot_dimension_numbers<[1], [1], [0], [0], [0, 0, 1, 0], [], []>} : vector<128x128xbf16>, vector<128x128xbf16>, vector<128x128xf32> -> vector<128x128xf32>
    %cst_20 = arith.constant 0.000000e+00 : f32
    %28 = vector.broadcast %cst_20 : f32 to vector<128x128xf32>
    %29 = arith.select %5, %27, %28 : vector<128x128xi1>, vector<128x128xf32>
    %30 = arith.truncf %29 : vector<128x128xf32> to vector<128x128xbf16>
    %cst_21 = arith.constant dense<0.000000e+00> : vector<128x32xf32>
    %31 = tpu.matmul %30, %24, %cst_21 {dimension_numbers = #tpu.dot_dimension_numbers<[1], [0], [0], [1], [0, 0, 1, 1], [], []>} : vector<128x128xbf16>, vector<128x32xbf16>, vector<128x32xf32> -> vector<128x32xf32>
    %32 = arith.addf %26, %31 : vector<128x32xf32>
    %cst_22 = arith.constant 0.0883883461 : f32
    %33 = vector.broadcast %cst_22 : f32 to vector<128x32xf32>
    %34 = arith.mulf %32, %33 : vector<128x32xf32>
    %cst_23 = arith.constant dense<0.000000e+00> : vector<128x32xf32>
    %35 = tpu.matmul %21, %24, %cst_23 {dimension_numbers = #tpu.dot_dimension_numbers<[0], [0], [1], [1], [0, 1, 1, 1], [], []>} : vector<128x128xbf16>, vector<128x32xbf16>, vector<128x32xf32> -> vector<128x32xf32>
    %36 = arith.addf %7, %35 : vector<128x32xf32>
    %c0_24 = arith.constant 0 : index
    %c1_25 = arith.constant 1 : index
    %37 = arith.index_cast %15 : i32 to index
    %c0_26 = arith.constant 0 : index
    %38 = vector.load %arg2[%c0_24, %c1_25, %37, %c0_26] : memref<1x4x256x128xbf16, #tpu.memory_space<vmem>>, vector<1x1x128x128xbf16>
    %39 = vector.shape_cast %38 : vector<1x1x128x128xbf16> to vector<128x128xbf16>
    %c0_27 = arith.constant 0 : index
    %c1_28 = arith.constant 1 : index
    %40 = arith.index_cast %15 : i32 to index
    %c0_29 = arith.constant 0 : index
    %41 = vector.load %arg3[%c0_27, %c1_28, %40, %c0_29] : memref<1x4x256x128xbf16, #tpu.memory_space<vmem>>, vector<1x1x128x128xbf16>
    %42 = vector.shape_cast %41 : vector<1x1x128x128xbf16> to vector<128x128xbf16>
    %c0_30 = arith.constant 0 : index
    %c1_31 = arith.constant 1 : index
    %43 = arith.index_cast %15 : i32 to index
    %c0_32 = arith.constant 0 : index
    %44 = vector.load %arg4[%c0_30, %c1_31, %43, %c0_32] : memref<1x4x256x32xbf16, #tpu.memory_space<vmem>>, vector<1x1x128x32xbf16>
    %45 = vector.shape_cast %44 : vector<1x1x128x32xbf16> to vector<128x32xbf16>
    %46 = arith.truncf %9 : vector<128x32xf32> to vector<128x32xbf16>
    %cst_33 = arith.constant dense<0.000000e+00> : vector<128x32xf32>
    %47 = tpu.matmul %39, %46, %cst_33 {dimension_numbers = #tpu.dot_dimension_numbers<[1], [0], [0], [1], [0, 0, 1, 1], [], []>} : vector<128x128xbf16>, vector<128x32xbf16>, vector<128x32xf32> -> vector<128x32xf32>
    %cst_34 = arith.constant dense<0.000000e+00> : vector<128x128xf32>
    %48 = tpu.matmul %39, %42, %cst_34 {dimension_numbers = #tpu.dot_dimension_numbers<[1], [1], [0], [0], [0, 0, 1, 0], [], []>} : vector<128x128xbf16>, vector<128x128xbf16>, vector<128x128xf32> -> vector<128x128xf32>
    %cst_35 = arith.constant 0.000000e+00 : f32
    %49 = vector.broadcast %cst_35 : f32 to vector<128x128xf32>
    %50 = arith.select %5, %48, %49 : vector<128x128xi1>, vector<128x128xf32>
    %51 = arith.truncf %50 : vector<128x128xf32> to vector<128x128xbf16>
    %cst_36 = arith.constant dense<0.000000e+00> : vector<128x32xf32>
    %52 = tpu.matmul %51, %45, %cst_36 {dimension_numbers = #tpu.dot_dimension_numbers<[1], [0], [0], [1], [0, 0, 1, 1], [], []>} : vector<128x128xbf16>, vector<128x32xbf16>, vector<128x32xf32> -> vector<128x32xf32>
    %53 = arith.addf %47, %52 : vector<128x32xf32>
    %cst_37 = arith.constant 0.0883883461 : f32
    %54 = vector.broadcast %cst_37 : f32 to vector<128x32xf32>
    %55 = arith.mulf %53, %54 : vector<128x32xf32>
    %cst_38 = arith.constant dense<0.000000e+00> : vector<128x32xf32>
    %56 = tpu.matmul %42, %45, %cst_38 {dimension_numbers = #tpu.dot_dimension_numbers<[0], [0], [1], [1], [0, 1, 1, 1], [], []>} : vector<128x128xbf16>, vector<128x32xbf16>, vector<128x32xf32> -> vector<128x32xf32>
    %57 = arith.addf %9, %56 : vector<128x32xf32>
    %c0_39 = arith.constant 0 : index
    %c2_40 = arith.constant 2 : index
    %58 = arith.index_cast %15 : i32 to index
    %c0_41 = arith.constant 0 : index
    %59 = vector.load %arg2[%c0_39, %c2_40, %58, %c0_41] : memref<1x4x256x128xbf16, #tpu.memory_space<vmem>>, vector<1x1x128x128xbf16>
    %60 = vector.shape_cast %59 : vector<1x1x128x128xbf16> to vector<128x128xbf16>
    %c0_42 = arith.constant 0 : index
    %c2_43 = arith.constant 2 : index
    %61 = arith.index_cast %15 : i32 to index
    %c0_44 = arith.constant 0 : index
    %62 = vector.load %arg3[%c0_42, %c2_43, %61, %c0_44] : memref<1x4x256x128xbf16, #tpu.memory_space<vmem>>, vector<1x1x128x128xbf16>
    %63 = vector.shape_cast %62 : vector<1x1x128x128xbf16> to vector<128x128xbf16>
    %c0_45 = arith.constant 0 : index
    %c2_46 = arith.constant 2 : index
    %64 = arith.index_cast %15 : i32 to index
    %c0_47 = arith.constant 0 : index
    %65 = vector.load %arg4[%c0_45, %c2_46, %64, %c0_47] : memref<1x4x256x32xbf16, #tpu.memory_space<vmem>>, vector<1x1x128x32xbf16>
    %66 = vector.shape_cast %65 : vector<1x1x128x32xbf16> to vector<128x32xbf16>
    %67 = arith.truncf %11 : vector<128x32xf32> to vector<128x32xbf16>
    %cst_48 = arith.constant dense<0.000000e+00> : vector<128x32xf32>
    %68 = tpu.matmul %60, %67, %cst_48 {dimension_numbers = #tpu.dot_dimension_numbers<[1], [0], [0], [1], [0, 0, 1, 1], [], []>} : vector<128x128xbf16>, vector<128x32xbf16>, vector<128x32xf32> -> vector<128x32xf32>
    %cst_49 = arith.constant dense<0.000000e+00> : vector<128x128xf32>
    %69 = tpu.matmul %60, %63, %cst_49 {dimension_numbers = #tpu.dot_dimension_numbers<[1], [1], [0], [0], [0, 0, 1, 0], [], []>} : vector<128x128xbf16>, vector<128x128xbf16>, vector<128x128xf32> -> vector<128x128xf32>
    %cst_50 = arith.constant 0.000000e+00 : f32
    %70 = vector.broadcast %cst_50 : f32 to vector<128x128xf32>
    %71 = arith.select %5, %69, %70 : vector<128x128xi1>, vector<128x128xf32>
    %72 = arith.truncf %71 : vector<128x128xf32> to vector<128x128xbf16>
    %cst_51 = arith.constant dense<0.000000e+00> : vector<128x32xf32>
    %73 = tpu.matmul %72, %66, %cst_51 {dimension_numbers = #tpu.dot_dimension_numbers<[1], [0], [0], [1], [0, 0, 1, 1], [], []>} : vector<128x128xbf16>, vector<128x32xbf16>, vector<128x32xf32> -> vector<128x32xf32>
    %74 = arith.addf %68, %73 : vector<128x32xf32>
    %cst_52 = arith.constant 0.0883883461 : f32
    %75 = vector.broadcast %cst_52 : f32 to vector<128x32xf32>
    %76 = arith.mulf %74, %75 : vector<128x32xf32>
    %cst_53 = arith.constant dense<0.000000e+00> : vector<128x32xf32>
    %77 = tpu.matmul %63, %66, %cst_53 {dimension_numbers = #tpu.dot_dimension_numbers<[0], [0], [1], [1], [0, 1, 1, 1], [], []>} : vector<128x128xbf16>, vector<128x32xbf16>, vector<128x32xf32> -> vector<128x32xf32>
    %78 = arith.addf %11, %77 : vector<128x32xf32>
    %c0_54 = arith.constant 0 : index
    %c3_55 = arith.constant 3 : index
    %79 = arith.index_cast %15 : i32 to index
    %c0_56 = arith.constant 0 : index
    %80 = vector.load %arg2[%c0_54, %c3_55, %79, %c0_56] : memref<1x4x256x128xbf16, #tpu.memory_space<vmem>>, vector<1x1x128x128xbf16>
    %81 = vector.shape_cast %80 : vector<1x1x128x128xbf16> to vector<128x128xbf16>
    %c0_57 = arith.constant 0 : index
    %c3_58 = arith.constant 3 : index
    %82 = arith.index_cast %15 : i32 to index
    %c0_59 = arith.constant 0 : index
    %83 = vector.load %arg3[%c0_57, %c3_58, %82, %c0_59] : memref<1x4x256x128xbf16, #tpu.memory_space<vmem>>, vector<1x1x128x128xbf16>
    %84 = vector.shape_cast %83 : vector<1x1x128x128xbf16> to vector<128x128xbf16>
    %c0_60 = arith.constant 0 : index
    %c3_61 = arith.constant 3 : index
    %85 = arith.index_cast %15 : i32 to index
    %c0_62 = arith.constant 0 : index
    %86 = vector.load %arg4[%c0_60, %c3_61, %85, %c0_62] : memref<1x4x256x32xbf16, #tpu.memory_space<vmem>>, vector<1x1x128x32xbf16>
    %87 = vector.shape_cast %86 : vector<1x1x128x32xbf16> to vector<128x32xbf16>
    %88 = arith.truncf %13 : vector<128x32xf32> to vector<128x32xbf16>
    %cst_63 = arith.constant dense<0.000000e+00> : vector<128x32xf32>
    %89 = tpu.matmul %81, %88, %cst_63 {dimension_numbers = #tpu.dot_dimension_numbers<[1], [0], [0], [1], [0, 0, 1, 1], [], []>} : vector<128x128xbf16>, vector<128x32xbf16>, vector<128x32xf32> -> vector<128x32xf32>
    %cst_64 = arith.constant dense<0.000000e+00> : vector<128x128xf32>
    %90 = tpu.matmul %81, %84, %cst_64 {dimension_numbers = #tpu.dot_dimension_numbers<[1], [1], [0], [0], [0, 0, 1, 0], [], []>} : vector<128x128xbf16>, vector<128x128xbf16>, vector<128x128xf32> -> vector<128x128xf32>
    %cst_65 = arith.constant 0.000000e+00 : f32
    %91 = vector.broadcast %cst_65 : f32 to vector<128x128xf32>
    %92 = arith.select %5, %90, %91 : vector<128x128xi1>, vector<128x128xf32>
    %93 = arith.truncf %92 : vector<128x128xf32> to vector<128x128xbf16>
    %cst_66 = arith.constant dense<0.000000e+00> : vector<128x32xf32>
    %94 = tpu.matmul %93, %87, %cst_66 {dimension_numbers = #tpu.dot_dimension_numbers<[1], [0], [0], [1], [0, 0, 1, 1], [], []>} : vector<128x128xbf16>, vector<128x32xbf16>, vector<128x32xf32> -> vector<128x32xf32>
    %95 = arith.addf %89, %94 : vector<128x32xf32>
    %cst_67 = arith.constant 0.0883883461 : f32
    %96 = vector.broadcast %cst_67 : f32 to vector<128x32xf32>
    %97 = arith.mulf %95, %96 : vector<128x32xf32>
    %cst_68 = arith.constant dense<0.000000e+00> : vector<128x32xf32>
    %98 = tpu.matmul %84, %87, %cst_68 {dimension_numbers = #tpu.dot_dimension_numbers<[0], [0], [1], [1], [0, 1, 1, 1], [], []>} : vector<128x128xbf16>, vector<128x32xbf16>, vector<128x32xf32> -> vector<128x32xf32>
    %99 = arith.addf %13, %98 : vector<128x32xf32>
    %100 = tpu.concatenate %34, %55, %76, %97 in 1 : vector<128x32xf32>, vector<128x32xf32>, vector<128x32xf32>, vector<128x32xf32> -> vector<128x128xf32>
    %c0_69 = arith.constant 0 : index
    %101 = arith.index_cast %15 : i32 to index
    %c0_70 = arith.constant 0 : index
    %102 = vector.load %arg5[%c0_69, %101, %c0_70] : memref<1x256x128xf32, #tpu.memory_space<vmem>>, vector<1x128x128xf32>
    %103 = vector.shape_cast %102 : vector<1x128x128xf32> to vector<128x128xf32>
    %104 = vector.shape_cast %100 : vector<128x128xf32> to vector<1x128x128xf32>
    tpu.vector_store %arg5[%c0_69, %101, %c0_70], %104 {strides = array<i32>} : memref<1x256x128xf32, #tpu.memory_space<vmem>>, vector<1x128x128xf32>,
    %c1_i32 = arith.constant 1 : i32
    %c128_i32_71 = arith.constant 128 : i32
    %105 = arith.muli %c1_i32, %c128_i32_71 : i32
    %106 = tpu.assume_multiple %105, 128 : i32
    %c0_72 = arith.constant 0 : index
    %c0_73 = arith.constant 0 : index
    %107 = arith.index_cast %106 : i32 to index
    %c0_74 = arith.constant 0 : index
    %108 = vector.load %arg2[%c0_72, %c0_73, %107, %c0_74] : memref<1x4x256x128xbf16, #tpu.memory_space<vmem>>, vector<1x1x128x128xbf16>
    %109 = vector.shape_cast %108 : vector<1x1x128x128xbf16> to vector<128x128xbf16>
    %c0_75 = arith.constant 0 : index
    %c0_76 = arith.constant 0 : index
    %110 = arith.index_cast %106 : i32 to index
    %c0_77 = arith.constant 0 : index
    %111 = vector.load %arg3[%c0_75, %c0_76, %110, %c0_77] : memref<1x4x256x128xbf16, #tpu.memory_space<vmem>>, vector<1x1x128x128xbf16>
    %112 = vector.shape_cast %111 : vector<1x1x128x128xbf16> to vector<128x128xbf16>
    %c0_78 = arith.constant 0 : index
    %c0_79 = arith.constant 0 : index
    %113 = arith.index_cast %106 : i32 to index
    %c0_80 = arith.constant 0 : index
    %114 = vector.load %arg4[%c0_78, %c0_79, %113, %c0_80] : memref<1x4x256x32xbf16, #tpu.memory_space<vmem>>, vector<1x1x128x32xbf16>
    %115 = vector.shape_cast %114 : vector<1x1x128x32xbf16> to vector<128x32xbf16>
    %116 = arith.truncf %36 : vector<128x32xf32> to vector<128x32xbf16>
    %cst_81 = arith.constant dense<0.000000e+00> : vector<128x32xf32>
    %117 = tpu.matmul %109, %116, %cst_81 {dimension_numbers = #tpu.dot_dimension_numbers<[1], [0], [0], [1], [0, 0, 1, 1], [], []>} : vector<128x128xbf16>, vector<128x32xbf16>, vector<128x32xf32> -> vector<128x32xf32>
    %cst_82 = arith.constant dense<0.000000e+00> : vector<128x128xf32>
    %118 = tpu.matmul %109, %112, %cst_82 {dimension_numbers = #tpu.dot_dimension_numbers<[1], [1], [0], [0], [0, 0, 1, 0], [], []>} : vector<128x128xbf16>, vector<128x128xbf16>, vector<128x128xf32> -> vector<128x128xf32>
    %cst_83 = arith.constant 0.000000e+00 : f32
    %119 = vector.broadcast %cst_83 : f32 to vector<128x128xf32>
    %120 = arith.select %5, %118, %119 : vector<128x128xi1>, vector<128x128xf32>
    %121 = arith.truncf %120 : vector<128x128xf32> to vector<128x128xbf16>
    %cst_84 = arith.constant dense<0.000000e+00> : vector<128x32xf32>
    %122 = tpu.matmul %121, %115, %cst_84 {dimension_numbers = #tpu.dot_dimension_numbers<[1], [0], [0], [1], [0, 0, 1, 1], [], []>} : vector<128x128xbf16>, vector<128x32xbf16>, vector<128x32xf32> -> vector<128x32xf32>
    %123 = arith.addf %117, %122 : vector<128x32xf32>
    %cst_85 = arith.constant 0.0883883461 : f32
    %124 = vector.broadcast %cst_85 : f32 to vector<128x32xf32>
    %125 = arith.mulf %123, %124 : vector<128x32xf32>
    %cst_86 = arith.constant dense<0.000000e+00> : vector<128x32xf32>
    %126 = tpu.matmul %112, %115, %cst_86 {dimension_numbers = #tpu.dot_dimension_numbers<[0], [0], [1], [1], [0, 1, 1, 1], [], []>} : vector<128x128xbf16>, vector<128x32xbf16>, vector<128x32xf32> -> vector<128x32xf32>
    %127 = arith.addf %36, %126 : vector<128x32xf32>
    %c0_87 = arith.constant 0 : index
    %c1_88 = arith.constant 1 : index
    %128 = arith.index_cast %106 : i32 to index
    %c0_89 = arith.constant 0 : index
    %129 = vector.load %arg2[%c0_87, %c1_88, %128, %c0_89] : memref<1x4x256x128xbf16, #tpu.memory_space<vmem>>, vector<1x1x128x128xbf16>
    %130 = vector.shape_cast %129 : vector<1x1x128x128xbf16> to vector<128x128xbf16>
    %c0_90 = arith.constant 0 : index
    %c1_91 = arith.constant 1 : index
    %131 = arith.index_cast %106 : i32 to index
    %c0_92 = arith.constant 0 : index
    %132 = vector.load %arg3[%c0_90, %c1_91, %131, %c0_92] : memref<1x4x256x128xbf16, #tpu.memory_space<vmem>>, vector<1x1x128x128xbf16>
    %133 = vector.shape_cast %132 : vector<1x1x128x128xbf16> to vector<128x128xbf16>
    %c0_93 = arith.constant 0 : index
    %c1_94 = arith.constant 1 : index
    %134 = arith.index_cast %106 : i32 to index
    %c0_95 = arith.constant 0 : index
    %135 = vector.load %arg4[%c0_93, %c1_94, %134, %c0_95] : memref<1x4x256x32xbf16, #tpu.memory_space<vmem>>, vector<1x1x128x32xbf16>
    %136 = vector.shape_cast %135 : vector<1x1x128x32xbf16> to vector<128x32xbf16>
    %137 = arith.truncf %57 : vector<128x32xf32> to vector<128x32xbf16>
    %cst_96 = arith.constant dense<0.000000e+00> : vector<128x32xf32>
    %138 = tpu.matmul %130, %137, %cst_96 {dimension_numbers = #tpu.dot_dimension_numbers<[1], [0], [0], [1], [0, 0, 1, 1], [], []>} : vector<128x128xbf16>, vector<128x32xbf16>, vector<128x32xf32> -> vector<128x32xf32>
    %cst_97 = arith.constant dense<0.000000e+00> : vector<128x128xf32>
    %139 = tpu.matmul %130, %133, %cst_97 {dimension_numbers = #tpu.dot_dimension_numbers<[1], [1], [0], [0], [0, 0, 1, 0], [], []>} : vector<128x128xbf16>, vector<128x128xbf16>, vector<128x128xf32> -> vector<128x128xf32>
    %cst_98 = arith.constant 0.000000e+00 : f32
    %140 = vector.broadcast %cst_98 : f32 to vector<128x128xf32>
    %141 = arith.select %5, %139, %140 : vector<128x128xi1>, vector<128x128xf32>
    %142 = arith.truncf %141 : vector<128x128xf32> to vector<128x128xbf16>
    %cst_99 = arith.constant dense<0.000000e+00> : vector<128x32xf32>
    %143 = tpu.matmul %142, %136, %cst_99 {dimension_numbers = #tpu.dot_dimension_numbers<[1], [0], [0], [1], [0, 0, 1, 1], [], []>} : vector<128x128xbf16>, vector<128x32xbf16>, vector<128x32xf32> -> vector<128x32xf32>
    %144 = arith.addf %138, %143 : vector<128x32xf32>
    %cst_100 = arith.constant 0.0883883461 : f32
    %145 = vector.broadcast %cst_100 : f32 to vector<128x32xf32>
    %146 = arith.mulf %144, %145 : vector<128x32xf32>
    %cst_101 = arith.constant dense<0.000000e+00> : vector<128x32xf32>
    %147 = tpu.matmul %133, %136, %cst_101 {dimension_numbers = #tpu.dot_dimension_numbers<[0], [0], [1], [1], [0, 1, 1, 1], [], []>} : vector<128x128xbf16>, vector<128x32xbf16>, vector<128x32xf32> -> vector<128x32xf32>
    %148 = arith.addf %57, %147 : vector<128x32xf32>
    %c0_102 = arith.constant 0 : index
    %c2_103 = arith.constant 2 : index
    %149 = arith.index_cast %106 : i32 to index
    %c0_104 = arith.constant 0 : index
    %150 = vector.load %arg2[%c0_102, %c2_103, %149, %c0_104] : memref<1x4x256x128xbf16, #tpu.memory_space<vmem>>, vector<1x1x128x128xbf16>
    %151 = vector.shape_cast %150 : vector<1x1x128x128xbf16> to vector<128x128xbf16>
    %c0_105 = arith.constant 0 : index
    %c2_106 = arith.constant 2 : index
    %152 = arith.index_cast %106 : i32 to index
    %c0_107 = arith.constant 0 : index
    %153 = vector.load %arg3[%c0_105, %c2_106, %152, %c0_107] : memref<1x4x256x128xbf16, #tpu.memory_space<vmem>>, vector<1x1x128x128xbf16>
    %154 = vector.shape_cast %153 : vector<1x1x128x128xbf16> to vector<128x128xbf16>
    %c0_108 = arith.constant 0 : index
    %c2_109 = arith.constant 2 : index
    %155 = arith.index_cast %106 : i32 to index
    %c0_110 = arith.constant 0 : index
    %156 = vector.load %arg4[%c0_108, %c2_109, %155, %c0_110] : memref<1x4x256x32xbf16, #tpu.memory_space<vmem>>, vector<1x1x128x32xbf16>
    %157 = vector.shape_cast %156 : vector<1x1x128x32xbf16> to vector<128x32xbf16>
    %158 = arith.truncf %78 : vector<128x32xf32> to vector<128x32xbf16>
    %cst_111 = arith.constant dense<0.000000e+00> : vector<128x32xf32>
    %159 = tpu.matmul %151, %158, %cst_111 {dimension_numbers = #tpu.dot_dimension_numbers<[1], [0], [0], [1], [0, 0, 1, 1], [], []>} : vector<128x128xbf16>, vector<128x32xbf16>, vector<128x32xf32> -> vector<128x32xf32>
    %cst_112 = arith.constant dense<0.000000e+00> : vector<128x128xf32>
    %160 = tpu.matmul %151, %154, %cst_112 {dimension_numbers = #tpu.dot_dimension_numbers<[1], [1], [0], [0], [0, 0, 1, 0], [], []>} : vector<128x128xbf16>, vector<128x128xbf16>, vector<128x128xf32> -> vector<128x128xf32>
    %cst_113 = arith.constant 0.000000e+00 : f32
    %161 = vector.broadcast %cst_113 : f32 to vector<128x128xf32>
    %162 = arith.select %5, %160, %161 : vector<128x128xi1>, vector<128x128xf32>
    %163 = arith.truncf %162 : vector<128x128xf32> to vector<128x128xbf16>
    %cst_114 = arith.constant dense<0.000000e+00> : vector<128x32xf32>
    %164 = tpu.matmul %163, %157, %cst_114 {dimension_numbers = #tpu.dot_dimension_numbers<[1], [0], [0], [1], [0, 0, 1, 1], [], []>} : vector<128x128xbf16>, vector<128x32xbf16>, vector<128x32xf32> -> vector<128x32xf32>
    %165 = arith.addf %159, %164 : vector<128x32xf32>
    %cst_115 = arith.constant 0.0883883461 : f32
    %166 = vector.broadcast %cst_115 : f32 to vector<128x32xf32>
    %167 = arith.mulf %165, %166 : vector<128x32xf32>
    %cst_116 = arith.constant dense<0.000000e+00> : vector<128x32xf32>
    %168 = tpu.matmul %154, %157, %cst_116 {dimension_numbers = #tpu.dot_dimension_numbers<[0], [0], [1], [1], [0, 1, 1, 1], [], []>} : vector<128x128xbf16>, vector<128x32xbf16>, vector<128x32xf32> -> vector<128x32xf32>
    %169 = arith.addf %78, %168 : vector<128x32xf32>
    %c0_117 = arith.constant 0 : index
    %c3_118 = arith.constant 3 : index
    %170 = arith.index_cast %106 : i32 to index
    %c0_119 = arith.constant 0 : index
    %171 = vector.load %arg2[%c0_117, %c3_118, %170, %c0_119] : memref<1x4x256x128xbf16, #tpu.memory_space<vmem>>, vector<1x1x128x128xbf16>
    %172 = vector.shape_cast %171 : vector<1x1x128x128xbf16> to vector<128x128xbf16>
    %c0_120 = arith.constant 0 : index
    %c3_121 = arith.constant 3 : index
    %173 = arith.index_cast %106 : i32 to index
    %c0_122 = arith.constant 0 : index
    %174 = vector.load %arg3[%c0_120, %c3_121, %173, %c0_122] : memref<1x4x256x128xbf16, #tpu.memory_space<vmem>>, vector<1x1x128x128xbf16>
    %175 = vector.shape_cast %174 : vector<1x1x128x128xbf16> to vector<128x128xbf16>
    %c0_123 = arith.constant 0 : index
    %c3_124 = arith.constant 3 : index
    %176 = arith.index_cast %106 : i32 to index
    %c0_125 = arith.constant 0 : index
    %177 = vector.load %arg4[%c0_123, %c3_124, %176, %c0_125] : memref<1x4x256x32xbf16, #tpu.memory_space<vmem>>, vector<1x1x128x32xbf16>
    %178 = vector.shape_cast %177 : vector<1x1x128x32xbf16> to vector<128x32xbf16>
    %179 = arith.truncf %99 : vector<128x32xf32> to vector<128x32xbf16>
    %cst_126 = arith.constant dense<0.000000e+00> : vector<128x32xf32>
    %180 = tpu.matmul %172, %179, %cst_126 {dimension_numbers = #tpu.dot_dimension_numbers<[1], [0], [0], [1], [0, 0, 1, 1], [], []>} : vector<128x128xbf16>, vector<128x32xbf16>, vector<128x32xf32> -> vector<128x32xf32>
    %cst_127 = arith.constant dense<0.000000e+00> : vector<128x128xf32>
    %181 = tpu.matmul %172, %175, %cst_127 {dimension_numbers = #tpu.dot_dimension_numbers<[1], [1], [0], [0], [0, 0, 1, 0], [], []>} : vector<128x128xbf16>, vector<128x128xbf16>, vector<128x128xf32> -> vector<128x128xf32>
    %cst_128 = arith.constant 0.000000e+00 : f32
    %182 = vector.broadcast %cst_128 : f32 to vector<128x128xf32>
    %183 = arith.select %5, %181, %182 : vector<128x128xi1>, vector<128x128xf32>
    %184 = arith.truncf %183 : vector<128x128xf32> to vector<128x128xbf16>
    %cst_129 = arith.constant dense<0.000000e+00> : vector<128x32xf32>
    %185 = tpu.matmul %184, %178, %cst_129 {dimension_numbers = #tpu.dot_dimension_numbers<[1], [0], [0], [1], [0, 0, 1, 1], [], []>} : vector<128x128xbf16>, vector<128x32xbf16>, vector<128x32xf32> -> vector<128x32xf32>
    %186 = arith.addf %180, %185 : vector<128x32xf32>
    %cst_130 = arith.constant 0.0883883461 : f32
    %187 = vector.broadcast %cst_130 : f32 to vector<128x32xf32>
    %188 = arith.mulf %186, %187 : vector<128x32xf32>
    %cst_131 = arith.constant dense<0.000000e+00> : vector<128x32xf32>
    %189 = tpu.matmul %175, %178, %cst_131 {dimension_numbers = #tpu.dot_dimension_numbers<[0], [0], [1], [1], [0, 1, 1, 1], [], []>} : vector<128x128xbf16>, vector<128x32xbf16>, vector<128x32xf32> -> vector<128x32xf32>
    %190 = arith.addf %99, %189 : vector<128x32xf32>
    %191 = tpu.concatenate %125, %146, %167, %188 in 1 : vector<128x32xf32>, vector<128x32xf32>, vector<128x32xf32>, vector<128x32xf32> -> vector<128x128xf32>
    %c0_132 = arith.constant 0 : index
    %192 = arith.index_cast %106 : i32 to index
    %c0_133 = arith.constant 0 : index
    %193 = vector.load %arg5[%c0_132, %192, %c0_133] : memref<1x256x128xf32, #tpu.memory_space<vmem>>, vector<1x128x128xf32>
    %194 = vector.shape_cast %193 : vector<1x128x128xf32> to vector<128x128xf32>
    %195 = vector.shape_cast %191 : vector<128x128xf32> to vector<1x128x128xf32>
    tpu.vector_store %arg5[%c0_132, %192, %c0_133], %195 {strides = array<i32>} : memref<1x256x128xf32, #tpu.memory_space<vmem>>, vector<1x128x128xf32>,
    %c2_i32 = arith.constant 2 : i32
    %c0_134 = arith.constant 0 : index
    %c0_135 = arith.constant 0 : index
    %c0_136 = arith.constant 0 : index
    %196 = vector.load %arg6[%c0_134, %c0_135, %c0_136] : memref<4x128x32xf32, #tpu.memory_space<vmem>>, vector<1x128x32xf32>
    %197 = vector.shape_cast %196 : vector<1x128x32xf32> to vector<128x32xf32>
    %198 = vector.shape_cast %127 : vector<128x32xf32> to vector<1x128x32xf32>
    tpu.vector_store %arg6[%c0_134, %c0_135, %c0_136], %198 {strides = array<i32>} : memref<4x128x32xf32, #tpu.memory_space<vmem>>, vector<1x128x32xf32>,
    %c1_137 = arith.constant 1 : index
    %c0_138 = arith.constant 0 : index
    %c0_139 = arith.constant 0 : index
    %199 = vector.load %arg6[%c1_137, %c0_138, %c0_139] : memref<4x128x32xf32, #tpu.memory_space<vmem>>, vector<1x128x32xf32>
    %200 = vector.shape_cast %199 : vector<1x128x32xf32> to vector<128x32xf32>
    %201 = vector.shape_cast %148 : vector<128x32xf32> to vector<1x128x32xf32>
    tpu.vector_store %arg6[%c1_137, %c0_138, %c0_139], %201 {strides = array<i32>} : memref<4x128x32xf32, #tpu.memory_space<vmem>>, vector<1x128x32xf32>,
    %c2_140 = arith.constant 2 : index
    %c0_141 = arith.constant 0 : index
    %c0_142 = arith.constant 0 : index
    %202 = vector.load %arg6[%c2_140, %c0_141, %c0_142] : memref<4x128x32xf32, #tpu.memory_space<vmem>>, vector<1x128x32xf32>
    %203 = vector.shape_cast %202 : vector<1x128x32xf32> to vector<128x32xf32>
    %204 = vector.shape_cast %169 : vector<128x32xf32> to vector<1x128x32xf32>
    tpu.vector_store %arg6[%c2_140, %c0_141, %c0_142], %204 {strides = array<i32>} : memref<4x128x32xf32, #tpu.memory_space<vmem>>, vector<1x128x32xf32>,
    %c3_143 = arith.constant 3 : index
    %c0_144 = arith.constant 0 : index
    %c0_145 = arith.constant 0 : index
    %205 = vector.load %arg6[%c3_143, %c0_144, %c0_145] : memref<4x128x32xf32, #tpu.memory_space<vmem>>, vector<1x128x32xf32>
    %206 = vector.shape_cast %205 : vector<1x128x32xf32> to vector<128x32xf32>
    %207 = vector.shape_cast %190 : vector<128x32xf32> to vector<1x128x32xf32>
    tpu.vector_store %arg6[%c3_143, %c0_144, %c0_145], %207 {strides = array<i32>} : memref<4x128x32xf32, #tpu.memory_space<vmem>>, vector<1x128x32xf32>,
    return
  }
  func.func @transform_0(%arg0: i32, %arg1: i32) -> (i32, i32, i32, i32) {
    %c0_i32 = arith.constant 0 : i32
    %c0_i32_0 = arith.constant 0 : i32
    %c0_i32_1 = arith.constant 0 : i32
    return %arg0, %c0_i32, %arg1, %c0_i32_0 : i32, i32, i32, i32
  }
  func.func @transform_1(%arg0: i32, %arg1: i32) -> (i32, i32, i32, i32) {
    %c0_i32 = arith.constant 0 : i32
    %c0_i32_0 = arith.constant 0 : i32
    %c0_i32_1 = arith.constant 0 : i32
    return %arg0, %c0_i32, %arg1, %c0_i32_0 : i32, i32, i32, i32
  }
  func.func @transform_2(%arg0: i32, %arg1: i32) -> (i32, i32, i32, i32) {
    %c0_i32 = arith.constant 0 : i32
    %c0_i32_0 = arith.constant 0 : i32
    %c0_i32_1 = arith.constant 0 : i32
    return %arg0, %c0_i32, %arg1, %c0_i32_0 : i32, i32, i32, i32
  }
  func.func @transform_3(%arg0: i32, %arg1: i32) -> (i32, i32, i32) {
    %c0_i32 = arith.constant 0 : i32
    %c0_i32_0 = arith.constant 0 : i32
    return %arg0, %arg1, %c0_i32 : i32, i32, i32
  }
}

</mosaic_0001>

<bundles_post_ra>
// kernel: _lambda_.1
= control target key start
LH: loop header
LB: loop body
LE: loop exit
PB: predicated region body
PF: predicated region fallthrough
CT: control target
= control target key end

     0   :  { %s8443_s12 = smov 0   ;;  %s8445_s13 = smov 0   ;;  %s11254_s0 = inlined_call_operand.vmem [shape: bf16[2,4,512,128], index: 0, kind: input, shape index: {}]   ;;  %s11255_s1 = inlined_call_operand.vmem [shape: bf16[2,4,512,128], index: 1, kind: input, shape index: {}]   ;;  %s11256_s2 = inlined_call_operand.vmem [shape: bf16[2,4,512,32], index: 2, kind: input, shape index: {}]   ;;  %s11257_s3 = inlined_call_operand.vmem [shape: f32[2,512,128], index: 3, kind: output, shape index: {}]  }
   0x1   :  { %s8447_s14 = smov 0   ;;  %s8449_s15 = smov 0  }
   0x2   :  { %s8451_s16 = smov 0   ;;  %s8453_s17 = smov 0  }
   0x3   :  { %s8455_s18 = smov 0  }
   0x4 LB: > { %s22_s19 = sadd.s32 1, %s8406_s16  ;;  %s25_s20 = sadd.s32 1, %s8410_s17  ;;  %s8414_s18 = sphi %s8455_s18, %s13_s18   ;;  %s8410_s17 = sphi %s8453_s17, %s11542_s17   ;;  %s8406_s16 = sphi %s8451_s16, %s11541_s16   ;;  %s8402_s15 = sphi %s8449_s15, %s11540_s15   ;;  %s8398_s14 = sphi %s8447_s14, %s11539_s14   ;;  %s8394_s13 = sphi %s8445_s13, %s11538_s13   ;;  %s8390_s12 = sphi %s8443_s12, %s11537_s12  }
   0x5   : > { %p23_p0 = scmp.ge.s32.totalorder %s22_s19, 2  ;;  %p41_p1 = scmp.ne.s32.totalorder %s8394_s13, %s8390_s12 }
   0x6   : > { %p42_p2 = scmp.eq.s32.totalorder %s8414_s18, 0  ;;  %s34_s25 = sadd.s32 1, %s8394_s13 }
   0x7   : > { %s11544_s19 = smov (%p23_p0, %s22_s19), 0  ;;  %s11546_s20 = smov (!%p23_p0, %s25_s20), %s8410_s17 }
   0x8   : > { %p8486_p3 = por %p42_p2, %p41_p1  ;;  %p27_p4 = scmp.ge.s32.totalorder %s11546_s20, 2 }
   0x9   : > { %s30_s22 = ssub.s32 %s8406_s16, %s11544_s19  ;;  %p6601_p6 = scmp.ge.s32.totalorder %s8414_s18, 4 }
   0xa   : > { %s11548_s20 = smov (%p27_p4, %s11546_s20), 0 }
   0xb   : > { %s29_s23 = ssub.s32 %s8410_s17, %s11548_s20  ;;  %151 = sbr.rel (%p6601_p6) target bundleno = 229 (0xe5), region = 16 }
   0xc   : > { %s31_s24 = sor.u32 %s30_s22, %s29_s23 }
   0xd   : > { %p32_p5 = scmp.eq.s32.totalorder %s31_s24, 0 }
   0xf   : > { %s8498_s26 = scalar_select %p32_p5, %s8394_s13, %s34_s25  }
  0x10   : > { %154 = sbr.rel (!%p8486_p3) target bundleno = 87 (0x57), region = 20  ;;  %s156_s27 = sand.u32 (%p8486_p3), 1, %s8394_s13  }
  0x11   : > { %s6603_s28 = sshll.u32 (%p8486_p3), %s8406_s16, 5  ;;  %s6602_s29 = sshll.u32 (%p8486_p3), %s156_s27, 9 }
  0x12   : > { %s6604_s30 = sshll.u32 (%p8486_p3), %s8410_s17, 8  ;;  %s8514_s9 = scalar_lea.vmem (%p8486_p3), [#allocation3], %s6602_s29 }
  0x13   : > { %s161_s4 = sadd.s32 (%p8486_p3), %s6604_s30, %s6603_s28 }
  0x14   : > { %s6605_s5 = sshll.u32 (%p8486_p3), %s161_s4, 2 }
  0x15   : > { %s8509_s8 = scalar_lea.vmem %s11254_s0, %s6605_s5 }
  0x16   : > { %v180_v0 = vld [vmem:[%s8509_s8] sm:$0xff]   ;;  %v184_v1 = vld [vmem:[%s8509_s8 + $0x8] sm:$0xff]   ;;  %v188_v2 = vld [vmem:[%s8509_s8 + $0x10] sm:$0xff]  }
  0x17   : > { %181 = vst [vmem:[%s8514_s9] sm:$0xff] %v180_v0   ;;  %v192_v3 = vld [vmem:[%s8509_s8 + $0x18] sm:$0xff]   ;;  %v196_v4 = vld [vmem:[%s8509_s8 + $0x20] sm:$0xff]   ;;  %v200_v5 = vld [vmem:[%s8509_s8 + $0x28] sm:$0xff]  }
  0x18   : > { %185 = vst [vmem:[%s8514_s9 + $0x8] sm:$0xff] %v184_v1   ;;  %v204_v6 = vld [vmem:[%s8509_s8 + $0x30] sm:$0xff]   ;;  %v208_v7 = vld [vmem:[%s8509_s8 + $0x38] sm:$0xff]   ;;  %v212_v8 = vld [vmem:[%s8509_s8 + $0x40] sm:$0xff]  }
  0x19   : > { %189 = vst [vmem:[%s8514_s9 + $0x10] sm:$0xff] %v188_v2   ;;  %v216_v9 = vld [vmem:[%s8509_s8 + $0x48] sm:$0xff]   ;;  %v220_v10 = vld [vmem:[%s8509_s8 + $0x50] sm:$0xff]   ;;  %v224_v11 = vld [vmem:[%s8509_s8 + $0x58] sm:$0xff]  }
  0x1a   : > { %193 = vst [vmem:[%s8514_s9 + $0x18] sm:$0xff] %v192_v3   ;;  %v228_v12 = vld [vmem:[%s8509_s8 + $0x60] sm:$0xff]   ;;  %v232_v13 = vld [vmem:[%s8509_s8 + $0x68] sm:$0xff]   ;;  %v236_v14 = vld [vmem:[%s8509_s8 + $0x70] sm:$0xff]  }
  0x1b   : > { %197 = vst [vmem:[%s8514_s9 + $0x20] sm:$0xff] %v196_v4   ;;  %v240_v15 = vld [vmem:[%s8509_s8 + $0x78] sm:$0xff]   ;;  %v244_v16 = vld [vmem:[%s8509_s8 + $0x100] sm:$0xff]   ;;  %v248_v17 = vld [vmem:[%s8509_s8 + $0x108] sm:$0xff]  }
  0x1c   : > { %201 = vst [vmem:[%s8514_s9 + $0x28] sm:$0xff] %v200_v5   ;;  %v252_v18 = vld [vmem:[%s8509_s8 + $0x110] sm:$0xff]   ;;  %v256_v19 = vld [vmem:[%s8509_s8 + $0x118] sm:$0xff]   ;;  %v260_v20 = vld [vmem:[%s8509_s8 + $0x120] sm:$0xff]  }
  0x1d   : > { %205 = vst [vmem:[%s8514_s9 + $0x30] sm:$0xff] %v204_v6   ;;  %v264_v21 = vld [vmem:[%s8509_s8 + $0x128] sm:$0xff]   ;;  %v268_v22 = vld [vmem:[%s8509_s8 + $0x130] sm:$0xff]   ;;  %v272_v23 = vld [vmem:[%s8509_s8 + $0x138] sm:$0xff]  }
  0x1e   : > { %209 = vst [vmem:[%s8514_s9 + $0x38] sm:$0xff] %v208_v7   ;;  %v276_v24 = vld [vmem:[%s8509_s8 + $0x140] sm:$0xff]   ;;  %v280_v25 = vld [vmem:[%s8509_s8 + $0x148] sm:$0xff]   ;;  %v284_v26 = vld [vmem:[%s8509_s8 + $0x150] sm:$0xff]  }
  0x1f   : > { %213 = vst [vmem:[%s8514_s9 + $0x40] sm:$0xff] %v212_v8   ;;  %v288_v27 = vld [vmem:[%s8509_s8 + $0x158] sm:$0xff]   ;;  %v292_v28 = vld [vmem:[%s8509_s8 + $0x160] sm:$0xff]   ;;  %v296_v29 = vld [vmem:[%s8509_s8 + $0x168] sm:$0xff]  }
  0x20   : > { %217 = vst [vmem:[%s8514_s9 + $0x48] sm:$0xff] %v216_v9   ;;  %v300_v30 = vld [vmem:[%s8509_s8 + $0x170] sm:$0xff]   ;;  %v304_v31 = vld [vmem:[%s8509_s8 + $0x178] sm:$0xff]   ;;  %v308_v32 = vld [vmem:[%s8509_s8 + $0x200] sm:$0xff]  }
  0x21   : > { %221 = vst [vmem:[%s8514_s9 + $0x50] sm:$0xff] %v220_v10   ;;  %v312_v33 = vld [vmem:[%s8509_s8 + $0x208] sm:$0xff]   ;;  %v316_v34 = vld [vmem:[%s8509_s8 + $0x210] sm:$0xff]   ;;  %v320_v35 = vld [vmem:[%s8509_s8 + $0x218] sm:$0xff]  }
  0x22   : > { %225 = vst [vmem:[%s8514_s9 + $0x58] sm:$0xff] %v224_v11   ;;  %v324_v36 = vld [vmem:[%s8509_s8 + $0x220] sm:$0xff]   ;;  %v328_v37 = vld [vmem:[%s8509_s8 + $0x228] sm:$0xff]   ;;  %v332_v38 = vld [vmem:[%s8509_s8 + $0x230] sm:$0xff]  }
  0x23   : > { %229 = vst [vmem:[%s8514_s9 + $0x60] sm:$0xff] %v228_v12   ;;  %v336_v39 = vld [vmem:[%s8509_s8 + $0x238] sm:$0xff]   ;;  %v340_v40 = vld [vmem:[%s8509_s8 + $0x240] sm:$0xff]   ;;  %v344_v41 = vld [vmem:[%s8509_s8 + $0x248] sm:$0xff]  }
  0x24   : > { %233 = vst [vmem:[%s8514_s9 + $0x68] sm:$0xff] %v232_v13   ;;  %v348_v42 = vld [vmem:[%s8509_s8 + $0x250] sm:$0xff]   ;;  %v352_v43 = vld [vmem:[%s8509_s8 + $0x258] sm:$0xff]   ;;  %v356_v44 = vld [vmem:[%s8509_s8 + $0x260] sm:$0xff]  }
  0x25   : > { %237 = vst [vmem:[%s8514_s9 + $0x70] sm:$0xff] %v236_v14   ;;  %v360_v45 = vld [vmem:[%s8509_s8 + $0x268] sm:$0xff]   ;;  %v364_v46 = vld [vmem:[%s8509_s8 + $0x270] sm:$0xff]   ;;  %v368_v47 = vld [vmem:[%s8509_s8 + $0x278] sm:$0xff]  }
  0x26   : > { %241 = vst [vmem:[%s8514_s9 + $0x78] sm:$0xff] %v240_v15   ;;  %v372_v48 = vld [vmem:[%s8509_s8 + $0x300] sm:$0xff]   ;;  %v376_v49 = vld [vmem:[%s8509_s8 + $0x308] sm:$0xff]   ;;  %v380_v50 = vld [vmem:[%s8509_s8 + $0x310] sm:$0xff]  }
  0x27   : > { %245 = vst [vmem:[%s8514_s9 + $0x80] sm:$0xff] %v244_v16   ;;  %v384_v51 = vld [vmem:[%s8509_s8 + $0x318] sm:$0xff]   ;;  %v388_v52 = vld [vmem:[%s8509_s8 + $0x320] sm:$0xff]   ;;  %v392_v53 = vld [vmem:[%s8509_s8 + $0x328] sm:$0xff]  }
  0x28   : > { %249 = vst [vmem:[%s8514_s9 + $0x88] sm:$0xff] %v248_v17   ;;  %v396_v54 = vld [vmem:[%s8509_s8 + $0x330] sm:$0xff]   ;;  %v400_v55 = vld [vmem:[%s8509_s8 + $0x338] sm:$0xff]   ;;  %v404_v56 = vld [vmem:[%s8509_s8 + $0x340] sm:$0xff]  }
  0x29   : > { %253 = vst [vmem:[%s8514_s9 + $0x90] sm:$0xff] %v252_v18   ;;  %v408_v57 = vld [vmem:[%s8509_s8 + $0x348] sm:$0xff]   ;;  %v412_v58 = vld [vmem:[%s8509_s8 + $0x350] sm:$0xff]   ;;  %v416_v59 = vld [vmem:[%s8509_s8 + $0x358] sm:$0xff]  }
  0x2a   : > { %257 = vst [vmem:[%s8514_s9 + $0x98] sm:$0xff] %v256_v19   ;;  %v420_v60 = vld [vmem:[%s8509_s8 + $0x360] sm:$0xff]   ;;  %v424_v61 = vld [vmem:[%s8509_s8 + $0x368] sm:$0xff]   ;;  %v428_v62 = vld [vmem:[%s8509_s8 + $0x370] sm:$0xff]  }
  0x2b   : > { %261 = vst [vmem:[%s8514_s9 + $0xa0] sm:$0xff] %v260_v20   ;;  %v432_v63 = vld [vmem:[%s8509_s8 + $0x378] sm:$0xff]  }
  0x2c   : > { %265 = vst [vmem:[%s8514_s9 + $0xa8] sm:$0xff] %v264_v21  }
  0x2d   : > { %269 = vst [vmem:[%s8514_s9 + $0xb0] sm:$0xff] %v268_v22  }
  0x2e   : > { %273 = vst [vmem:[%s8514_s9 + $0xb8] sm:$0xff] %v272_v23  }
  0x2f   : > { %277 = vst [vmem:[%s8514_s9 + $0xc0] sm:$0xff] %v276_v24  }
  0x30   : > { %281 = vst [vmem:[%s8514_s9 + $0xc8] sm:$0xff] %v280_v25  }
  0x31   : > { %285 = vst [vmem:[%s8514_s9 + $0xd0] sm:$0xff] %v284_v26  }
  0x32   : > { %289 = vst [vmem:[%s8514_s9 + $0xd8] sm:$0xff] %v288_v27  }
  0x33   : > { %293 = vst [vmem:[%s8514_s9 + $0xe0] sm:$0xff] %v292_v28  }
  0x34   : > { %297 = vst [vmem:[%s8514_s9 + $0xe8] sm:$0xff] %v296_v29  }
  0x35   : > { %301 = vst [vmem:[%s8514_s9 + $0xf0] sm:$0xff] %v300_v30  }
  0x36   : > { %305 = vst [vmem:[%s8514_s9 + $0xf8] sm:$0xff] %v304_v31  }
  0x37   : > { %309 = vst [vmem:[%s8514_s9 + $0x100] sm:$0xff] %v308_v32  }
  0x38   : > { %313 = vst [vmem:[%s8514_s9 + $0x108] sm:$0xff] %v312_v33  }
  0x39   : > { %317 = vst [vmem:[%s8514_s9 + $0x110] sm:$0xff] %v316_v34  }
  0x3a   : > { %321 = vst [vmem:[%s8514_s9 + $0x118] sm:$0xff] %v320_v35  }
  0x3b   : > { %325 = vst [vmem:[%s8514_s9 + $0x120] sm:$0xff] %v324_v36  }
  0x3c   : > { %329 = vst [vmem:[%s8514_s9 + $0x128] sm:$0xff] %v328_v37  }
  0x3d   : > { %333 = vst [vmem:[%s8514_s9 + $0x130] sm:$0xff] %v332_v38  }
  0x3e   : > { %337 = vst [vmem:[%s8514_s9 + $0x138] sm:$0xff] %v336_v39  }
  0x3f   : > { %341 = vst [vmem:[%s8514_s9 + $0x140] sm:$0xff] %v340_v40  }
  0x40   : > { %345 = vst [vmem:[%s8514_s9 + $0x148] sm:$0xff] %v344_v41  }
  0x41   : > { %349 = vst [vmem:[%s8514_s9 + $0x150] sm:$0xff] %v348_v42  }
  0x42   : > { %353 = vst [vmem:[%s8514_s9 + $0x158] sm:$0xff] %v352_v43  }
  0x43   : > { %357 = vst [vmem:[%s8514_s9 + $0x160] sm:$0xff] %v356_v44  }
  0x44   : > { %361 = vst [vmem:[%s8514_s9 + $0x168] sm:$0xff] %v360_v45  }
  0x45   : > { %365 = vst [vmem:[%s8514_s9 + $0x170] sm:$0xff] %v364_v46  }
  0x46   : > { %369 = vst [vmem:[%s8514_s9 + $0x178] sm:$0xff] %v368_v47  }
  0x47   : > { %373 = vst [vmem:[%s8514_s9 + $0x180] sm:$0xff] %v372_v48  }
  0x48   : > { %377 = vst [vmem:[%s8514_s9 + $0x188] sm:$0xff] %v376_v49  }
  0x49   : > { %381 = vst [vmem:[%s8514_s9 + $0x190] sm:$0xff] %v380_v50  }
  0x4a   : > { %385 = vst [vmem:[%s8514_s9 + $0x198] sm:$0xff] %v384_v51  }
  0x4b   : > { %389 = vst [vmem:[%s8514_s9 + $0x1a0] sm:$0xff] %v388_v52  }
  0x4c   : > { %393 = vst [vmem:[%s8514_s9 + $0x1a8] sm:$0xff] %v392_v53  }
  0x4d   : > { %397 = vst [vmem:[%s8514_s9 + $0x1b0] sm:$0xff] %v396_v54  }
  0x4e   : > { %401 = vst [vmem:[%s8514_s9 + $0x1b8] sm:$0xff] %v400_v55  }
  0x4f   : > { %405 = vst [vmem:[%s8514_s9 + $0x1c0] sm:$0xff] %v404_v56  }
  0x50   : > { %409 = vst [vmem:[%s8514_s9 + $0x1c8] sm:$0xff] %v408_v57  }
  0x51   : > { %413 = vst [vmem:[%s8514_s9 + $0x1d0] sm:$0xff] %v412_v58  }
  0x52   : > { %417 = vst [vmem:[%s8514_s9 + $0x1d8] sm:$0xff] %v416_v59  }
  0x53   : > { %421 = vst [vmem:[%s8514_s9 + $0x1e0] sm:$0xff] %v420_v60  }
  0x54   : > { %425 = vst [vmem:[%s8514_s9 + $0x1e8] sm:$0xff] %v424_v61  }
  0x55   : > { %429 = vst [vmem:[%s8514_s9 + $0x1f0] sm:$0xff] %v428_v62  }
  0x56   : > { %433 = vst [vmem:[%s8514_s9 + $0x1f8] sm:$0xff] %v432_v63  }
  0x57 PF: > { %715 = sbr.rel (!%p8486_p3) target bundleno = 158 (0x9e), region = 61  ;;  %s717_s10 = sand.u32 (%p8486_p3), 1, %s8394_s13  }
  0x58   : > { %s6607_s11 = sshll.u32 (%p8486_p3), %s8406_s16, 5  ;;  %s6606_s22 = sshll.u32 (%p8486_p3), %s717_s10, 9 }
  0x59   : > { %s6608_s23 = sshll.u32 (%p8486_p3), %s8410_s17, 8  ;;  %s8654_s30 = scalar_lea.vmem (%p8486_p3), [#allocation4], %s6606_s22 }
  0x5a   : > { %s722_s24 = sadd.s32 (%p8486_p3), %s6608_s23, %s6607_s11 }
  0x5b   : > { %s6609_s25 = sshll.u32 (%p8486_p3), %s722_s24, 2 }
  0x5c   : > { %s8649_s29 = scalar_lea.vmem %s11255_s1, %s6609_s25 }
  0x5d   : > { %v741_v0 = vld [vmem:[%s8649_s29] sm:$0xff]   ;;  %v745_v1 = vld [vmem:[%s8649_s29 + $0x8] sm:$0xff]   ;;  %v749_v2 = vld [vmem:[%s8649_s29 + $0x10] sm:$0xff]  }
  0x5e   : > { %742 = vst [vmem:[%s8654_s30] sm:$0xff] %v741_v0   ;;  %v753_v3 = vld [vmem:[%s8649_s29 + $0x18] sm:$0xff]   ;;  %v757_v4 = vld [vmem:[%s8649_s29 + $0x20] sm:$0xff]   ;;  %v761_v5 = vld [vmem:[%s8649_s29 + $0x28] sm:$0xff]  }
  0x5f   : > { %746 = vst [vmem:[%s8654_s30 + $0x8] sm:$0xff] %v745_v1   ;;  %v765_v6 = vld [vmem:[%s8649_s29 + $0x30] sm:$0xff]   ;;  %v769_v7 = vld [vmem:[%s8649_s29 + $0x38] sm:$0xff]   ;;  %v773_v8 = vld [vmem:[%s8649_s29 + $0x40] sm:$0xff]  }
  0x60   : > { %750 = vst [vmem:[%s8654_s30 + $0x10] sm:$0xff] %v749_v2   ;;  %v777_v9 = vld [vmem:[%s8649_s29 + $0x48] sm:$0xff]   ;;  %v781_v10 = vld [vmem:[%s8649_s29 + $0x50] sm:$0xff]   ;;  %v785_v11 = vld [vmem:[%s8649_s29 + $0x58] sm:$0xff]  }
  0x61   : > { %754 = vst [vmem:[%s8654_s30 + $0x18] sm:$0xff] %v753_v3   ;;  %v789_v12 = vld [vmem:[%s8649_s29 + $0x60] sm:$0xff]   ;;  %v793_v13 = vld [vmem:[%s8649_s29 + $0x68] sm:$0xff]   ;;  %v797_v14 = vld [vmem:[%s8649_s29 + $0x70] sm:$0xff]  }
  0x62   : > { %758 = vst [vmem:[%s8654_s30 + $0x20] sm:$0xff] %v757_v4   ;;  %v801_v15 = vld [vmem:[%s8649_s29 + $0x78] sm:$0xff]   ;;  %v805_v16 = vld [vmem:[%s8649_s29 + $0x100] sm:$0xff]   ;;  %v809_v17 = vld [vmem:[%s8649_s29 + $0x108] sm:$0xff]  }
  0x63   : > { %762 = vst [vmem:[%s8654_s30 + $0x28] sm:$0xff] %v761_v5   ;;  %v813_v18 = vld [vmem:[%s8649_s29 + $0x110] sm:$0xff]   ;;  %v817_v19 = vld [vmem:[%s8649_s29 + $0x118] sm:$0xff]   ;;  %v821_v20 = vld [vmem:[%s8649_s29 + $0x120] sm:$0xff]  }
  0x64   : > { %766 = vst [vmem:[%s8654_s30 + $0x30] sm:$0xff] %v765_v6   ;;  %v825_v21 = vld [vmem:[%s8649_s29 + $0x128] sm:$0xff]   ;;  %v829_v22 = vld [vmem:[%s8649_s29 + $0x130] sm:$0xff]   ;;  %v833_v23 = vld [vmem:[%s8649_s29 + $0x138] sm:$0xff]  }
  0x65   : > { %770 = vst [vmem:[%s8654_s30 + $0x38] sm:$0xff] %v769_v7   ;;  %v837_v24 = vld [vmem:[%s8649_s29 + $0x140] sm:$0xff]   ;;  %v841_v25 = vld [vmem:[%s8649_s29 + $0x148] sm:$0xff]   ;;  %v845_v26 = vld [vmem:[%s8649_s29 + $0x150] sm:$0xff]  }
  0x66   : > { %774 = vst [vmem:[%s8654_s30 + $0x40] sm:$0xff] %v773_v8   ;;  %v849_v27 = vld [vmem:[%s8649_s29 + $0x158] sm:$0xff]   ;;  %v853_v28 = vld [vmem:[%s8649_s29 + $0x160] sm:$0xff]   ;;  %v857_v29 = vld [vmem:[%s8649_s29 + $0x168] sm:$0xff]  }
  0x67   : > { %778 = vst [vmem:[%s8654_s30 + $0x48] sm:$0xff] %v777_v9   ;;  %v861_v30 = vld [vmem:[%s8649_s29 + $0x170] sm:$0xff]   ;;  %v865_v31 = vld [vmem:[%s8649_s29 + $0x178] sm:$0xff]   ;;  %v869_v32 = vld [vmem:[%s8649_s29 + $0x200] sm:$0xff]  }
  0x68   : > { %782 = vst [vmem:[%s8654_s30 + $0x50] sm:$0xff] %v781_v10   ;;  %v873_v33 = vld [vmem:[%s8649_s29 + $0x208] sm:$0xff]   ;;  %v877_v34 = vld [vmem:[%s8649_s29 + $0x210] sm:$0xff]   ;;  %v881_v35 = vld [vmem:[%s8649_s29 + $0x218] sm:$0xff]  }
  0x69   : > { %786 = vst [vmem:[%s8654_s30 + $0x58] sm:$0xff] %v785_v11   ;;  %v885_v36 = vld [vmem:[%s8649_s29 + $0x220] sm:$0xff]   ;;  %v889_v37 = vld [vmem:[%s8649_s29 + $0x228] sm:$0xff]   ;;  %v893_v38 = vld [vmem:[%s8649_s29 + $0x230] sm:$0xff]  }
  0x6a   : > { %790 = vst [vmem:[%s8654_s30 + $0x60] sm:$0xff] %v789_v12   ;;  %v897_v39 = vld [vmem:[%s8649_s29 + $0x238] sm:$0xff]   ;;  %v901_v40 = vld [vmem:[%s8649_s29 + $0x240] sm:$0xff]   ;;  %v905_v41 = vld [vmem:[%s8649_s29 + $0x248] sm:$0xff]  }
  0x6b   : > { %794 = vst [vmem:[%s8654_s30 + $0x68] sm:$0xff] %v793_v13   ;;  %v909_v42 = vld [vmem:[%s8649_s29 + $0x250] sm:$0xff]   ;;  %v913_v43 = vld [vmem:[%s8649_s29 + $0x258] sm:$0xff]   ;;  %v917_v44 = vld [vmem:[%s8649_s29 + $0x260] sm:$0xff]  }
  0x6c   : > { %798 = vst [vmem:[%s8654_s30 + $0x70] sm:$0xff] %v797_v14   ;;  %v921_v45 = vld [vmem:[%s8649_s29 + $0x268] sm:$0xff]   ;;  %v925_v46 = vld [vmem:[%s8649_s29 + $0x270] sm:$0xff]   ;;  %v929_v47 = vld [vmem:[%s8649_s29 + $0x278] sm:$0xff]  }
  0x6d   : > { %802 = vst [vmem:[%s8654_s30 + $0x78] sm:$0xff] %v801_v15   ;;  %v933_v48 = vld [vmem:[%s8649_s29 + $0x300] sm:$0xff]   ;;  %v937_v49 = vld [vmem:[%s8649_s29 + $0x308] sm:$0xff]   ;;  %v941_v50 = vld [vmem:[%s8649_s29 + $0x310] sm:$0xff]  }
  0x6e   : > { %806 = vst [vmem:[%s8654_s30 + $0x80] sm:$0xff] %v805_v16   ;;  %v945_v51 = vld [vmem:[%s8649_s29 + $0x318] sm:$0xff]   ;;  %v949_v52 = vld [vmem:[%s8649_s29 + $0x320] sm:$0xff]   ;;  %v953_v53 = vld [vmem:[%s8649_s29 + $0x328] sm:$0xff]  }
  0x6f   : > { %810 = vst [vmem:[%s8654_s30 + $0x88] sm:$0xff] %v809_v17   ;;  %v957_v54 = vld [vmem:[%s8649_s29 + $0x330] sm:$0xff]   ;;  %v961_v55 = vld [vmem:[%s8649_s29 + $0x338] sm:$0xff]   ;;  %v965_v56 = vld [vmem:[%s8649_s29 + $0x340] sm:$0xff]  }
  0x70   : > { %814 = vst [vmem:[%s8654_s30 + $0x90] sm:$0xff] %v813_v18   ;;  %v969_v57 = vld [vmem:[%s8649_s29 + $0x348] sm:$0xff]   ;;  %v973_v58 = vld [vmem:[%s8649_s29 + $0x350] sm:$0xff]   ;;  %v977_v59 = vld [vmem:[%s8649_s29 + $0x358] sm:$0xff]  }
  0x71   : > { %818 = vst [vmem:[%s8654_s30 + $0x98] sm:$0xff] %v817_v19   ;;  %v981_v60 = vld [vmem:[%s8649_s29 + $0x360] sm:$0xff]   ;;  %v985_v61 = vld [vmem:[%s8649_s29 + $0x368] sm:$0xff]   ;;  %v989_v62 = vld [vmem:[%s8649_s29 + $0x370] sm:$0xff]  }
  0x72   : > { %822 = vst [vmem:[%s8654_s30 + $0xa0] sm:$0xff] %v821_v20   ;;  %v993_v63 = vld [vmem:[%s8649_s29 + $0x378] sm:$0xff]  }
  0x73   : > { %826 = vst [vmem:[%s8654_s30 + $0xa8] sm:$0xff] %v825_v21  }
  0x74   : > { %830 = vst [vmem:[%s8654_s30 + $0xb0] sm:$0xff] %v829_v22  }
  0x75   : > { %834 = vst [vmem:[%s8654_s30 + $0xb8] sm:$0xff] %v833_v23  }
  0x76   : > { %838 = vst [vmem:[%s8654_s30 + $0xc0] sm:$0xff] %v837_v24  }
  0x77   : > { %842 = vst [vmem:[%s8654_s30 + $0xc8] sm:$0xff] %v841_v25  }
  0x78   : > { %846 = vst [vmem:[%s8654_s30 + $0xd0] sm:$0xff] %v845_v26  }
  0x79   : > { %850 = vst [vmem:[%s8654_s30 + $0xd8] sm:$0xff] %v849_v27  }
  0x7a   : > { %854 = vst [vmem:[%s8654_s30 + $0xe0] sm:$0xff] %v853_v28  }
  0x7b   : > { %858 = vst [vmem:[%s8654_s30 + $0xe8] sm:$0xff] %v857_v29  }
  0x7c   : > { %862 = vst [vmem:[%s8654_s30 + $0xf0] sm:$0xff] %v861_v30  }
  0x7d   : > { %866 = vst [vmem:[%s8654_s30 + $0xf8] sm:$0xff] %v865_v31  }
  0x7e   : > { %870 = vst [vmem:[%s8654_s30 + $0x100] sm:$0xff] %v869_v32  }
  0x7f   : > { %874 = vst [vmem:[%s8654_s30 + $0x108] sm:$0xff] %v873_v33  }
  0x80   : > { %878 = vst [vmem:[%s8654_s30 + $0x110] sm:$0xff] %v877_v34  }
  0x81   : > { %882 = vst [vmem:[%s8654_s30 + $0x118] sm:$0xff] %v881_v35  }
  0x82   : > { %886 = vst [vmem:[%s8654_s30 + $0x120] sm:$0xff] %v885_v36  }
  0x83   : > { %890 = vst [vmem:[%s8654_s30 + $0x128] sm:$0xff] %v889_v37  }
  0x84   : > { %894 = vst [vmem:[%s8654_s30 + $0x130] sm:$0xff] %v893_v38  }
  0x85   : > { %898 = vst [vmem:[%s8654_s30 + $0x138] sm:$0xff] %v897_v39  }
  0x86   : > { %902 = vst [vmem:[%s8654_s30 + $0x140] sm:$0xff] %v901_v40  }
  0x87   : > { %906 = vst [vmem:[%s8654_s30 + $0x148] sm:$0xff] %v905_v41  }
  0x88   : > { %910 = vst [vmem:[%s8654_s30 + $0x150] sm:$0xff] %v909_v42  }
  0x89   : > { %914 = vst [vmem:[%s8654_s30 + $0x158] sm:$0xff] %v913_v43  }
  0x8a   : > { %918 = vst [vmem:[%s8654_s30 + $0x160] sm:$0xff] %v917_v44  }
  0x8b   : > { %922 = vst [vmem:[%s8654_s30 + $0x168] sm:$0xff] %v921_v45  }
  0x8c   : > { %926 = vst [vmem:[%s8654_s30 + $0x170] sm:$0xff] %v925_v46  }
  0x8d   : > { %930 = vst [vmem:[%s8654_s30 + $0x178] sm:$0xff] %v929_v47  }
  0x8e   : > { %934 = vst [vmem:[%s8654_s30 + $0x180] sm:$0xff] %v933_v48  }
  0x8f   : > { %938 = vst [vmem:[%s8654_s30 + $0x188] sm:$0xff] %v937_v49  }
  0x90   : > { %942 = vst [vmem:[%s8654_s30 + $0x190] sm:$0xff] %v941_v50  }
  0x91   : > { %946 = vst [vmem:[%s8654_s30 + $0x198] sm:$0xff] %v945_v51  }
  0x92   : > { %950 = vst [vmem:[%s8654_s30 + $0x1a0] sm:$0xff] %v949_v52  }
  0x93   : > { %954 = vst [vmem:[%s8654_s30 + $0x1a8] sm:$0xff] %v953_v53  }
  0x94   : > { %958 = vst [vmem:[%s8654_s30 + $0x1b0] sm:$0xff] %v957_v54  }
  0x95   : > { %962 = vst [vmem:[%s8654_s30 + $0x1b8] sm:$0xff] %v961_v55  }
  0x96   : > { %966 = vst [vmem:[%s8654_s30 + $0x1c0] sm:$0xff] %v965_v56  }
  0x97   : > { %970 = vst [vmem:[%s8654_s30 + $0x1c8] sm:$0xff] %v969_v57  }
  0x98   : > { %974 = vst [vmem:[%s8654_s30 + $0x1d0] sm:$0xff] %v973_v58  }
  0x99   : > { %978 = vst [vmem:[%s8654_s30 + $0x1d8] sm:$0xff] %v977_v59  }
  0x9a   : > { %982 = vst [vmem:[%s8654_s30 + $0x1e0] sm:$0xff] %v981_v60  }
  0x9b   : > { %986 = vst [vmem:[%s8654_s30 + $0x1e8] sm:$0xff] %v985_v61  }
  0x9c   : > { %990 = vst [vmem:[%s8654_s30 + $0x1f0] sm:$0xff] %v989_v62  }
  0x9d   : > { %994 = vst [vmem:[%s8654_s30 + $0x1f8] sm:$0xff] %v993_v63  }
  0x9e PF: > { %1276 = sbr.rel (!%p8486_p3) target bundleno = 229 (0xe5), region = 102  ;;  %s1278_s4 = sand.u32 (%p8486_p3), 1, %s8394_s13  }
  0x9f   : > { %s6611_s5 = sshll.u32 (%p8486_p3), %s8406_s16, 5  ;;  %s6610_s6 = sshll.u32 (%p8486_p3), %s1278_s4, 9 }
  0xa0   : > { %s6612_s7 = sshll.u32 (%p8486_p3), %s8410_s17, 8  ;;  %s8794_s21 = scalar_lea.vmem (%p8486_p3), [#allocation5], %s6610_s6 }
  0xa1   : > { %s1283_s8 = sadd.s32 (%p8486_p3), %s6612_s7, %s6611_s5 }
  0xa2   : > { %s6613_s9 = sshll.u32 (%p8486_p3), %s1283_s8, 2 }
  0xa3   : > { %s8789_s22 = scalar_lea.vmem %s11256_s2, %s6613_s9 }
  0xa4   : > { %v1302_v0 = vld [vmem:[%s8789_s22] sm:$0xff]   ;;  %v1306_v1 = vld [vmem:[%s8789_s22 + $0x8] sm:$0xff]   ;;  %v1310_v2 = vld [vmem:[%s8789_s22 + $0x10] sm:$0xff]  }
  0xa5   : > { %1303 = vst [vmem:[%s8794_s21] sm:$0xff] %v1302_v0   ;;  %v1314_v3 = vld [vmem:[%s8789_s22 + $0x18] sm:$0xff]   ;;  %v1318_v4 = vld [vmem:[%s8789_s22 + $0x20] sm:$0xff]   ;;  %v1322_v5 = vld [vmem:[%s8789_s22 + $0x28] sm:$0xff]  }
  0xa6   : > { %1307 = vst [vmem:[%s8794_s21 + $0x8] sm:$0xff] %v1306_v1   ;;  %v1326_v6 = vld [vmem:[%s8789_s22 + $0x30] sm:$0xff]   ;;  %v1330_v7 = vld [vmem:[%s8789_s22 + $0x38] sm:$0xff]   ;;  %v1334_v8 = vld [vmem:[%s8789_s22 + $0x40] sm:$0xff]  }
  0xa7   : > { %1311 = vst [vmem:[%s8794_s21 + $0x10] sm:$0xff] %v1310_v2   ;;  %v1338_v9 = vld [vmem:[%s8789_s22 + $0x48] sm:$0xff]   ;;  %v1342_v10 = vld [vmem:[%s8789_s22 + $0x50] sm:$0xff]   ;;  %v1346_v11 = vld [vmem:[%s8789_s22 + $0x58] sm:$0xff]  }
  0xa8   : > { %1315 = vst [vmem:[%s8794_s21 + $0x18] sm:$0xff] %v1314_v3   ;;  %v1350_v12 = vld [vmem:[%s8789_s22 + $0x60] sm:$0xff]   ;;  %v1354_v13 = vld [vmem:[%s8789_s22 + $0x68] sm:$0xff]   ;;  %v1358_v14 = vld [vmem:[%s8789_s22 + $0x70] sm:$0xff]  }
  0xa9   : > { %1319 = vst [vmem:[%s8794_s21 + $0x20] sm:$0xff] %v1318_v4   ;;  %v1362_v15 = vld [vmem:[%s8789_s22 + $0x78] sm:$0xff]   ;;  %v1366_v16 = vld [vmem:[%s8789_s22 + $0x100] sm:$0xff]   ;;  %v1370_v17 = vld [vmem:[%s8789_s22 + $0x108] sm:$0xff]  }
  0xaa   : > { %1323 = vst [vmem:[%s8794_s21 + $0x28] sm:$0xff] %v1322_v5   ;;  %v1374_v18 = vld [vmem:[%s8789_s22 + $0x110] sm:$0xff]   ;;  %v1378_v19 = vld [vmem:[%s8789_s22 + $0x118] sm:$0xff]   ;;  %v1382_v20 = vld [vmem:[%s8789_s22 + $0x120] sm:$0xff]  }
  0xab   : > { %1327 = vst [vmem:[%s8794_s21 + $0x30] sm:$0xff] %v1326_v6   ;;  %v1386_v21 = vld [vmem:[%s8789_s22 + $0x128] sm:$0xff]   ;;  %v1390_v22 = vld [vmem:[%s8789_s22 + $0x130] sm:$0xff]   ;;  %v1394_v23 = vld [vmem:[%s8789_s22 + $0x138] sm:$0xff]  }
  0xac   : > { %1331 = vst [vmem:[%s8794_s21 + $0x38] sm:$0xff] %v1330_v7   ;;  %v1398_v24 = vld [vmem:[%s8789_s22 + $0x140] sm:$0xff]   ;;  %v1402_v25 = vld [vmem:[%s8789_s22 + $0x148] sm:$0xff]   ;;  %v1406_v26 = vld [vmem:[%s8789_s22 + $0x150] sm:$0xff]  }
  0xad   : > { %1335 = vst [vmem:[%s8794_s21 + $0x40] sm:$0xff] %v1334_v8   ;;  %v1410_v27 = vld [vmem:[%s8789_s22 + $0x158] sm:$0xff]   ;;  %v1414_v28 = vld [vmem:[%s8789_s22 + $0x160] sm:$0xff]   ;;  %v1418_v29 = vld [vmem:[%s8789_s22 + $0x168] sm:$0xff]  }
  0xae   : > { %1339 = vst [vmem:[%s8794_s21 + $0x48] sm:$0xff] %v1338_v9   ;;  %v1422_v30 = vld [vmem:[%s8789_s22 + $0x170] sm:$0xff]   ;;  %v1426_v31 = vld [vmem:[%s8789_s22 + $0x178] sm:$0xff]   ;;  %v1430_v32 = vld [vmem:[%s8789_s22 + $0x200] sm:$0xff]  }
  0xaf   : > { %1343 = vst [vmem:[%s8794_s21 + $0x50] sm:$0xff] %v1342_v10   ;;  %v1434_v33 = vld [vmem:[%s8789_s22 + $0x208] sm:$0xff]   ;;  %v1438_v34 = vld [vmem:[%s8789_s22 + $0x210] sm:$0xff]   ;;  %v1442_v35 = vld [vmem:[%s8789_s22 + $0x218] sm:$0xff]  }
  0xb0   : > { %1347 = vst [vmem:[%s8794_s21 + $0x58] sm:$0xff] %v1346_v11   ;;  %v1446_v36 = vld [vmem:[%s8789_s22 + $0x220] sm:$0xff]   ;;  %v1450_v37 = vld [vmem:[%s8789_s22 + $0x228] sm:$0xff]   ;;  %v1454_v38 = vld [vmem:[%s8789_s22 + $0x230] sm:$0xff]  }
  0xb1   : > { %1351 = vst [vmem:[%s8794_s21 + $0x60] sm:$0xff] %v1350_v12   ;;  %v1458_v39 = vld [vmem:[%s8789_s22 + $0x238] sm:$0xff]   ;;  %v1462_v40 = vld [vmem:[%s8789_s22 + $0x240] sm:$0xff]   ;;  %v1466_v41 = vld [vmem:[%s8789_s22 + $0x248] sm:$0xff]  }
  0xb2   : > { %1355 = vst [vmem:[%s8794_s21 + $0x68] sm:$0xff] %v1354_v13   ;;  %v1470_v42 = vld [vmem:[%s8789_s22 + $0x250] sm:$0xff]   ;;  %v1474_v43 = vld [vmem:[%s8789_s22 + $0x258] sm:$0xff]   ;;  %v1478_v44 = vld [vmem:[%s8789_s22 + $0x260] sm:$0xff]  }
  0xb3   : > { %1359 = vst [vmem:[%s8794_s21 + $0x70] sm:$0xff] %v1358_v14   ;;  %v1482_v45 = vld [vmem:[%s8789_s22 + $0x268] sm:$0xff]   ;;  %v1486_v46 = vld [vmem:[%s8789_s22 + $0x270] sm:$0xff]   ;;  %v1490_v47 = vld [vmem:[%s8789_s22 + $0x278] sm:$0xff]  }
  0xb4   : > { %1363 = vst [vmem:[%s8794_s21 + $0x78] sm:$0xff] %v1362_v15   ;;  %v1494_v48 = vld [vmem:[%s8789_s22 + $0x300] sm:$0xff]   ;;  %v1498_v49 = vld [vmem:[%s8789_s22 + $0x308] sm:$0xff]   ;;  %v1502_v50 = vld [vmem:[%s8789_s22 + $0x310] sm:$0xff]  }
  0xb5   : > { %1367 = vst [vmem:[%s8794_s21 + $0x80] sm:$0xff] %v1366_v16   ;;  %v1506_v51 = vld [vmem:[%s8789_s22 + $0x318] sm:$0xff]   ;;  %v1510_v52 = vld [vmem:[%s8789_s22 + $0x320] sm:$0xff]   ;;  %v1514_v53 = vld [vmem:[%s8789_s22 + $0x328] sm:$0xff]  }
  0xb6   : > { %1371 = vst [vmem:[%s8794_s21 + $0x88] sm:$0xff] %v1370_v17   ;;  %v1518_v54 = vld [vmem:[%s8789_s22 + $0x330] sm:$0xff]   ;;  %v1522_v55 = vld [vmem:[%s8789_s22 + $0x338] sm:$0xff]   ;;  %v1526_v56 = vld [vmem:[%s8789_s22 + $0x340] sm:$0xff]  }
  0xb7   : > { %1375 = vst [vmem:[%s8794_s21 + $0x90] sm:$0xff] %v1374_v18   ;;  %v1530_v57 = vld [vmem:[%s8789_s22 + $0x348] sm:$0xff]   ;;  %v1534_v58 = vld [vmem:[%s8789_s22 + $0x350] sm:$0xff]   ;;  %v1538_v59 = vld [vmem:[%s8789_s22 + $0x358] sm:$0xff]  }
  0xb8   : > { %1379 = vst [vmem:[%s8794_s21 + $0x98] sm:$0xff] %v1378_v19   ;;  %v1542_v60 = vld [vmem:[%s8789_s22 + $0x360] sm:$0xff]   ;;  %v1546_v61 = vld [vmem:[%s8789_s22 + $0x368] sm:$0xff]   ;;  %v1550_v62 = vld [vmem:[%s8789_s22 + $0x370] sm:$0xff]  }
  0xb9   : > { %1383 = vst [vmem:[%s8794_s21 + $0xa0] sm:$0xff] %v1382_v20   ;;  %v1554_v63 = vld [vmem:[%s8789_s22 + $0x378] sm:$0xff]  }
  0xba   : > { %1387 = vst [vmem:[%s8794_s21 + $0xa8] sm:$0xff] %v1386_v21  }
  0xbb   : > { %1391 = vst [vmem:[%s8794_s21 + $0xb0] sm:$0xff] %v1390_v22  }
  0xbc   : > { %1395 = vst [vmem:[%s8794_s21 + $0xb8] sm:$0xff] %v1394_v23  }
  0xbd   : > { %1399 = vst [vmem:[%s8794_s21 + $0xc0] sm:$0xff] %v1398_v24  }
  0xbe   : > { %1403 = vst [vmem:[%s8794_s21 + $0xc8] sm:$0xff] %v1402_v25  }
  0xbf   : > { %1407 = vst [vmem:[%s8794_s21 + $0xd0] sm:$0xff] %v1406_v26  }
  0xc0   : > { %1411 = vst [vmem:[%s8794_s21 + $0xd8] sm:$0xff] %v1410_v27  }
  0xc1   : > { %1415 = vst [vmem:[%s8794_s21 + $0xe0] sm:$0xff] %v1414_v28  }
  0xc2   : > { %1419 = vst [vmem:[%s8794_s21 + $0xe8] sm:$0xff] %v1418_v29  }
  0xc3   : > { %1423 = vst [vmem:[%s8794_s21 + $0xf0] sm:$0xff] %v1422_v30  }
  0xc4   : > { %1427 = vst [vmem:[%s8794_s21 + $0xf8] sm:$0xff] %v1426_v31  }
  0xc5   : > { %1431 = vst [vmem:[%s8794_s21 + $0x100] sm:$0xff] %v1430_v32  }
  0xc6   : > { %1435 = vst [vmem:[%s8794_s21 + $0x108] sm:$0xff] %v1434_v33  }
  0xc7   : > { %1439 = vst [vmem:[%s8794_s21 + $0x110] sm:$0xff] %v1438_v34  }
  0xc8   : > { %1443 = vst [vmem:[%s8794_s21 + $0x118] sm:$0xff] %v1442_v35  }
  0xc9   : > { %1447 = vst [vmem:[%s8794_s21 + $0x120] sm:$0xff] %v1446_v36  }
  0xca   : > { %1451 = vst [vmem:[%s8794_s21 + $0x128] sm:$0xff] %v1450_v37  }
  0xcb   : > { %1455 = vst [vmem:[%s8794_s21 + $0x130] sm:$0xff] %v1454_v38  }
  0xcc   : > { %1459 = vst [vmem:[%s8794_s21 + $0x138] sm:$0xff] %v1458_v39  }
  0xcd   : > { %1463 = vst [vmem:[%s8794_s21 + $0x140] sm:$0xff] %v1462_v40  }
  0xce   : > { %1467 = vst [vmem:[%s8794_s21 + $0x148] sm:$0xff] %v1466_v41  }
  0xcf   : > { %1471 = vst [vmem:[%s8794_s21 + $0x150] sm:$0xff] %v1470_v42  }
  0xd0   : > { %1475 = vst [vmem:[%s8794_s21 + $0x158] sm:$0xff] %v1474_v43  }
  0xd1   : > { %1479 = vst [vmem:[%s8794_s21 + $0x160] sm:$0xff] %v1478_v44  }
  0xd2   : > { %1483 = vst [vmem:[%s8794_s21 + $0x168] sm:$0xff] %v1482_v45  }
  0xd3   : > { %1487 = vst [vmem:[%s8794_s21 + $0x170] sm:$0xff] %v1486_v46  }
  0xd4   : > { %1491 = vst [vmem:[%s8794_s21 + $0x178] sm:$0xff] %v1490_v47  }
  0xd5   : > { %1495 = vst [vmem:[%s8794_s21 + $0x180] sm:$0xff] %v1494_v48  }
  0xd6   : > { %1499 = vst [vmem:[%s8794_s21 + $0x188] sm:$0xff] %v1498_v49  }
  0xd7   : > { %1503 = vst [vmem:[%s8794_s21 + $0x190] sm:$0xff] %v1502_v50  }
  0xd8   : > { %1507 = vst [vmem:[%s8794_s21 + $0x198] sm:$0xff] %v1506_v51  }
  0xd9   : > { %1511 = vst [vmem:[%s8794_s21 + $0x1a0] sm:$0xff] %v1510_v52  }
  0xda   : > { %1515 = vst [vmem:[%s8794_s21 + $0x1a8] sm:$0xff] %v1514_v53  }
  0xdb   : > { %1519 = vst [vmem:[%s8794_s21 + $0x1b0] sm:$0xff] %v1518_v54  }
  0xdc   : > { %1523 = vst [vmem:[%s8794_s21 + $0x1b8] sm:$0xff] %v1522_v55  }
  0xdd   : > { %1527 = vst [vmem:[%s8794_s21 + $0x1c0] sm:$0xff] %v1526_v56  }
  0xde   : > { %1531 = vst [vmem:[%s8794_s21 + $0x1c8] sm:$0xff] %v1530_v57  }
  0xdf   : > { %1535 = vst [vmem:[%s8794_s21 + $0x1d0] sm:$0xff] %v1534_v58  }
  0xe0   : > { %1539 = vst [vmem:[%s8794_s21 + $0x1d8] sm:$0xff] %v1538_v59  }
  0xe1   : > { %1543 = vst [vmem:[%s8794_s21 + $0x1e0] sm:$0xff] %v1542_v60  }
  0xe2   : > { %1547 = vst [vmem:[%s8794_s21 + $0x1e8] sm:$0xff] %v1546_v61  }
  0xe3   : > { %1551 = vst [vmem:[%s8794_s21 + $0x1f0] sm:$0xff] %v1550_v62  }
  0xe4   : > { %1555 = vst [vmem:[%s8794_s21 + $0x1f8] sm:$0xff] %v1554_v63  }
  0xe5 PF: > { %p6614_p7 = scmp.ge.s32.totalorder %s8414_s18, 1  ;;  %p1836_p8 = scmp.lt.s32.totalorder %s8414_s18, 5 }
  0xe7   : > { %p1837_p9 = pnand %p6614_p7, %p1836_p8 }
  0xe9   : > { %1840 = sbr.rel (%p1837_p9) target bundleno = 1922 (0x782), region = 143 }
  0xee   : > { %s1843_s23 = sand.u32 1, %s8390_s12   ;;  %s6618_s24 = sshll.u32 %s8398_s14, 5 }
  0xef   : > { %s6615_s25 = sshll.u32 %s1843_s23, 9  ;;  %p1896_p10 = scmp.lt.s32.totalorder %s8402_s15, 1 }
  0xf0   : > { %p1898_p11 = scmp.lt.s32.totalorder %s6618_s24, 63  ;;  %s8932_s6 = scalar_lea.vmem [#allocation3], %s6615_s25 }
  0xf1   : > { %s11550_s15 = smov (!%p1896_p10, %s8402_s15), 1  ;;  %s8934_s7 = scalar_lea.vmem [#allocation4], %s6615_s25 }
  0xf2   : > { %s11552_s24 = smov (!%p1898_p11, %s6618_s24), 63  ;;  %s6619_s27 = sshll.u32 %s11550_s15, 6 }
  0xf3   : > { %s1901_s28 = sadd.s32 %s6619_s27, %s11552_s24  ;;  %s8936_s8 = scalar_lea.vmem [#allocation5], %s6615_s25 }
  0xf4   : > { %s6620_s29 = sshll.u32 %s1901_s28, 3  ;;  %p6621_p12 = scmp.ne.s32.totalorder %s8398_s14, 0 }
  0xf5   : > { %s8930_s5 = scalar_lea.vmem %s11257_s3, %s6620_s29 }
  0xf6   : > { %1908 = sbr.rel (%p6621_p12) target bundleno = 316 (0x13c), region = 159 }
  0xfb   : > { %vm1909_vm0 = vcmask 261120   ;;  %v8416_v0 = vmov 0.0  }
  0xfc   : > { %1910 = vst.msk [vmem:[#allocation2] sm:$0xff] %vm1909_vm0, %v8416_v0 }
  0xfd   : > { %1911 = vst.msk [vmem:[#allocation2 + $0x8] sm:$0xff] %vm1909_vm0, %v8416_v0 }
  0xfe   : > { %1912 = vst.msk [vmem:[#allocation2 + $0x10] sm:$0xff] %vm1909_vm0, %v8416_v0 }
  0xff   : > { %1913 = vst.msk [vmem:[#allocation2 + $0x18] sm:$0xff] %vm1909_vm0, %v8416_v0 }
 0x100   : > { %1914 = vst.msk [vmem:[#allocation2 + $0x20] sm:$0xff] %vm1909_vm0, %v8416_v0 }
 0x101   : > { %1915 = vst.msk [vmem:[#allocation2 + $0x28] sm:$0xff] %vm1909_vm0, %v8416_v0 }
 0x102   : > { %1916 = vst.msk [vmem:[#allocation2 + $0x30] sm:$0xff] %vm1909_vm0, %v8416_v0 }
 0x103   : > { %1917 = vst.msk [vmem:[#allocation2 + $0x38] sm:$0xff] %vm1909_vm0, %v8416_v0 }
 0x104   : > { %1918 = vst.msk [vmem:[#allocation2 + $0x40] sm:$0xff] %vm1909_vm0, %v8416_v0 }
 0x105   : > { %1919 = vst.msk [vmem:[#allocation2 + $0x48] sm:$0xff] %vm1909_vm0, %v8416_v0 }
 0x106   : > { %1920 = vst.msk [vmem:[#allocation2 + $0x50] sm:$0xff] %vm1909_vm0, %v8416_v0 }
 0x107   : > { %1921 = vst.msk [vmem:[#allocation2 + $0x58] sm:$0xff] %vm1909_vm0, %v8416_v0 }
 0x108   : > { %1922 = vst.msk [vmem:[#allocation2 + $0x60] sm:$0xff] %vm1909_vm0, %v8416_v0 }
 0x109   : > { %1923 = vst.msk [vmem:[#allocation2 + $0x68] sm:$0xff] %vm1909_vm0, %v8416_v0 }
 0x10a   : > { %1924 = vst.msk [vmem:[#allocation2 + $0x70] sm:$0xff] %vm1909_vm0, %v8416_v0 }
 0x10b   : > { %1925 = vst.msk [vmem:[#allocation2 + $0x78] sm:$0xff] %vm1909_vm0, %v8416_v0 }
 0x10c   : > { %1926 = vst.msk [vmem:[#allocation2 + $0x80] sm:$0xff] %vm1909_vm0, %v8416_v0 }
 0x10d   : > { %1927 = vst.msk [vmem:[#allocation2 + $0x88] sm:$0xff] %vm1909_vm0, %v8416_v0 }
 0x10e   : > { %1928 = vst.msk [vmem:[#allocation2 + $0x90] sm:$0xff] %vm1909_vm0, %v8416_v0 }
 0x10f   : > { %1929 = vst.msk [vmem:[#allocation2 + $0x98] sm:$0xff] %vm1909_vm0, %v8416_v0 }
 0x110   : > { %1930 = vst.msk [vmem:[#allocation2 + $0xa0] sm:$0xff] %vm1909_vm0, %v8416_v0 }
 0x111   : > { %1931 = vst.msk [vmem:[#allocation2 + $0xa8] sm:$0xff] %vm1909_vm0, %v8416_v0 }
 0x112   : > { %1932 = vst.msk [vmem:[#allocation2 + $0xb0] sm:$0xff] %vm1909_vm0, %v8416_v0 }
 0x113   : > { %1933 = vst.msk [vmem:[#allocation2 + $0xb8] sm:$0xff] %vm1909_vm0, %v8416_v0 }
 0x114   : > { %1934 = vst.msk [vmem:[#allocation2 + $0xc0] sm:$0xff] %vm1909_vm0, %v8416_v0 }
 0x115   : > { %1935 = vst.msk [vmem:[#allocation2 + $0xc8] sm:$0xff] %vm1909_vm0, %v8416_v0 }
 0x116   : > { %1936 = vst.msk [vmem:[#allocation2 + $0xd0] sm:$0xff] %vm1909_vm0, %v8416_v0 }
 0x117   : > { %1937 = vst.msk [vmem:[#allocation2 + $0xd8] sm:$0xff] %vm1909_vm0, %v8416_v0 }
 0x118   : > { %1938 = vst.msk [vmem:[#allocation2 + $0xe0] sm:$0xff] %vm1909_vm0, %v8416_v0 }
 0x119   : > { %1939 = vst.msk [vmem:[#allocation2 + $0xe8] sm:$0xff] %vm1909_vm0, %v8416_v0 }
 0x11a   : > { %1940 = vst.msk [vmem:[#allocation2 + $0xf0] sm:$0xff] %vm1909_vm0, %v8416_v0 }
 0x11b   : > { %1941 = vst.msk [vmem:[#allocation2 + $0xf8] sm:$0xff] %vm1909_vm0, %v8416_v0 }
 0x11c   : > { %1942 = vst.msk [vmem:[#allocation2 + $0x100] sm:$0xff] %vm1909_vm0, %v8416_v0 }
 0x11d   : > { %1943 = vst.msk [vmem:[#allocation2 + $0x108] sm:$0xff] %vm1909_vm0, %v8416_v0 }
 0x11e   : > { %1944 = vst.msk [vmem:[#allocation2 + $0x110] sm:$0xff] %vm1909_vm0, %v8416_v0 }
 0x11f   : > { %1945 = vst.msk [vmem:[#allocation2 + $0x118] sm:$0xff] %vm1909_vm0, %v8416_v0 }
 0x120   : > { %1946 = vst.msk [vmem:[#allocation2 + $0x120] sm:$0xff] %vm1909_vm0, %v8416_v0 }
 0x121   : > { %1947 = vst.msk [vmem:[#allocation2 + $0x128] sm:$0xff] %vm1909_vm0, %v8416_v0 }
 0x122   : > { %1948 = vst.msk [vmem:[#allocation2 + $0x130] sm:$0xff] %vm1909_vm0, %v8416_v0 }
 0x123   : > { %1949 = vst.msk [vmem:[#allocation2 + $0x138] sm:$0xff] %vm1909_vm0, %v8416_v0 }
 0x124   : > { %1950 = vst.msk [vmem:[#allocation2 + $0x140] sm:$0xff] %vm1909_vm0, %v8416_v0 }
 0x125   : > { %1951 = vst.msk [vmem:[#allocation2 + $0x148] sm:$0xff] %vm1909_vm0, %v8416_v0 }
 0x126   : > { %1952 = vst.msk [vmem:[#allocation2 + $0x150] sm:$0xff] %vm1909_vm0, %v8416_v0 }
 0x127   : > { %1953 = vst.msk [vmem:[#allocation2 + $0x158] sm:$0xff] %vm1909_vm0, %v8416_v0 }
 0x128   : > { %1954 = vst.msk [vmem:[#allocation2 + $0x160] sm:$0xff] %vm1909_vm0, %v8416_v0 }
 0x129   : > { %1955 = vst.msk [vmem:[#allocation2 + $0x168] sm:$0xff] %vm1909_vm0, %v8416_v0 }
 0x12a   : > { %1956 = vst.msk [vmem:[#allocation2 + $0x170] sm:$0xff] %vm1909_vm0, %v8416_v0 }
 0x12b   : > { %1957 = vst.msk [vmem:[#allocation2 + $0x178] sm:$0xff] %vm1909_vm0, %v8416_v0 }
 0x12c   : > { %1958 = vst.msk [vmem:[#allocation2 + $0x180] sm:$0xff] %vm1909_vm0, %v8416_v0 }
 0x12d   : > { %1959 = vst.msk [vmem:[#allocation2 + $0x188] sm:$0xff] %vm1909_vm0, %v8416_v0 }
 0x12e   : > { %1960 = vst.msk [vmem:[#allocation2 + $0x190] sm:$0xff] %vm1909_vm0, %v8416_v0 }
 0x12f   : > { %1961 = vst.msk [vmem:[#allocation2 + $0x198] sm:$0xff] %vm1909_vm0, %v8416_v0 }
 0x130   : > { %1962 = vst.msk [vmem:[#allocation2 + $0x1a0] sm:$0xff] %vm1909_vm0, %v8416_v0 }
 0x131   : > { %1963 = vst.msk [vmem:[#allocation2 + $0x1a8] sm:$0xff] %vm1909_vm0, %v8416_v0 }
 0x132   : > { %1964 = vst.msk [vmem:[#allocation2 + $0x1b0] sm:$0xff] %vm1909_vm0, %v8416_v0 }
 0x133   : > { %1965 = vst.msk [vmem:[#allocation2 + $0x1b8] sm:$0xff] %vm1909_vm0, %v8416_v0 }
 0x134   : > { %1966 = vst.msk [vmem:[#allocation2 + $0x1c0] sm:$0xff] %vm1909_vm0, %v8416_v0 }
 0x135   : > { %1967 = vst.msk [vmem:[#allocation2 + $0x1c8] sm:$0xff] %vm1909_vm0, %v8416_v0 }
 0x136   : > { %1968 = vst.msk [vmem:[#allocation2 + $0x1d0] sm:$0xff] %vm1909_vm0, %v8416_v0 }
 0x137   : > { %1969 = vst.msk [vmem:[#allocation2 + $0x1d8] sm:$0xff] %vm1909_vm0, %v8416_v0 }
 0x138   : > { %1970 = vst.msk [vmem:[#allocation2 + $0x1e0] sm:$0xff] %vm1909_vm0, %v8416_v0 }
 0x139   : > { %1971 = vst.msk [vmem:[#allocation2 + $0x1e8] sm:$0xff] %vm1909_vm0, %v8416_v0 }
 0x13a   : > { %1972 = vst.msk [vmem:[#allocation2 + $0x1f0] sm:$0xff] %vm1909_vm0, %v8416_v0 }
 0x13b   : > { %1973 = vst.msk [vmem:[#allocation2 + $0x1f8] sm:$0xff] %vm1909_vm0, %v8416_v0 }
 0x13c PF: > { %v7951_v1 = vld [vmem:[%s8934_s7 + $0x38] sm:$0xff]  ;;  %v7944_v2 = vld [vmem:[%s8934_s7] sm:$0xff]  ;;  %v7950_v3 = vld [vmem:[%s8934_s7 + $0x30] sm:$0xff]  ;;  %s8417_s12 = smov 32   ;;  %s8418_s14 = smov 64  }
 0x13d   : > { %2228 = vmatpush.bf16.xpose.msra.mxu0 %v7951_v1  ;;  %2463 = vxpose.xlu0.c.b16.start [1/8] %v7944_v2, 128  ;;  %v7949_v4 = vld [vmem:[%s8934_s7 + $0x28] sm:$0xff]  ;;  %v7948_v6 = vld [vmem:[%s8934_s7 + $0x20] sm:$0xff]  ;;  %v7947_v7 = vld [vmem:[%s8934_s7 + $0x18] sm:$0xff]  ;;  %s8419_s15 = smov 96  }
 0x13e   : > { %v7945_v5 = vld [vmem:[%s8934_s7 + $0x8] sm:$0xff]  ;;  %v7946_v8 = vld [vmem:[%s8934_s7 + $0x10] sm:$0xff]  ;;  %v9076_v9 = vld [vmem:[%s8932_s6] sm:$0xff] }
 0x13f   : > { %v9080_v10 = vld [vmem:[%s8932_s6 + $0x8] sm:$0xff]  ;;  %v9084_v11 = vld [vmem:[%s8932_s6 + $0x10] sm:$0xff]  ;;  %v9087_v12 = vld [vmem:[%s8934_s7 + $0xb8] sm:$0xff] }
 0x140   : > { %v9092_v13 = vld [vmem:[%s8934_s7 + $0xb0] sm:$0xff]  ;;  %v9096_v14 = vld [vmem:[%s8934_s7 + $0xa8] sm:$0xff]  ;;  %v9100_v15 = vld [vmem:[%s8934_s7 + $0xa0] sm:$0xff] }
 0x141   : > { %v9103_v16 = vld [vmem:[%s8932_s6 + $0x18] sm:$0xff]  ;;  %v9111_v18 = vld [vmem:[%s8934_s7 + $0x100] sm:$0xff]  ;;  %v9115_v19 = vld [vmem:[%s8934_s7 + $0x90] sm:$0xff] }
 0x142   : > { %v9107_v17 = vld [vmem:[%s8934_s7 + $0x98] sm:$0xff]  ;;  %3413 = vxpose.xlu1.c.b16.start [1/8] %v9111_v18, 128  ;;  %v9121_v21 = vld [vmem:[%s8934_s7 + $0x88] sm:$0xff]  ;;  %v9125_v22 = vld [vmem:[%s8934_s7 + $0x80] sm:$0xff] }
 0x143   : > { %v7959_v20 = vld [vmem:[%s8936_s8 + $0x38] sm:$0xff]  ;;  %v9128_v23 = vld [vmem:[%s8932_s6 + $0x20] sm:$0xff]  ;;  %v7958_v24 = vld [vmem:[%s8936_s8 + $0x30] sm:$0xff] }
 0x144   : > { %2479 = vmatpush.bf16.msra.mxu3 %v7959_v20  ;;  %2349 = vmatpush.bf16.msra.mxu1 %v7959_v20  ;;  %v9133_v25 = vld [vmem:[%s8936_s8 + $0xb8] sm:$0xff]  ;;  %v9137_v26 = vld [vmem:[%s8934_s7 + $0x108] sm:$0xff]  ;;  %v2023_v27 = vld [vmem:[#allocation2 + $0x70] sm:$0xff] }
 0x145   : > { %2229 = vmatpush.bf16.xpose.msra.mxu0 %v7950_v3  ;;  %v2024_v28 = vld [vmem:[#allocation2 + $0x78] sm:$0xff]  ;;  %v7957_v30 = vld [vmem:[%s8936_s8 + $0x28] sm:$0xff]  ;;  %v9142_v31 = vld [vmem:[%s8936_s8 + $0xb0] sm:$0xff] }
 0x146   : > { %v2131_v29 = vpack.c.bf16 %v2024_v28, %v2023_v27  ;;  %v2021_v32 = vld [vmem:[#allocation2 + $0x60] sm:$0xff]  ;;  %v2022_v33 = vld [vmem:[#allocation2 + $0x68] sm:$0xff]  ;;  %v2019_v35 = vld [vmem:[#allocation2 + $0x50] sm:$0xff] }
 0x147   : > { %v2130_v34 = vpack.c.bf16 %v2022_v33, %v2021_v32  ;;  %v2020_v36 = vld [vmem:[#allocation2 + $0x58] sm:$0xff]  ;;  %v7956_v37 = vld [vmem:[%s8936_s8 + $0x20] sm:$0xff]  ;;  %v7981_v38 = vld [vmem:[%s8936_s8 + $0xa8] sm:$0xff] }
 0x148   : > { %2480 = vmatpush.bf16.msra.mxu3 %v7958_v24  ;;  %2350 = vmatpush.bf16.msra.mxu1 %v7958_v24  ;;  %v2129_v39 = vpack.c.bf16 %v2020_v36, %v2019_v35  ;;  %v2017_v40 = vld [vmem:[#allocation2 + $0x40] sm:$0xff]  ;;  %v2018_v41 = vld [vmem:[#allocation2 + $0x48] sm:$0xff]  ;;  %v7955_v42 = vld [vmem:[%s8936_s8 + $0x18] sm:$0xff] }
 0x149   : > { %2398 = vmatpush.bf16.msra.mxu2 %v2131_v29  ;;  %v7980_v43 = vld [vmem:[%s8936_s8 + $0xa0] sm:$0xff]  ;;  %v2128_v44 = vpack.c.bf16 %v2018_v41, %v2017_v40  ;;  %v9151_v45 = vld [vmem:[%s8932_s6 + $0x28] sm:$0xff]  ;;  %v7954_v46 = vld [vmem:[%s8936_s8 + $0x10] sm:$0xff] }
 0x14a   : > { %v7979_v47 = vld [vmem:[%s8936_s8 + $0x98] sm:$0xff]  ;;  %v9157_v48 = vld [vmem:[%s8934_s7 + $0x110] sm:$0xff]  ;;  %v7953_v52 = vld [vmem:[%s8936_s8 + $0x8] sm:$0xff] }
 0x14b   : > { %v9159_v49 = vld [vmem:[#allocation2 + $0x30] sm:$0xff]  ;;  %v9161_v50 = vld [vmem:[#allocation2 + $0x38] sm:$0xff]  ;;  %v9167_v54 = vld [vmem:[#allocation2 + $0x20] sm:$0xff] }
 0x14c   : > { %2481 = vmatpush.bf16.msra.mxu3 %v7957_v30  ;;  %2351 = vmatpush.bf16.msra.mxu1 %v7957_v30  ;;  %v2127_v51 = vpack.c.bf16 %v9161_v50, %v9159_v49  ;;  %v7978_v53 = vld [vmem:[%s8936_s8 + $0x90] sm:$0xff]  ;;  %v9170_v55 = vld [vmem:[#allocation2 + $0x28] sm:$0xff]  ;;  %v9176_v58 = vld [vmem:[#allocation2 + $0x18] sm:$0xff] }
 0x14d   : > { %2230 = vmatpush.bf16.xpose.msra.mxu0 %v7949_v4  ;;  %2464 = vxpose.xlu0.c.b16.cont [2/8] %v7945_v5, 128  ;;  %v2126_v56 = vpack.c.bf16 %v9170_v55, %v9167_v54  ;;  %v9174_v57 = vld [vmem:[#allocation2 + $0x10] sm:$0xff]  ;;  %v7952_v59 = vld [vmem:[%s8936_s8] sm:$0xff]  ;;  %v7977_v60 = vld [vmem:[%s8936_s8 + $0x88] sm:$0xff] }
 0x14e   : > { %2399 = vmatpush.bf16.msra.mxu2 %v2130_v34  ;;  %v2125_v61 = vpack.c.bf16 %v9176_v58, %v9174_v57  ;;  %v7976_v62 = vld [vmem:[%s8936_s8 + $0x80] sm:$0xff]  ;;  %v9185_v63 = vld [vmem:[%s8932_s6 + $0x30] sm:$0xff] }
 0x14f   : > { %v9187_v0 = vld [vmem:[#allocation2] sm:$0xff] }
 0x150   : > { %2482 = vmatpush.bf16.msra.mxu3 %v7956_v37  ;;  %2352 = vmatpush.bf16.msra.mxu1 %v7956_v37 }
 0x152   : > { %3414 = vxpose.xlu1.c.b16.cont [2/8] %v9137_v26, 128  ;;  %2400 = vmatpush.bf16.msra.mxu2 %v2129_v39 }
 0x154   : > { %2483 = vmatpush.bf16.msra.mxu3 %v7955_v42  ;;  %2353 = vmatpush.bf16.msra.mxu1 %v7955_v42 }
 0x155   : > { %2231 = vmatpush.bf16.xpose.msra.mxu0 %v7948_v6 }
 0x156   : > { %2401 = vmatpush.bf16.msra.mxu2 %v2128_v44  ;;  %v2041_v44 = vld [vmem:[#allocation2 + $0xf8] sm:$0xff] }
 0x158   : > { %2484 = vmatpush.bf16.msra.mxu3 %v7954_v46  ;;  %2354 = vmatpush.bf16.msra.mxu1 %v7954_v46 }
 0x15a   : > { %2402 = vmatpush.bf16.msra.mxu2 %v2127_v51 }
 0x15c   : > { %2485 = vmatpush.bf16.msra.mxu3 %v7953_v52  ;;  %2355 = vmatpush.bf16.msra.mxu1 %v7953_v52 }
 0x15d   : > { %2232 = vmatpush.bf16.xpose.msra.mxu0 %v7947_v7  ;;  %2465 = vxpose.xlu0.c.b16.cont [3/8] %v7946_v8, 128 }
 0x15e   : > { %2403 = vmatpush.bf16.msra.mxu2 %v2126_v56  ;;  %v2038_v56 = vld [vmem:[#allocation2 + $0xe0] sm:$0xff] }
 0x160   : > { %2486 = vmatpush.bf16.msra.mxu3 %v7952_v59  ;;  %2356 = vmatpush.bf16.msra.mxu1 %v7952_v59  ;;  %v2039_v59 = vld [vmem:[#allocation2 + $0xe8] sm:$0xff] }
 0x162   : > { %3415 = vxpose.xlu1.c.b16.cont [3/8] %v9157_v48, 128  ;;  %2404 = vmatpush.bf16.msra.mxu2 %v2125_v61  ;;  %v8007_v61 = vld [vmem:[%s8936_s8 + $0x138] sm:$0xff] }
 0x164   : > { %2703 = vmatpush.bf16.xpose.msrb.mxu1 %v9087_v12 }
 0x165   : > { %2233 = vmatpush.bf16.xpose.msra.mxu0 %v7946_v8 }
 0x16c   : > { %2704 = vmatpush.bf16.xpose.msrb.mxu1 %v9092_v13 }
 0x16d   : > { %2234 = vmatpush.bf16.xpose.msra.mxu0 %v7945_v5  ;;  %2466 = vxpose.xlu0.c.b16.cont [4/8] %v7947_v7, 128  ;;  %v1974_v7 = vlaneseq }
 0x16f   : > { %v9213_v8 = vshrl.u32 %v1974_v7, 7 }
 0x171   : > { %v1977_v27 = vadd.s32 16, %v9213_v8  ;;  %v1979_v32 = vadd.s32 32, %v9213_v8  ;;  %v1980_v33 = vadd.s32 40, %v9213_v8  ;;  %v1981_v39 = vadd.s32 48, %v9213_v8 }
 0x172   : > { %v1983_v52 = vadd.s32 64, %v9213_v8 }
 0x174   : > { %2705 = vmatpush.bf16.xpose.msrb.mxu1 %v9096_v14 }
 0x175   : > { %2235 = vmatpush.bf16.xpose.msra.mxu0 %v7944_v2 }
 0x17c   : > { %2236 = vmatmul.bf16.vlgmr.msra.gmra.mxu0 %v9076_v9  ;;  %2706 = vmatpush.bf16.xpose.msrb.mxu1 %v9100_v15 }
 0x17d   : > { %2467 = vxpose.xlu0.c.b16.cont [5/8] %v7948_v6, 128  ;;  %8154 = vmatpush.lsf.bf16.msrb.mxu0 %v9087_v12  ;;  %v9208_v6 = vld [vmem:[%s8934_s7 + $0x120] sm:$0xff] }
 0x181   : > { %8155 = vmatpush.lsf.bf16.msrb.mxu0 %v9092_v13  ;;  %v1976_v13 = vadd.s32 8, %v9213_v8 }
 0x184   : > { %2707 = vmatpush.bf16.xpose.msrb.mxu1 %v9107_v17 }
 0x185   : > { %8156 = vmatpush.lsf.bf16.msrb.mxu0 %v9096_v14  ;;  %v9217_v14 = vand.u32 127, %v1974_v7 }
 0x187   : > { %vm1993_vm1 = vcmp.ge.s32.totalorder %v9213_v8, %v9217_v14  ;;  %vm1994_vm2 = vcmp.ge.s32.totalorder %v1976_v13, %v9217_v14  ;;  %vm1995_vm4 = vcmp.ge.s32.totalorder %v1977_v27, %v9217_v14  ;;  %vm1997_vm7 = vcmp.ge.s32.totalorder %v1979_v32, %v9217_v14  ;;  %v2034_v13 = vld [vmem:[#allocation2 + $0xc0] sm:$0xff] }
 0x188   : > { %vm9225_vm3 = vmpackc.low %vm1994_vm2, %vm1993_vm1  ;;  %vm1998_vm8 = vcmp.ge.s32.totalorder %v1980_v33, %v9217_v14  ;;  %vm1999_vm10 = vcmp.ge.s32.totalorder %v1981_v39, %v9217_v14  ;;  %vm2001_vm13 = vcmp.ge.s32.totalorder %v1983_v52, %v9217_v14  ;;  %v8003_v33 = vld [vmem:[%s8936_s8 + $0x118] sm:$0xff] }
 0x189   : > { %8157 = vmatpush.lsf.bf16.msrb.mxu0 %v9100_v15  ;;  %vm9251_vm9 = vmpackc.low %vm1998_vm8, %vm1997_vm7 }
 0x18c   : > { %2241 = vmatmul.bf16.gmra.mxu0 %v9080_v10  ;;  %2708 = vmatpush.bf16.xpose.msrb.mxu1 %v9115_v19 }
 0x18d   : > { %2468 = vxpose.xlu0.c.b16.cont [6/8] %v7949_v4, 128  ;;  %8158 = vmatpush.lsf.bf16.msrb.mxu0 %v9107_v17  ;;  %v9204_v4 = vld [vmem:[%s8932_s6 + $0x38] sm:$0xff] }
 0x191   : > { %8159 = vmatpush.lsf.bf16.msrb.mxu0 %v9115_v19  ;;  %v7998_v19 = vld [vmem:[%s8934_s7 + $0x130] sm:$0xff] }
 0x194   : > { %2709 = vmatpush.bf16.xpose.msrb.mxu1 %v9121_v21 }
 0x195   : > { %8160 = vmatpush.lsf.bf16.msrb.mxu0 %v9121_v21 }
 0x199   : > { %8161 = vmatpush.lsf.bf16.msrb.mxu0 %v9125_v22 }
 0x19c   : > { %2246 = vmatmul.bf16.gmra.mxu0 %v9084_v11  ;;  %2710 = vmatpush.bf16.xpose.msrb.mxu1 %v9125_v22 }
 0x19d   : > { %2469 = vxpose.xlu0.c.b16.cont [7/8] %v7950_v3, 128  ;;  %2954 = vmatpush.bf16.msra.mxu0 %v9133_v25  ;;  %v9195_v3 = vld [vmem:[%s8934_s7 + $0x118] sm:$0xff] }
 0x19e   : > { %3416 = vxpose.xlu1.c.b16.cont [4/8] %v9195_v3, 128 }
 0x1a1   : > { %2955 = vmatpush.bf16.msra.mxu0 %v9142_v31 }
 0x1a5   : > { %2956 = vmatpush.bf16.msra.mxu0 %v7981_v38 }
 0x1a9   : > { %2957 = vmatpush.bf16.msra.mxu0 %v7980_v43 }
 0x1ac   : > { %2251 = vmatmul.bf16.gmra.mxu0 %v9103_v16 }
 0x1ad   : > { %2470 = vxpose.xlu0.c.b16.end [8/8] %v7951_v1, 128  ;;  %2958 = vmatpush.bf16.msra.mxu0 %v7979_v47  ;;  %v9189_v1 = vld [vmem:[#allocation2 + $0x8] sm:$0xff] }
 0x1ae   : > { %v2124_v2 = vpack.c.bf16 %v9189_v1, %v9187_v0  ;;  %3417 = vxpose.xlu1.c.b16.cont [5/8] %v9208_v6, 128 }
 0x1b0   : > { %2405 = vmatpush.bf16.msra.mxu2 %v2124_v2  ;;  %v2037_v2 = vld [vmem:[#allocation2 + $0xd8] sm:$0xff] }
 0x1b1   : > { %2959 = vmatpush.bf16.msra.mxu0 %v7978_v53 }
 0x1b3   : > { %2406 = vmatmul.bf16.vlgmr.msra.gmra.mxu2 %v9076_v9 }
 0x1b4   : > { %2824 = vmatpush.bf16.msrb.mxu2 %v9133_v25 }
 0x1b5   : > { %2960 = vmatpush.bf16.msra.mxu0 %v7977_v60 }
 0x1b8   : > { %2825 = vmatpush.bf16.msrb.mxu2 %v9142_v31 }
 0x1b9   : > { %2961 = vmatpush.bf16.msra.mxu0 %v7976_v62 }
 0x1bb   : > { %8162 = vllmr.16.mxu0 }
 0x1bc   : > { %2256 = vmatmul.bf16.gmra.mxu0 %v9128_v23  ;;  %2826 = vmatpush.bf16.msrb.mxu2 %v7981_v38  ;;  %v9258_v38 = vld [vmem:[%s8934_s7 + $0x40] sm:$0xff] }
 0x1bd   : > { %4618 = vxpose.xlu2.c.b16.start [1/8] %v9258_v38, 128 }
 0x1c0   : > { %2827 = vmatpush.bf16.msrb.mxu2 %v7980_v43  ;;  %v2040_v43 = vld [vmem:[#allocation2 + $0xf0] sm:$0xff] }
 0x1c1   : > { %v2606_v46 = vpack.c.bf16 %v2041_v44, %v2040_v43 }
 0x1c3   : > { %2411 = vmatmul.bf16.gmra.mxu2 %v9080_v10  ;;  %v7997_v10 = vld [vmem:[%s8934_s7 + $0x128] sm:$0xff]  ;;  %2873 = vmatpush.bf16.msrb.mxu3 %v2606_v46  ;;  %v9316_v46 = vld [vmem:[%s8934_s7 + $0x58] sm:$0xff] }
 0x1c4   : > { %2828 = vmatpush.bf16.msrb.mxu2 %v7979_v47  ;;  %3418 = vxpose.xlu1.c.b16.cont [6/8] %v7997_v10, 128 }
 0x1c8   : > { %2829 = vmatpush.bf16.msrb.mxu2 %v7978_v53  ;;  %v1984_v53 = vadd.s32 72, %v9213_v8 }
 0x1ca   : > { %vm2002_vm14 = vcmp.ge.s32.totalorder %v1984_v53, %v9217_v14 }
 0x1cb   : > { %vm9285_vm15 = vmpackc.low %vm2002_vm14, %vm2001_vm13  ;;  %vm4161_vm13 = vcmask 261120   ;;  %vm4178_vm14 = vcmask 523264  }
 0x1cc   : > { %2261 = vmatmul.bf16.gmra.mxu0 %v9151_v45  ;;  %2830 = vmatpush.bf16.msrb.mxu2 %v7977_v60  ;;  %v2605_v60 = vpack.c.bf16 %v2039_v59, %v2038_v56  ;;  %v7960_v59 = vld [vmem:[%s8932_s6 + $0x80] sm:$0xff] }
 0x1ce   : > { %2874 = vmatpush.bf16.msrb.mxu3 %v2605_v60 }
 0x1d0   : > { %2831 = vmatpush.bf16.msrb.mxu2 %v7976_v62  ;;  %v2036_v62 = vld [vmem:[#allocation2 + $0xd0] sm:$0xff] }
 0x1d3   : > { %2416 = vmatmul.bf16.gmra.mxu2 %v9084_v11  ;;  %v1978_v11 = vadd.s32 24, %v9213_v8 }
 0x1d4   : > { %3419 = vxpose.xlu1.c.b16.cont [7/8] %v7998_v19, 128  ;;  %3299 = vmatpush.bf16.msra.mxu2 %v8007_v61 }
 0x1d5   : > { %vm1996_vm5 = vcmp.ge.s32.totalorder %v1978_v11, %v9217_v14 }
 0x1d6   : > { %vm9239_vm6 = vmpackc.low %vm1996_vm5, %vm1995_vm4 }
 0x1dc   : > { %2266 = vmatmul.bf16.gmra.mxu0 %v9185_v63 }
 0x1e3   : > { %2421 = vmatmul.bf16.gmra.mxu2 %v9103_v16  ;;  %v7999_v16 = vld [vmem:[%s8934_s7 + $0x138] sm:$0xff] }
 0x1e4   : > { %3420 = vxpose.xlu1.c.b16.end [8/8] %v7999_v16, 128 }
 0x1e9   : > { %v2471_v5 = vpop.trf.xlu0 }
 0x1ea   : > { %2487 = vmatmul.bf16.vlgmr.msra.gmra.mxu3 %v2471_v5  ;;  %v2604_v5 = vpack.c.bf16 %v2037_v2, %v2036_v62  ;;  %v1989_v62 = vadd.s32 112, %v9213_v8  ;;  %v1990_v2 = vadd.s32 120, %v9213_v8 }
 0x1ec   : > { %2271 = vmatmul.bf16.gmra.mxu0 %v9204_v4  ;;  %2875 = vmatpush.bf16.msrb.mxu3 %v2604_v5  ;;  %vm2007_vm8 = vcmp.ge.s32.totalorder %v1989_v62, %v9217_v14  ;;  %v2056_v62 = vld [vmem:[#allocation2 + $0x168] sm:$0xff] }
 0x1f3   : > { %2426 = vmatmul.bf16.gmra.mxu2 %v9128_v23  ;;  %v1982_v23 = vadd.s32 56, %v9213_v8 }
 0x1f5   : > { %vm2000_vm11 = vcmp.ge.s32.totalorder %v1982_v23, %v9217_v14  ;;  %v2026_v23 = vld [vmem:[#allocation2 + $0x80] sm:$0xff] }
 0x1f6   : > { %vm9266_vm12 = vmpackc.low %vm2000_vm11, %vm1999_vm10  ;;  %vm2008_vm10 = vcmp.ge.s32.totalorder %v1990_v2, %v9217_v14 }
 0x1f7   : > { %vm9342_vm11 = vmpackc.low %vm2008_vm10, %vm2007_vm8 }
 0x1f9   : > { %v2237_v9 = vpop.f32.mrf.mxu0  ;;  %v2472_v12 = vpop.trf.xlu0 }
 0x1fa   : > { %2492 = vmatmul.bf16.gmra.mxu3 %v2472_v12 }
 0x1fc   : > { %8163 = vmatmul.lmr.bf16.vlgmr.msra.gmra.16.mxu0 }
 0x1fd   : > { %3429 = vmatpush.bf16.msra.mxu0 %v8007_v61  ;;  %v9331_v61 = vld [vmem:[%s8934_s7 + $0x60] sm:$0xff] }
 0x201   : > { %v2239_v15 = vpop.f32.mrf.mxu0 }
 0x202   : > { %v6719_v20 = vpack.c.bf16 %v2239_v15, %v2237_v9 }
 0x203   : > { %2431 = vmatmul.bf16.gmra.mxu2 %v9151_v45  ;;  %v9274_v45 = vld [vmem:[%s8934_s7 + $0x48] sm:$0xff] }
 0x204   : > { %6720 = vmatmul.msk.bf16.vlgmr.msra.gmra.mxu1 %vm9225_vm3, %v6719_v20  ;;  %8164 = vmatmul.lmr.bf16.gmra.16.mxu0  ;;  %v2033_v20 = vld [vmem:[#allocation2 + $0xb8] sm:$0xff] }
 0x205   : > { %3178 = vmatpush.bf16.xpose.msra.mxu1 %v7999_v16  ;;  %4619 = vxpose.xlu2.c.b16.cont [2/8] %v9274_v45, 128  ;;  %v2029_v16 = vld [vmem:[#allocation2 + $0x98] sm:$0xff] }
 0x209   : > { %v2242_v24 = vpop.f32.mrf.mxu0  ;;  %v2473_v25 = vpop.trf.xlu0 }
 0x20a   : > { %2497 = vmatmul.bf16.gmra.mxu3 %v2473_v25  ;;  %v8004_v25 = vld [vmem:[%s8936_s8 + $0x120] sm:$0xff] }
 0x20c   : > { %8165 = vmatmul.lmr.bf16.gmra.16.mxu0 }
 0x20d   : > { %3179 = vmatpush.bf16.xpose.msra.mxu1 %v7998_v19  ;;  %v9295_v19 = vld [vmem:[%s8934_s7 + $0x50] sm:$0xff] }
 0x211   : > { %v2244_v21 = vpop.f32.mrf.mxu0 }
 0x212   : > { %v6722_v29 = vpack.c.bf16 %v2244_v21, %v2242_v24  ;;  %v1985_v21 = vadd.s32 80, %v9213_v8 }
 0x213   : > { %2436 = vmatmul.bf16.gmra.mxu2 %v9185_v63  ;;  %v8005_v63 = vld [vmem:[%s8936_s8 + $0x128] sm:$0xff] }
 0x214   : > { %6723 = vmatmul.msk.bf16.gmra.mxu1 %vm9239_vm6, %v6722_v29  ;;  %8166 = vmatmul.lmr.bf16.gmra.16.mxu0  ;;  %v1986_v29 = vadd.s32 88, %v9213_v8  ;;  %vm2003_vm0 = vcmp.ge.s32.totalorder %v1985_v21, %v9217_v14 }
 0x215   : > { %3180 = vmatpush.bf16.xpose.msra.mxu1 %v7997_v10  ;;  %v2035_v10 = vld [vmem:[#allocation2 + $0xc8] sm:$0xff]  ;;  %4620 = vxpose.xlu2.c.b16.cont [3/8] %v9295_v19, 128 }
 0x216   : > { %v2603_v15 = vpack.c.bf16 %v2035_v10, %v2034_v13  ;;  %vm2004_vm1 = vcmp.ge.s32.totalorder %v1986_v29, %v9217_v14  ;;  %v7961_v10 = vld [vmem:[%s8932_s6 + $0x88] sm:$0xff]  ;;  %v7962_v29 = vld [vmem:[%s8932_s6 + $0x90] sm:$0xff] }
 0x217   : > { %vm9306_vm2 = vmpackc.low %vm2004_vm1, %vm2003_vm0  ;;  %vm4195_vm0 = vcmask 785408  }
 0x218   : > { %2876 = vmatpush.bf16.msrb.mxu3 %v2603_v15 }
 0x219   : > { %v2247_v30 = vpop.f32.mrf.mxu0  ;;  %v2474_v31 = vpop.trf.xlu0 }
 0x21a   : > { %2502 = vmatmul.bf16.gmra.mxu3 %v2474_v31  ;;  %v2031_v31 = vld [vmem:[#allocation2 + $0xa8] sm:$0xff] }
 0x21c   : > { %8167 = vmatmul.lmr.bf16.gmra.16.mxu0 }
 0x21d   : > { %3181 = vmatpush.bf16.xpose.msra.mxu1 %v9208_v6  ;;  %v8006_v6 = vld [vmem:[%s8936_s8 + $0x130] sm:$0xff] }
 0x21e   : > { %3430 = vmatpush.bf16.msra.mxu0 %v8006_v6  ;;  %3300 = vmatpush.bf16.msra.mxu2 %v8006_v6 }
 0x221   : > { %v2249_v22 = vpop.f32.mrf.mxu0 }
 0x222   : > { %v6725_v35 = vpack.c.bf16 %v2249_v22, %v2247_v30  ;;  %3431 = vmatpush.bf16.msra.mxu0 %v8005_v63  ;;  %3301 = vmatpush.bf16.msra.mxu2 %v8005_v63  ;;  %v2030_v30 = vld [vmem:[#allocation2 + $0xa0] sm:$0xff] }
 0x223   : > { %v2601_v32 = vpack.c.bf16 %v2031_v31, %v2030_v30  ;;  %2441 = vmatmul.bf16.gmra.mxu2 %v9204_v4 }
 0x224   : > { %6726 = vmatmul.msk.bf16.gmra.mxu1 %vm9251_vm9, %v6725_v35  ;;  %8168 = vmatmul.lmr.bf16.gmra.16.mxu0  ;;  %v8002_v35 = vld [vmem:[%s8936_s8 + $0x110] sm:$0xff] }
 0x225   : > { %3182 = vmatpush.bf16.xpose.msra.mxu1 %v9195_v3  ;;  %v2032_v3 = vld [vmem:[#allocation2 + $0xb0] sm:$0xff]  ;;  %4621 = vxpose.xlu2.c.b16.cont [4/8] %v9316_v46, 128 }
 0x226   : > { %v2602_v24 = vpack.c.bf16 %v2033_v20, %v2032_v3  ;;  %3432 = vmatpush.bf16.msra.mxu0 %v8004_v25  ;;  %3302 = vmatpush.bf16.msra.mxu2 %v8004_v25  ;;  %v3421_v3 = vpop.trf.xlu1 }
 0x228   : > { %2877 = vmatpush.bf16.msrb.mxu3 %v2602_v24 }
 0x229   : > { %v2252_v36 = vpop.f32.mrf.mxu0  ;;  %v2475_v37 = vpop.trf.xlu0 }
 0x22a   : > { %2507 = vmatmul.bf16.gmra.mxu3 %v2475_v37  ;;  %3433 = vmatpush.bf16.msra.mxu0 %v8003_v33 }
 0x22b   : > { %3303 = vmatpush.bf16.msra.mxu2 %v8003_v33  ;;  %v9373_v33 = vld [vmem:[%s8934_s7 + $0x70] sm:$0xff] }
 0x22c   : > { %8169 = vmatmul.lmr.bf16.gmra.16.mxu0  ;;  %2878 = vmatpush.bf16.msrb.mxu3 %v2601_v32 }
 0x22d   : > { %3183 = vmatpush.bf16.xpose.msra.mxu1 %v9157_v48  ;;  %v2028_v48 = vld [vmem:[#allocation2 + $0x90] sm:$0xff] }
 0x22e   : > { %v2600_v22 = vpack.c.bf16 %v2029_v16, %v2028_v48  ;;  %3434 = vmatpush.bf16.msra.mxu0 %v8002_v35 }
 0x22f   : > { %3304 = vmatpush.bf16.msra.mxu2 %v8002_v35 }
 0x230   : > { %2879 = vmatpush.bf16.msrb.mxu3 %v2600_v22  ;;  %v3422_v30 = vpop.trf.xlu1 }
 0x231   : > { %v2254_v40 = vpop.f32.mrf.mxu0 }
 0x232   : > { %v6728_v42 = vpack.c.bf16 %v2254_v40, %v2252_v36  ;;  %v2027_v40 = vld [vmem:[#allocation2 + $0x88] sm:$0xff] }
 0x233   : > { %v2599_v4 = vpack.c.bf16 %v2027_v40, %v2026_v23  ;;  %v9387_v40 = vld [vmem:[%s8932_s6 + $0x98] sm:$0xff] }
 0x234   : > { %6729 = vmatmul.msk.bf16.gmra.mxu1 %vm9266_vm12, %v6728_v42  ;;  %8170 = vmatmul.lmr.bf16.gmra.16.mxu0  ;;  %v8001_v42 = vld [vmem:[%s8936_s8 + $0x108] sm:$0xff] }
 0x235   : > { %3184 = vmatpush.bf16.xpose.msra.mxu1 %v9137_v26  ;;  %2880 = vmatpush.bf16.msrb.mxu3 %v2599_v4  ;;  %v8000_v26 = vld [vmem:[%s8936_s8 + $0x100] sm:$0xff] }
 0x236   : > { %3435 = vmatpush.bf16.msra.mxu0 %v8001_v42  ;;  %3305 = vmatpush.bf16.msra.mxu2 %v8001_v42  ;;  %v2407_v56 = vpop.f32.mrf.mxu2 }
 0x237   : > { %4622 = vxpose.xlu2.c.b16.cont [5/8] %v9331_v61, 128 }
 0x239   : > { %v2257_v47 = vpop.f32.mrf.mxu0  ;;  %v2476_v51 = vpop.trf.xlu0 }
 0x23a   : > { %2512 = vmatmul.bf16.gmra.mxu3 %v2476_v51  ;;  %3436 = vmatpush.bf16.msra.mxu0 %v8000_v26  ;;  %v1988_v51 = vadd.s32 104, %v9213_v8 }
 0x23b   : > { %3306 = vmatpush.bf16.msra.mxu2 %v8000_v26 }
 0x23c   : > { %8171 = vmatmul.lmr.bf16.gmra.16.mxu0  ;;  %vm2006_vm5 = vcmp.ge.s32.totalorder %v1988_v51, %v9217_v14  ;;  %v2058_v51 = vld [vmem:[#allocation2 + $0x178] sm:$0xff] }
 0x23d   : > { %3185 = vmatpush.bf16.xpose.msra.mxu1 %v9111_v18 }
 0x23e   : > { %v9336_v5 = vpop.f32.mrf.mxu2 }
 0x23f   : > { %11315 = vst [vmem:[#allocation6_spill] sm:$0xff] %v9336_v5 }
 0x240   : > { %v3423_v4 = vpop.trf.xlu1 }
 0x241   : > { %v2259_v7 = vpop.f32.mrf.mxu0 }
 0x242   : > { %v6731_v12 = vpack.c.bf16 %v2259_v7, %v2257_v47  ;;  %v1987_v47 = vadd.s32 96, %v9213_v8 }
 0x244   : > { %6732 = vmatmul.msk.bf16.gmra.mxu1 %vm9285_vm15, %v6731_v12  ;;  %8172 = vmatmul.lmr.bf16.gmra.16.mxu0  ;;  %vm2005_vm4 = vcmp.ge.s32.totalorder %v1987_v47, %v9217_v14  ;;  %v9354_v14 = vld [vmem:[%s8934_s7 + $0x68] sm:$0xff]  ;;  %v2057_v47 = vld [vmem:[#allocation2 + $0x170] sm:$0xff] }
 0x245   : > { %vm9323_vm7 = vmpackc.low %vm2006_vm5, %vm2005_vm4 }
 0x246   : > { %v2412_v15 = vpop.f32.mrf.mxu2 }
 0x247   : > { %4623 = vxpose.xlu2.c.b16.cont [6/8] %v9354_v14, 128 }
 0x249   : > { %v2262_v27 = vpop.f32.mrf.mxu0  ;;  %v2477_v11 = vpop.trf.xlu0 }
 0x24a   : > { %2517 = vmatmul.bf16.gmra.mxu3 %v2477_v11 }
 0x24c   : > { %8173 = vmatmul.lmr.bf16.gmra.16.mxu0 }
 0x24e   : > { %v9359_v24 = vpop.f32.mrf.mxu2 }
 0x24f   : > { %11319 = vst [vmem:[#allocation8_spill] sm:$0xff] %v9359_v24  ;;  %v2074_v24 = vld [vmem:[#allocation2 + $0x1f0] sm:$0xff] }
 0x251   : > { %v2264_v36 = vpop.f32.mrf.mxu0 }
 0x252   : > { %v6734_v39 = vpack.c.bf16 %v2264_v36, %v2262_v27 }
 0x254   : > { %6735 = vmatmul.msk.bf16.gmra.mxu1 %vm9306_vm2, %v6734_v39  ;;  %8174 = vmatmul.lmr.bf16.gmra.16.mxu0 }
 0x256   : > { %v2417_v48 = vpop.f32.mrf.mxu2 }
 0x257   : > { %4624 = vxpose.xlu2.c.b16.cont [7/8] %v9373_v33, 128 }
 0x259   : > { %v2267_v43 = vpop.f32.mrf.mxu0  ;;  %v2478_v44 = vpop.trf.xlu0 }
 0x25a   : > { %2522 = vmatmul.bf16.gmra.mxu3 %v2478_v44  ;;  %v8023_v44 = vld [vmem:[%s8934_s7 + $0x1b8] sm:$0xff] }
 0x25b   : > { %8179 = vmatpush.lsf.bf16.msrb.mxu0 %v8023_v44 }
 0x25c   : > { %8175 = vmatmul.lmr.bf16.gmra.16.mxu0 }
 0x25e   : > { %v9382_v39 = vpop.f32.mrf.mxu2 }
 0x25f   : > { %11326 = vst [vmem:[#allocation15_spill] sm:$0xff] %v9382_v39 }
 0x261   : > { %v2269_v18 = vpop.f32.mrf.mxu0 }
 0x262   : > { %v6737_v53 = vpack.c.bf16 %v2269_v18, %v2267_v43  ;;  %v9394_v43 = vld [vmem:[%s8934_s7 + $0x78] sm:$0xff]  ;;  %v3081_v18 = vpack.c.bf16 %v2058_v51, %v2057_v47  ;;  %v2051_v47 = vld [vmem:[#allocation2 + $0x140] sm:$0xff]  ;;  %v2052_v51 = vld [vmem:[#allocation2 + $0x148] sm:$0xff] }
 0x264   : > { %6738 = vmatmul.msk.bf16.gmra.mxu1 %vm9323_vm7, %v6737_v53  ;;  %8176 = vmatmul.lmr.bf16.gmra.16.mxu0 }
 0x265   : > { %3348 = vmatpush.bf16.msra.mxu3 %v3081_v18 }
 0x267   : > { %4625 = vxpose.xlu2.c.b16.end [8/8] %v9394_v43, 128 }
 0x269   : > { %v2272_v60 = vpop.f32.mrf.mxu0 }
 0x26a   : > { %2881 = vmatmul.bf16.vlgmr.msrb.gmra.mxu3 %v7960_v59 }
 0x26c   : > { %8177 = vmatmul.lmr.bf16.gmra.16.mxu0 }
 0x26d   : > { %v9338_v6 = vpop.f32.mrf.mxu3 }
 0x271   : > { %v2274_v7 = vpop.f32.mrf.mxu0 }
 0x272   : > { %v6740_v13 = vpack.c.bf16 %v2274_v7, %v2272_v60  ;;  %v2055_v60 = vld [vmem:[#allocation2 + $0x160] sm:$0xff] }
 0x273   : > { %v3080_v2 = vpack.c.bf16 %v2056_v62, %v2055_v60  ;;  %v3078_v60 = vpack.c.bf16 %v2052_v51, %v2051_v47  ;;  %v9425_v47 = vld [vmem:[%s8934_s7 + $0x190] sm:$0xff]  ;;  %v2047_v51 = vld [vmem:[#allocation2 + $0x120] sm:$0xff] }
 0x274   : > { %6741 = vmatmul.msk.bf16.gmra.mxu1 %vm9342_vm11, %v6740_v13  ;;  %8178 = vmatmul.lmr.bf16.gmra.16.mxu0 }
 0x275   : > { %v9348_v8 = vpop.f32.mrf.mxu3  ;;  %3349 = vmatpush.bf16.msra.mxu3 %v3080_v2  ;;  %v8112_v2 = vld [vmem:[%s8934_s7 + $0x1c0] sm:$0xff] }
 0x277   : > { %6043 = vxpose.xlu2.c.b16.start [1/8] %v8112_v2, 128 }
 0x279   : > { %v9351_v63 = vpop.f32.mrf.mxu0 }
 0x27a   : > { %11318 = vst [vmem:[#allocation7_spill] sm:$0xff] %v9351_v63  ;;  %2886 = vmatmul.bf16.gmra.mxu3 %v7961_v10 }
 0x27c   : > { %3437 = vmatmul.bf16.vlgmr.msra.gmra.mxu0 %v3421_v3  ;;  %v2053_v3 = vld [vmem:[#allocation2 + $0x150] sm:$0xff] }
 0x27d   : > { %v9357_v20 = vpop.f32.mrf.mxu3 }
 0x281   : > { %v2358_v25 = vpop.f32.mrf.mxu1  ;;  %v9361_v27 = vpop.f32.mrf.mxu0 }
 0x282   : > { %11320 = vst [vmem:[#allocation9_spill] sm:$0xff] %v9361_v27  ;;  %v9363_v11 = vadd.f32 %v2407_v56, %v2358_v25  ;;  %v2422_v56 = vpop.f32.mrf.mxu2  ;;  %v2054_v25 = vld [vmem:[#allocation2 + $0x158] sm:$0xff]  ;;  %v8114_v27 = vld [vmem:[%s8934_s7 + $0x1d0] sm:$0xff] }
 0x284   : > { %11321 = vst [vmem:[#allocation10_spill] sm:$0xff] %v9363_v11  ;;  %2711 = vmatmul.bf16.vlgmr.msrb.gmra.mxu1 %v7960_v59  ;;  %v8022_v59 = vld [vmem:[%s8934_s7 + $0x1b0] sm:$0xff] }
 0x285   : > { %v9365_v21 = vpop.f32.mrf.mxu3  ;;  %3653 = vmatpush.bf16.xpose.msrb.mxu1 %v8023_v44  ;;  %8180 = vmatpush.lsf.bf16.msrb.mxu0 %v8022_v59  ;;  %v8020_v44 = vld [vmem:[%s8934_s7 + $0x1a0] sm:$0xff] }
 0x289   : > { %v9368_v31 = vpop.f32.mrf.mxu1  ;;  %v9370_v32 = vpop.f32.mrf.mxu0 }
 0x28a   : > { %11322 = vst [vmem:[#allocation11_spill] sm:$0xff] %v9368_v31  ;;  %2891 = vmatmul.bf16.gmra.mxu3 %v7962_v29  ;;  %v9413_v18 = vpop.f32.mrf.mxu2 }
 0x28b   : > { %11323 = vst [vmem:[#allocation12_spill] sm:$0xff] %v9370_v32  ;;  %v2063_v32 = vld [vmem:[#allocation2 + $0x198] sm:$0xff] }
 0x28c   : > { %3442 = vmatmul.bf16.gmra.mxu0 %v3422_v30  ;;  %v3079_v30 = vpack.c.bf16 %v2054_v25, %v2053_v3  ;;  %11331 = vst [vmem:[#allocation20_spill] sm:$0xff] %v9413_v18  ;;  %v2050_v3 = vld [vmem:[#allocation2 + $0x138] sm:$0xff] }
 0x28d   : > { %v9376_v16 = vpop.f32.mrf.mxu3  ;;  %3654 = vmatpush.bf16.xpose.msrb.mxu1 %v8022_v59  ;;  %v8019_v59 = vld [vmem:[%s8934_s7 + $0x198] sm:$0xff] }
 0x28e   : > { %3350 = vmatpush.bf16.msra.mxu3 %v3079_v30 }
 0x291   : > { %v2363_v22 = vpop.f32.mrf.mxu1  ;;  %v9378_v35 = vpop.f32.mrf.mxu0 }
 0x292   : > { %11324 = vst [vmem:[#allocation13_spill] sm:$0xff] %v9378_v35  ;;  %v9380_v36 = vadd.f32 %v2412_v15, %v2363_v22  ;;  %v8021_v15 = vld [vmem:[%s8934_s7 + $0x1a8] sm:$0xff]  ;;  %3351 = vmatpush.bf16.msra.mxu3 %v3078_v60 }
 0x293   : > { %8181 = vmatpush.lsf.bf16.msrb.mxu0 %v8021_v15 }
 0x294   : > { %11325 = vst [vmem:[#allocation14_spill] sm:$0xff] %v9380_v36  ;;  %2716 = vmatmul.bf16.gmra.mxu1 %v7961_v10  ;;  %v8088_v36 = vld [vmem:[%s8934_s7 + $0x140] sm:$0xff] }
 0x295   : > { %v9384_v23 = vpop.f32.mrf.mxu3  ;;  %3655 = vmatpush.bf16.xpose.msrb.mxu1 %v8021_v15  ;;  %5568 = vxpose.xlu1.c.b16.start [1/8] %v8088_v36, 128  ;;  %v9434_v15 = vld [vmem:[%s8934_s7 + $0x188] sm:$0xff] }
 0x296   : > { %v2044_v36 = vld [vmem:[#allocation2 + $0x108] sm:$0xff] }
 0x297   : > { %8182 = vmatpush.lsf.bf16.msrb.mxu0 %v8020_v44 }
 0x299   : > { %v9389_v42 = vpop.f32.mrf.mxu1  ;;  %v9391_v26 = vpop.f32.mrf.mxu0 }
 0x29a   : > { %11327 = vst [vmem:[#allocation16_spill] sm:$0xff] %v9389_v42  ;;  %2896 = vmatmul.bf16.gmra.mxu3 %v9387_v40  ;;  %v2075_v42 = vld [vmem:[#allocation2 + $0x1f8] sm:$0xff] }
 0x29b   : > { %11328 = vst [vmem:[#allocation17_spill] sm:$0xff] %v9391_v26  ;;  %8183 = vmatpush.lsf.bf16.msrb.mxu0 %v8019_v59 }
 0x29c   : > { %3447 = vmatmul.bf16.gmra.mxu0 %v3423_v4  ;;  %v9410_v4 = vld [vmem:[%s8932_s6 + $0xa0] sm:$0xff] }
 0x29d   : > { %v9399_v53 = vpop.f32.mrf.mxu3  ;;  %3656 = vmatpush.bf16.xpose.msrb.mxu1 %v8020_v44  ;;  %v3556_v44 = vpack.c.bf16 %v2075_v42, %v2074_v24  ;;  %v9462_v24 = vld [vmem:[%s8936_s8 + $0x1b0] sm:$0xff]  ;;  %v8089_v42 = vld [vmem:[%s8934_s7 + $0x148] sm:$0xff] }
 0x29f   : > { %8184 = vmatpush.lsf.bf16.msrb.mxu0 %v9425_v47 }
 0x2a1   : > { %v2368_v7 = vpop.f32.mrf.mxu1  ;;  %v9402_v13 = vpop.f32.mrf.mxu0 }
 0x2a2   : > { %11329 = vst [vmem:[#allocation18_spill] sm:$0xff] %v9402_v13  ;;  %v9404_v10 = vadd.f32 %v2417_v48, %v2368_v7  ;;  %v3424_v48 = vpop.trf.xlu1  ;;  %v2049_v7 = vld [vmem:[#allocation2 + $0x130] sm:$0xff] }
 0x2a3   : > { %v3077_v25 = vpack.c.bf16 %v2050_v3, %v2049_v7  ;;  %v2427_v7 = vpop.f32.mrf.mxu2  ;;  %v2045_v3 = vld [vmem:[#allocation2 + $0x110] sm:$0xff]  ;;  %8185 = vmatpush.lsf.bf16.msrb.mxu0 %v9434_v15 }
 0x2a4   : > { %11330 = vst [vmem:[#allocation19_spill] sm:$0xff] %v9404_v10  ;;  %2721 = vmatmul.bf16.gmra.mxu1 %v7962_v29  ;;  %v2048_v10 = vld [vmem:[#allocation2 + $0x128] sm:$0xff] }
 0x2a5   : > { %v9407_v22 = vpop.f32.mrf.mxu3  ;;  %3352 = vmatpush.bf16.msra.mxu3 %v3077_v25  ;;  %v3076_v11 = vpack.c.bf16 %v2048_v10, %v2047_v51  ;;  %v2046_v25 = vld [vmem:[#allocation2 + $0x118] sm:$0xff]  ;;  %v9441_v51 = vld [vmem:[%s8932_s6 + $0xa8] sm:$0xff]  ;;  %3657 = vmatpush.bf16.xpose.msrb.mxu1 %v8019_v59 }
 0x2a6   : > { %v3075_v18 = vpack.c.bf16 %v2046_v25, %v2045_v3  ;;  %v8113_v25 = vld [vmem:[%s8934_s7 + $0x1c8] sm:$0xff]  ;;  %5569 = vxpose.xlu1.c.b16.cont [2/8] %v8089_v42, 128 }
 0x2a7   : > { %6044 = vxpose.xlu2.c.b16.cont [2/8] %v8113_v25, 128  ;;  %v2071_v25 = vld [vmem:[#allocation2 + $0x1d8] sm:$0xff]  ;;  %v9471_v59 = vld [vmem:[%s8936_s8 + $0x1a8] sm:$0xff] }
 0x2a9   : > { %v9415_v62 = vpop.f32.mrf.mxu1  ;;  %v9417_v29 = vpop.f32.mrf.mxu0  ;;  %3353 = vmatpush.bf16.msra.mxu3 %v3076_v11  ;;  %v2043_v11 = vld [vmem:[#allocation2 + $0x100] sm:$0xff] }
 0x2aa   : > { %11332 = vst [vmem:[#allocation21_spill] sm:$0xff] %v9415_v62  ;;  %2901 = vmatmul.bf16.gmra.mxu3 %v9410_v4 }
 0x2ab   : > { %11333 = vst [vmem:[#allocation22_spill] sm:$0xff] %v9417_v29 }
 0x2ac   : > { %3452 = vmatmul.bf16.gmra.mxu0 %v3424_v48 }
 0x2ad   : > { %v9422_v30 = vpop.f32.mrf.mxu3  ;;  %3354 = vmatpush.bf16.msra.mxu3 %v3075_v18  ;;  %v9454_v18 = vld [vmem:[%s8936_s8 + $0x1b8] sm:$0xff]  ;;  %3658 = vmatpush.bf16.xpose.msrb.mxu1 %v9425_v47 }
 0x2ae   : > { %v9489_v47 = vld [vmem:[%s8936_s8 + $0x198] sm:$0xff] }
 0x2b1   : > { %v2373_v60 = vpop.f32.mrf.mxu1  ;;  %v9428_v2 = vpop.f32.mrf.mxu0 }
 0x2b2   : > { %11334 = vst [vmem:[#allocation23_spill] sm:$0xff] %v9428_v2  ;;  %v9431_v48 = vadd.f32 %v2422_v56, %v2373_v60  ;;  %v9444_v56 = vld [vmem:[%s8934_s7 + $0x180] sm:$0xff]  ;;  %v3425_v60 = vpop.trf.xlu1  ;;  %v7967_v2 = vld [vmem:[%s8932_s6 + $0xb8] sm:$0xff] }
 0x2b3   : > { %8186 = vmatpush.lsf.bf16.msrb.mxu0 %v9444_v56 }
 0x2b4   : > { %11335 = vst [vmem:[#allocation24_spill] sm:$0xff] %v9431_v48  ;;  %2726 = vmatmul.bf16.gmra.mxu1 %v9387_v40  ;;  %v3074_v48 = vpack.c.bf16 %v2044_v36, %v2043_v11  ;;  %v9456_v11 = vpop.f32.mrf.mxu2  ;;  %v2072_v36 = vld [vmem:[#allocation2 + $0x1e0] sm:$0xff] }
 0x2b5   : > { %v9437_v10 = vpop.f32.mrf.mxu3  ;;  %11338 = vst [vmem:[#allocation27_spill] sm:$0xff] %v9456_v11  ;;  %3659 = vmatpush.bf16.xpose.msrb.mxu1 %v9434_v15  ;;  %v9505_v15 = vld [vmem:[%s8936_s8 + $0x188] sm:$0xff] }
 0x2b6   : > { %3355 = vmatpush.bf16.msra.mxu3 %v3074_v48  ;;  %v2070_v48 = vld [vmem:[#allocation2 + $0x1d0] sm:$0xff] }
 0x2b7   : > { %3904 = vmatpush.bf16.msra.mxu0 %v9454_v18  ;;  %6045 = vxpose.xlu2.c.b16.cont [3/8] %v8114_v27, 128  ;;  %v2062_v27 = vld [vmem:[#allocation2 + $0x190] sm:$0xff] }
 0x2b8   : > { %v3550_v13 = vpack.c.bf16 %v2063_v32, %v2062_v27  ;;  %v9512_v32 = vld [vmem:[%s8936_s8 + $0x180] sm:$0xff] }
 0x2b9   : > { %v9446_v40 = vpop.f32.mrf.mxu1  ;;  %v9448_v3 = vpop.f32.mrf.mxu0 }
 0x2ba   : > { %11336 = vst [vmem:[#allocation25_spill] sm:$0xff] %v9446_v40  ;;  %2906 = vmatmul.bf16.gmra.mxu3 %v9441_v51  ;;  %v2073_v40 = vld [vmem:[#allocation2 + $0x1e8] sm:$0xff]  ;;  %v3426_v42 = vpop.trf.xlu1 }
 0x2bb   : > { %11337 = vst [vmem:[#allocation26_spill] sm:$0xff] %v9448_v3  ;;  %3823 = vmatpush.bf16.msrb.mxu3 %v3556_v44  ;;  %v3555_v31 = vpack.c.bf16 %v2073_v40, %v2072_v36  ;;  %v3554_v44 = vpack.c.bf16 %v2071_v25, %v2070_v48  ;;  %3905 = vmatpush.bf16.msra.mxu0 %v9462_v24  ;;  %v2069_v40 = vld [vmem:[#allocation2 + $0x1c8] sm:$0xff]  ;;  %v9480_v25 = vld [vmem:[%s8936_s8 + $0x1a0] sm:$0xff]  ;;  %v8293_v3 = vld [vmem:[#allocation2 + $0x78] sm:$0xff] }
 0x2bc   : > { %3457 = vmatmul.bf16.gmra.mxu0 %v3425_v60  ;;  %v2432_v48 = vpop.f32.mrf.mxu2 }
 0x2bd   : > { %v9458_v5 = vpop.f32.mrf.mxu3  ;;  %3660 = vmatpush.bf16.xpose.msrb.mxu1 %v9444_v56 }
 0x2bf   : > { %3824 = vmatpush.bf16.msrb.mxu3 %v3555_v31  ;;  %v2068_v31 = vld [vmem:[#allocation2 + $0x1c0] sm:$0xff]  ;;  %3906 = vmatpush.bf16.msra.mxu0 %v9471_v59 }
 0x2c0   : > { %v3553_v62 = vpack.c.bf16 %v2069_v40, %v2068_v31  ;;  %v2064_v40 = vld [vmem:[#allocation2 + $0x1a0] sm:$0xff] }
 0x2c1   : > { %v2378_v60 = vpop.f32.mrf.mxu1  ;;  %v9465_v11 = vpop.f32.mrf.mxu0 }
 0x2c2   : > { %11339 = vst [vmem:[#allocation28_spill] sm:$0xff] %v9465_v11  ;;  %v9467_v39 = vadd.f32 %v2427_v7, %v2378_v60  ;;  %v7966_v7 = vld [vmem:[%s8932_s6 + $0xb0] sm:$0xff] }
 0x2c3   : > { %3825 = vmatpush.bf16.msrb.mxu3 %v3554_v44  ;;  %v2066_v60 = vld [vmem:[#allocation2 + $0x1b0] sm:$0xff]  ;;  %3907 = vmatpush.bf16.msra.mxu0 %v9480_v25 }
 0x2c4   : > { %11340 = vst [vmem:[#allocation29_spill] sm:$0xff] %v9467_v39  ;;  %2731 = vmatmul.bf16.gmra.mxu1 %v9410_v4  ;;  %v2067_v4 = vld [vmem:[#allocation2 + $0x1b8] sm:$0xff] }
 0x2c5   : > { %v9474_v36 = vpop.f32.mrf.mxu3  ;;  %v3552_v31 = vpack.c.bf16 %v2067_v4, %v2066_v60  ;;  %v9496_v60 = vpop.f32.mrf.mxu2  ;;  %v8090_v4 = vld [vmem:[%s8934_s7 + $0x150] sm:$0xff] }
 0x2c6   : > { %11343 = vst [vmem:[#allocation32_spill] sm:$0xff] %v9496_v60  ;;  %5570 = vxpose.xlu1.c.b16.cont [3/8] %v8090_v4, 128 }
 0x2c7   : > { %3826 = vmatpush.bf16.msrb.mxu3 %v3553_v62  ;;  %v2065_v62 = vld [vmem:[#allocation2 + $0x1a8] sm:$0xff]  ;;  %3908 = vmatpush.bf16.msra.mxu0 %v9489_v47 }
 0x2c8   : > { %v3551_v35 = vpack.c.bf16 %v2065_v62, %v2064_v40  ;;  %v2061_v40 = vld [vmem:[#allocation2 + $0x188] sm:$0xff] }
 0x2c9   : > { %v9482_v44 = vpop.f32.mrf.mxu1  ;;  %v9484_v39 = vpop.f32.mrf.mxu0 }
 0x2ca   : > { %11341 = vst [vmem:[#allocation30_spill] sm:$0xff] %v9482_v44  ;;  %2911 = vmatmul.bf16.gmra.mxu3 %v7966_v7  ;;  %v9494_v44 = vld [vmem:[%s8936_s8 + $0x190] sm:$0xff] }
 0x2cb   : > { %8187 = vllmr.16.mxu0  ;;  %11342 = vst [vmem:[#allocation31_spill] sm:$0xff] %v9484_v39  ;;  %3827 = vmatpush.bf16.msrb.mxu3 %v3552_v31 }
 0x2cc   : > { %3462 = vmatmul.bf16.gmra.mxu0 %v3426_v42 }
 0x2cd   : > { %v2518_v63 = vpop.f32.mrf.mxu3  ;;  %3909 = vmatpush.bf16.msra.mxu0 %v9494_v44 }
 0x2cf   : > { %3828 = vmatpush.bf16.msrb.mxu3 %v3551_v35  ;;  %v2060_v35 = vld [vmem:[#allocation2 + $0x180] sm:$0xff] }
 0x2d0   : > { %v3549_v60 = vpack.c.bf16 %v2061_v40, %v2060_v35 }
 0x2d1   : > { %v2383_v42 = vpop.f32.mrf.mxu1  ;;  %v9499_v31 = vpop.f32.mrf.mxu0  ;;  %3910 = vmatpush.bf16.msra.mxu0 %v9505_v15 }
 0x2d2   : > { %11344 = vst [vmem:[#allocation33_spill] sm:$0xff] %v9499_v31  ;;  %v9501_v26 = vadd.f32 %v2432_v48, %v2383_v42  ;;  %v3427_v48 = vpop.trf.xlu1  ;;  %v8091_v42 = vld [vmem:[%s8934_s7 + $0x158] sm:$0xff] }
 0x2d3   : > { %3829 = vmatpush.bf16.msrb.mxu3 %v3550_v13  ;;  %v2437_v13 = vpop.f32.mrf.mxu2 }
 0x2d4   : > { %11345 = vst [vmem:[#allocation34_spill] sm:$0xff] %v9501_v26  ;;  %2736 = vmatmul.bf16.gmra.mxu1 %v9441_v51  ;;  %v8115_v51 = vld [vmem:[%s8934_s7 + $0x1d8] sm:$0xff] }
 0x2d5   : > { %v2520_v62 = vpop.f32.mrf.mxu3  ;;  %3911 = vmatpush.bf16.msra.mxu0 %v9512_v32  ;;  %6046 = vxpose.xlu2.c.b16.cont [4/8] %v8115_v51, 128  ;;  %v8294_v51 = vld [vmem:[#allocation2 + $0x60] sm:$0xff] }
 0x2d6   : > { %5571 = vxpose.xlu1.c.b16.cont [4/8] %v8091_v42, 128  ;;  %v9532_v39 = vadd.f32 %v8294_v51, %v2518_v63  ;;  %v8297_v63 = vld [vmem:[#allocation2 + $0x58] sm:$0xff] }
 0x2d7   : > { %3830 = vmatpush.bf16.msrb.mxu3 %v3549_v60  ;;  %v8292_v60 = vld [vmem:[#allocation2 + $0x70] sm:$0xff] }
 0x2d8   : > { %11353 = vst [vmem:[#allocation42_spill] sm:$0xff] %v9532_v39 }
 0x2d9   : > { %v9514_v4 = vpop.f32.mrf.mxu1  ;;  %v9516_v27 = vpop.f32.mrf.mxu0 }
 0x2da   : > { %11346 = vst [vmem:[#allocation35_spill] sm:$0xff] %v9514_v4  ;;  %2916 = vmatmul.bf16.gmra.mxu3 %v7967_v2 }
 0x2db   : > { %11347 = vst [vmem:[#allocation36_spill] sm:$0xff] %v9516_v27  ;;  %v9527_v29 = vpop.f32.mrf.mxu2  ;;  %v8295_v27 = vld [vmem:[#allocation2 + $0x68] sm:$0xff] }
 0x2dc   : > { %3467 = vmatmul.bf16.gmra.mxu0 %v3427_v48  ;;  %11351 = vst [vmem:[#allocation40_spill] sm:$0xff] %v9527_v29  ;;  %v7984_v48 = vld [vmem:[%s8932_s6 + $0x100] sm:$0xff] }
 0x2dd   : > { %v2523_v56 = vpop.f32.mrf.mxu3 }
 0x2de   : > { %v9525_v4 = vadd.f32 %v8292_v60, %v2523_v56  ;;  %v9547_v60 = vadd.f32 %v8297_v63, %v9474_v36  ;;  %v9560_v36 = vld [vmem:[%s8934_s7 + $0x160] sm:$0xff] }
 0x2e0   : > { %11350 = vst [vmem:[#allocation39_spill] sm:$0xff] %v9525_v4 }
 0x2e1   : > { %v2388_v35 = vpop.f32.mrf.mxu1  ;;  %v9521_v40 = vpop.f32.mrf.mxu0  ;;  %11357 = vst [vmem:[#allocation46_spill] sm:$0xff] %v9547_v60 }
 0x2e2   : > { %11348 = vst [vmem:[#allocation37_spill] sm:$0xff] %v9521_v40  ;;  %v9523_v26 = vadd.f32 %v2437_v13, %v2388_v35  ;;  %v9534_v40 = vadd.f32 %v8295_v27, %v2520_v62  ;;  %v3428_v13 = vpop.trf.xlu1  ;;  %v8116_v35 = vld [vmem:[%s8934_s7 + $0x1e0] sm:$0xff] }
 0x2e3   : > { %v8298_v27 = vld [vmem:[#allocation2 + $0x40] sm:$0xff] }
 0x2e4   : > { %11349 = vst [vmem:[#allocation38_spill] sm:$0xff] %v9523_v26  ;;  %2741 = vmatmul.bf16.gmra.mxu1 %v7966_v7  ;;  %v4285_v62 = vpack.c.bf16 %v9534_v40, %v9532_v39  ;;  %v9552_v51 = vadd.f32 %v8298_v27, %v9422_v30  ;;  %v8299_v26 = vld [vmem:[#allocation2 + $0x48] sm:$0xff]  ;;  %v9573_v30 = vadd.f32 %v9407_v22, %v9161_v50 }
 0x2e5   : > { %v2525_v11 = vpop.f32.mrf.mxu3  ;;  %11354 = vst [vmem:[#allocation43_spill] sm:$0xff] %v9534_v40  ;;  %6047 = vxpose.xlu2.c.b16.cont [5/8] %v8116_v35, 128  ;;  %v9579_v35 = vadd.f32 %v9376_v16, %v9167_v54  ;;  %v7985_v50 = vld [vmem:[%s8932_s6 + $0x108] sm:$0xff]  ;;  %v9595_v54 = vadd.f32 %v9357_v20, %v9174_v57 }
 0x2e6   : > { %v9529_v31 = vadd.f32 %v8293_v3, %v2525_v11  ;;  %v8296_v3 = vld [vmem:[#allocation2 + $0x50] sm:$0xff]  ;;  %5572 = vxpose.xlu1.c.b16.cont [5/8] %v9560_v36, 128  ;;  %v8117_v27 = vld [vmem:[%s8934_s7 + $0x1e8] sm:$0xff] }
 0x2e7   : > { %v9544_v11 = vadd.f32 %v8296_v3, %v9458_v5  ;;  %v2442_v3 = vpop.f32.mrf.mxu2 }
 0x2e8   : > { %11352 = vst [vmem:[#allocation41_spill] sm:$0xff] %v9529_v31  ;;  %v4286_v7 = vpack.c.bf16 %v9529_v31, %v9525_v4  ;;  %v9555_v31 = vadd.f32 %v8299_v26, %v9437_v10  ;;  %v9569_v26 = vadd.f32 %v9399_v53, %v9159_v49 }
 0x2e9   : > { %v9538_v42 = vpop.f32.mrf.mxu1  ;;  %v9540_v56 = vpop.f32.mrf.mxu0  ;;  %11356 = vst [vmem:[#allocation45_spill] sm:$0xff] %v9544_v11  ;;  %v4284_v5 = vpack.c.bf16 %v9547_v60, %v9544_v11 }
 0x2ea   : > { %11355 = vst [vmem:[#allocation44_spill] sm:$0xff] %v9538_v42  ;;  %3356 = vmatmul.bf16.vlgmr.msra.gmra.mxu3 %v7984_v48  ;;  %v4283_v10 = vpack.c.bf16 %v9555_v31, %v9552_v51  ;;  %v4282_v49 = vpack.c.bf16 %v9573_v30, %v9569_v26 }
 0x2eb   : > { %4553 = vmatpush.bf16.msra.mxu3 %v4286_v7  ;;  %11358 = vst [vmem:[#allocation47_spill] sm:$0xff] %v9555_v31  ;;  %v9754_v31 = vld [vmem:[%s8932_s6 + $0x188] sm:$0xff] }
 0x2ec   : > { %3472 = vmatmul.bf16.gmra.mxu0 %v3428_v13 }
 0x2ef   : > { %4554 = vmatpush.bf16.msra.mxu3 %v4285_v62  ;;  %v9583_v62 = vadd.f32 %v9384_v23, %v9170_v55  ;;  %v9599_v55 = vadd.f32 %v9365_v21, %v9176_v58  ;;  %v9605_v23 = vadd.f32 %v9338_v6, %v9187_v0  ;;  %v9614_v58 = vld [vmem:[%s8934_s7 + $0x168] sm:$0xff] }
 0x2f1   : > { %v2393_v63 = vpop.f32.mrf.mxu1  ;;  %v9562_v7 = vpop.f32.mrf.mxu0  ;;  %v4281_v16 = vpack.c.bf16 %v9583_v62, %v9579_v35  ;;  %v4280_v57 = vpack.c.bf16 %v9599_v55, %v9595_v54 }
 0x2f2   : > { %v9564_v13 = vadd.f32 %v2442_v3, %v2393_v63 }
 0x2f3   : > { %4555 = vmatpush.bf16.msra.mxu3 %v4284_v5  ;;  %v8118_v5 = vld [vmem:[%s8934_s7 + $0x1f0] sm:$0xff] }
 0x2f4   : > { %11359 = vst [vmem:[#allocation48_spill] sm:$0xff] %v9564_v13  ;;  %2746 = vmatmul.bf16.gmra.mxu1 %v7967_v2  ;;  %v9609_v2 = vadd.f32 %v9348_v8, %v9189_v1  ;;  %v7986_v1 = vld [vmem:[%s8932_s6 + $0x110] sm:$0xff] }
 0x2f5   : > { %6048 = vxpose.xlu2.c.b16.cont [6/8] %v8117_v27, 128 }
 0x2f6   : > { %5573 = vxpose.xlu1.c.b16.cont [6/8] %v9614_v58, 128  ;;  %v4279_v0 = vpack.c.bf16 %v9609_v2, %v9605_v23 }
 0x2f7   : > { %4556 = vmatpush.bf16.msra.mxu3 %v4283_v10  ;;  %v7987_v10 = vld [vmem:[%s8932_s6 + $0x118] sm:$0xff] }
 0x2f9   : > { %v9588_v53 = vpop.f32.mrf.mxu1  ;;  %v9590_v22 = vpop.f32.mrf.mxu0 }
 0x2fa   : > { %11360 = vst [vmem:[#allocation49_spill] sm:$0xff] %v9588_v53  ;;  %3361 = vmatmul.bf16.gmra.mxu3 %v7985_v50 }
 0x2fb   : > { %11361 = vst [vmem:[#allocation50_spill] sm:$0xff] %v9590_v22  ;;  %4557 = vmatpush.bf16.msra.mxu3 %v4282_v49  ;;  %v9742_v22 = vpop.f32.mrf.mxu2 }
 0x2fc   : > { %8188 = vmatmul.lmr.bf16.vlgmr.msra.gmra.16.mxu0  ;;  %11368 = vst [vmem:[#allocation57_spill] sm:$0xff] %v9742_v22 }
 0x2ff   : > { %4558 = vmatpush.bf16.msra.mxu3 %v4281_v16  ;;  %v9669_v16 = vld [vmem:[%s8936_s8 + $0x78] sm:$0xff] }
 0x300   : > { %4634 = vmatpush.bf16.msra.mxu0 %v9669_v16 }
 0x301   : > { %v2712_v20 = vpop.f32.mrf.mxu1  ;;  %v9616_v21 = vpop.f32.mrf.mxu0 }
 0x302   : > { %11362 = vst [vmem:[#allocation51_spill] sm:$0xff] %v9616_v21 }
 0x303   : > { %4559 = vmatpush.bf16.msra.mxu3 %v4280_v57  ;;  %v7988_v57 = vld [vmem:[%s8932_s6 + $0x120] sm:$0xff] }
 0x304   : > { %3186 = vmatmul.bf16.vlgmr.msra.gmra.mxu1 %v7984_v48  ;;  %8189 = vmatmul.lmr.bf16.gmra.16.mxu0 }
 0x305   : > { %4383 = vmatpush.bf16.xpose.msra.mxu1 %v9394_v43  ;;  %6049 = vxpose.xlu2.c.b16.cont [7/8] %v8118_v5, 128  ;;  %v9631_v43 = vld [vmem:[%s8934_s7 + $0x170] sm:$0xff] }
 0x306   : > { %5574 = vxpose.xlu1.c.b16.cont [7/8] %v9631_v43, 128 }
 0x307   : > { %4560 = vmatpush.bf16.msra.mxu3 %v4279_v0  ;;  %v9683_v0 = vld [vmem:[%s8936_s8 + $0x68] sm:$0xff] }
 0x309   : > { %v2714_v6 = vpop.f32.mrf.mxu1  ;;  %v9623_v8 = vpop.f32.mrf.mxu0 }
 0x30a   : > { %11363 = vst [vmem:[#allocation52_spill] sm:$0xff] %v9623_v8  ;;  %v6887_v3 = vpack.c.bf16 %v2714_v6, %v2712_v20  ;;  %3366 = vmatmul.bf16.gmra.mxu3 %v7986_v1 }
 0x30c   : > { %6888 = vmatmul.msk.bf16.vlgmr.msrb.gmra.mxu2 %vm9225_vm3, %v6887_v3  ;;  %8190 = vmatmul.lmr.bf16.gmra.16.mxu0  ;;  %v9693_v3 = vld [vmem:[%s8936_s8 + $0x58] sm:$0xff] }
 0x30d   : > { %3774 = vmatpush.bf16.msrb.mxu2 %v9454_v18  ;;  %4384 = vmatpush.bf16.xpose.msra.mxu1 %v9373_v33  ;;  %v8119_v33 = vld [vmem:[%s8934_s7 + $0x1f8] sm:$0xff] }
 0x311   : > { %v2717_v48 = vpop.f32.mrf.mxu1  ;;  %v9633_v63 = vpop.f32.mrf.mxu0  ;;  %3775 = vmatpush.bf16.msrb.mxu2 %v9462_v24 }
 0x312   : > { %11364 = vst [vmem:[#allocation53_spill] sm:$0xff] %v9633_v63 }
 0x314   : > { %3191 = vmatmul.bf16.gmra.mxu1 %v7985_v50  ;;  %8191 = vmatmul.lmr.bf16.gmra.16.mxu0 }
 0x315   : > { %4385 = vmatpush.bf16.xpose.msra.mxu1 %v9354_v14  ;;  %3776 = vmatpush.bf16.msrb.mxu2 %v9471_v59  ;;  %v9649_v14 = vld [vmem:[%s8934_s7 + $0x178] sm:$0xff] }
 0x316   : > { %6050 = vxpose.xlu2.c.b16.end [8/8] %v8119_v33, 128  ;;  %5575 = vxpose.xlu1.c.b16.end [8/8] %v9649_v14, 128 }
 0x319   : > { %v2719_v18 = vpop.f32.mrf.mxu1  ;;  %v9640_v49 = vpop.f32.mrf.mxu0  ;;  %3777 = vmatpush.bf16.msrb.mxu2 %v9480_v25 }
 0x31a   : > { %v6890_v27 = vpack.c.bf16 %v2719_v18, %v2717_v48  ;;  %3371 = vmatmul.bf16.gmra.mxu3 %v7987_v10  ;;  %v9699_v48 = vld [vmem:[%s8936_s8 + $0x50] sm:$0xff] }
 0x31c   : > { %6891 = vmatmul.msk.bf16.gmra.mxu2 %vm9239_vm6, %v6890_v27  ;;  %8192 = vmatmul.lmr.bf16.gmra.16.mxu0  ;;  %v9706_v27 = vld [vmem:[%s8936_s8 + $0x48] sm:$0xff] }
 0x31d   : > { %4386 = vmatpush.bf16.xpose.msra.mxu1 %v9331_v61  ;;  %3778 = vmatpush.bf16.msrb.mxu2 %v9489_v47 }
 0x321   : > { %v2722_v24 = vpop.f32.mrf.mxu1  ;;  %v9651_v59 = vpop.f32.mrf.mxu0  ;;  %3779 = vmatpush.bf16.msrb.mxu2 %v9494_v44 }
 0x322   : > { %11365 = vst [vmem:[#allocation54_spill] sm:$0xff] %v9651_v59 }
 0x324   : > { %3196 = vmatmul.bf16.gmra.mxu1 %v7986_v1  ;;  %8193 = vmatmul.lmr.bf16.gmra.16.mxu0  ;;  %v9687_v1 = vld [vmem:[%s8936_s8 + $0x60] sm:$0xff] }
 0x325   : > { %4387 = vmatpush.bf16.xpose.msra.mxu1 %v9316_v46  ;;  %3780 = vmatpush.bf16.msrb.mxu2 %v9505_v15 }
 0x329   : > { %v2724_v25 = vpop.f32.mrf.mxu1  ;;  %v9657_v61 = vpop.f32.mrf.mxu0  ;;  %3781 = vmatpush.bf16.msrb.mxu2 %v9512_v32 }
 0x32a   : > { %v6893_v47 = vpack.c.bf16 %v2724_v25, %v2722_v24  ;;  %v9710_v24 = vld [vmem:[%s8936_s8 + $0x40] sm:$0xff] }
 0x32c   : > { %6894 = vmatmul.msk.bf16.gmra.mxu2 %vm9251_vm9, %v6893_v47  ;;  %8194 = vmatmul.lmr.bf16.gmra.16.mxu0 }
 0x32d   : > { %4388 = vmatpush.bf16.xpose.msra.mxu1 %v9295_v19  ;;  %v9676_v19 = vld [vmem:[%s8936_s8 + $0x70] sm:$0xff] }
 0x32e   : > { %4635 = vmatpush.bf16.msra.mxu0 %v9676_v19 }
 0x331   : > { %v2727_v44 = vpop.f32.mrf.mxu1  ;;  %v9663_v50 = vpop.f32.mrf.mxu0 }
 0x332   : > { %4636 = vmatpush.bf16.msra.mxu0 %v9683_v0 }
 0x334   : > { %3201 = vmatmul.bf16.gmra.mxu1 %v7987_v10  ;;  %8195 = vmatmul.lmr.bf16.gmra.16.mxu0  ;;  %v7989_v10 = vld [vmem:[%s8932_s6 + $0x128] sm:$0xff] }
 0x335   : > { %4389 = vmatpush.bf16.xpose.msra.mxu1 %v9274_v45 }
 0x336   : > { %4637 = vmatpush.bf16.msra.mxu0 %v9687_v1 }
 0x339   : > { %v2729_v46 = vpop.f32.mrf.mxu1  ;;  %v9666_v15 = vpop.f32.mrf.mxu0 }
 0x33a   : > { %v6896_v32 = vpack.c.bf16 %v2729_v46, %v2727_v44  ;;  %4638 = vmatpush.bf16.msra.mxu0 %v9693_v3  ;;  %v7990_v46 = vld [vmem:[%s8932_s6 + $0x130] sm:$0xff] }
 0x33c   : > { %6897 = vmatmul.msk.bf16.gmra.mxu2 %vm9266_vm12, %v6896_v32  ;;  %8196 = vmatmul.lmr.bf16.gmra.16.mxu0 }
 0x33d   : > { %4390 = vmatpush.bf16.xpose.msra.mxu1 %v9258_v38 }
 0x33e   : > { %4639 = vmatpush.bf16.msra.mxu0 %v9699_v48 }
 0x341   : > { %v2732_v45 = vpop.f32.mrf.mxu1  ;;  %v9679_v20 = vpop.f32.mrf.mxu0 }
 0x342   : > { %4640 = vmatpush.bf16.msra.mxu0 %v9706_v27 }
 0x344   : > { %3206 = vmatmul.bf16.gmra.mxu1 %v7988_v57  ;;  %8197 = vmatmul.lmr.bf16.gmra.16.mxu0 }
 0x346   : > { %4641 = vmatpush.bf16.msra.mxu0 %v9710_v24 }
 0x349   : > { %v2734_v38 = vpop.f32.mrf.mxu1  ;;  %v9689_v6 = vpop.f32.mrf.mxu0 }
 0x34a   : > { %v6899_v5 = vpack.c.bf16 %v2734_v38, %v2732_v45  ;;  %v2882_v38 = vpop.f32.mrf.mxu3 }
 0x34c   : > { %6900 = vmatmul.msk.bf16.gmra.mxu2 %vm9285_vm15, %v6899_v5  ;;  %8198 = vmatmul.lmr.bf16.gmra.16.mxu0 }
 0x351   : > { %v2737_v18 = vpop.f32.mrf.mxu1  ;;  %v9702_v33 = vpop.f32.mrf.mxu0 }
 0x354   : > { %3211 = vmatmul.bf16.gmra.mxu1 %v7989_v10  ;;  %8199 = vmatmul.lmr.bf16.gmra.16.mxu0 }
 0x359   : > { %v2739_v25 = vpop.f32.mrf.mxu1  ;;  %v9712_v47 = vpop.f32.mrf.mxu0 }
 0x35a   : > { %v6902_v44 = vpack.c.bf16 %v2739_v25, %v2737_v18  ;;  %v2884_v18 = vpop.f32.mrf.mxu3  ;;  %3376 = vmatmul.bf16.gmra.mxu3 %v7988_v57  ;;  %v9725_v25 = vld [vmem:[%s8932_s6 + $0x138] sm:$0xff] }
 0x35c   : > { %6903 = vmatmul.msk.bf16.gmra.mxu2 %vm9306_vm2, %v6902_v44  ;;  %8200 = vmatmul.lmr.bf16.gmra.16.mxu0  ;;  %v4626_v44 = vpop.trf.xlu2 }
 0x361   : > { %v2742_v32 = vpop.f32.mrf.mxu1  ;;  %v9718_v45 = vpop.f32.mrf.mxu0 }
 0x362   : > { %v2887_v40 = vpop.f32.mrf.mxu3 }
 0x364   : > { %3216 = vmatmul.bf16.gmra.mxu1 %v7990_v46  ;;  %8201 = vmatmul.lmr.bf16.gmra.16.mxu0  ;;  %v4627_v13 = vpop.trf.xlu2 }
 0x369   : > { %v2744_v5 = vpop.f32.mrf.mxu1  ;;  %v9720_v53 = vpop.f32.mrf.mxu0 }
 0x36a   : > { %v6905_v4 = vpack.c.bf16 %v2744_v5, %v2742_v32  ;;  %v9737_v57 = vpop.f32.mrf.mxu3  ;;  %3381 = vmatmul.bf16.gmra.mxu3 %v7989_v10 }
 0x36c   : > { %6906 = vmatmul.msk.bf16.gmra.mxu2 %vm9323_vm7, %v6905_v4  ;;  %8202 = vmatmul.lmr.bf16.gmra.16.mxu0  ;;  %v9735_v4 = vld [vmem:[%s8932_s6 + $0x180] sm:$0xff]  ;;  %v4628_v21 = vpop.trf.xlu2 }
 0x371   : > { %v2747_v29 = vpop.f32.mrf.mxu1  ;;  %v9727_v42 = vpop.f32.mrf.mxu0 }
 0x374   : > { %3221 = vmatmul.bf16.gmra.mxu1 %v9725_v25  ;;  %8203 = vmatmul.lmr.bf16.gmra.16.mxu0  ;;  %v9750_v10 = vpop.trf.xlu2 }
 0x379   : > { %v2749_v39 = vpop.f32.mrf.mxu1  ;;  %v9730_v32 = vpop.f32.mrf.mxu0 }
 0x37a   : > { %11366 = vst [vmem:[#allocation55_spill] sm:$0xff] %v9730_v32  ;;  %v6908_v5 = vpack.c.bf16 %v2749_v39, %v2747_v29  ;;  %v9744_v32 = vpop.f32.mrf.mxu3 }
 0x37c   : > { %6909 = vmatmul.msk.bf16.gmra.mxu2 %vm9342_vm11, %v6908_v5  ;;  %4642 = vmatmul.bf16.vlgmr.msra.gmra.mxu0 %v4626_v44 }
 0x381   : > { %v3187_v60 = vpop.f32.mrf.mxu1  ;;  %v9739_v11 = vpop.f32.mrf.mxu0 }
 0x382   : > { %11367 = vst [vmem:[#allocation56_spill] sm:$0xff] %v9739_v11  ;;  %v9756_v63 = vpop.f32.mrf.mxu3  ;;  %3386 = vmatmul.bf16.gmra.mxu3 %v7990_v46 }
 0x384   : > { %3661 = vmatmul.bf16.vlgmr.msrb.gmra.mxu1 %v9735_v4 }
 0x389   : > { %v3189_v39 = vpop.f32.mrf.mxu1  ;;  %v9746_v29 = vpop.f32.mrf.mxu0 }
 0x38a   : > { %11369 = vst [vmem:[#allocation58_spill] sm:$0xff] %v9746_v29  ;;  %v7055_v44 = vpack.c.bf16 %v3189_v39, %v3187_v60  ;;  %v9766_v46 = vpop.f32.mrf.mxu3 }
 0x38c   : > { %7056 = vmatmul.msk.bf16.vlgmr.msra.gmra.mxu2 %vm9225_vm3, %v7055_v44  ;;  %4647 = vmatmul.bf16.gmra.mxu0 %v4627_v13  ;;  %v9764_v13 = vpop.trf.xlu2 }
 0x38d   : > { %4504 = vmatpush.bf16.msra.mxu2 %v9669_v16 }
 0x38f   : > { %v2833_v5 = vpop.f32.mrf.mxu2 }
 0x390   : > { %v2883_v11 = vadd.f32 %v2882_v38, %v2833_v5  ;;  %v8071_v5 = vld [vmem:[%s8934_s7 + $0xf8] sm:$0xff] }
 0x391   : > { %v3192_v22 = vpop.f32.mrf.mxu1  ;;  %v9758_v8 = vpop.f32.mrf.mxu0  ;;  %4505 = vmatpush.bf16.msra.mxu2 %v9676_v19  ;;  %8204 = vmatpush.lsf.bf16.msrb.mxu0 %v8071_v5 }
 0x392   : > { %11370 = vst [vmem:[#allocation59_spill] sm:$0xff] %v9758_v8  ;;  %v2922_v60 = vmul.f32 0.088388346, %v2883_v11  ;;  %4858 = vmatpush.bf16.xpose.msrb.mxu1 %v8071_v5  ;;  %v8300_v5 = vld [vmem:[#allocation2 + $0xf0] sm:$0xff] }
 0x394   : > { %3985 = vrot.lane.b32.xlu0 %v2922_v60, %s8417_s12  ;;  %3666 = vmatmul.bf16.gmra.mxu1 %v9754_v31  ;;  %v9777_v60 = vld [vmem:[%s8932_s6 + $0x190] sm:$0xff] }
 0x395   : > { %4506 = vmatpush.bf16.msra.mxu2 %v9683_v0 }
 0x397   : > { %v2835_v16 = vpop.f32.mrf.mxu2 }
 0x398   : > { %v2885_v38 = vadd.f32 %v2884_v18, %v2835_v16  ;;  %v9779_v16 = vpop.trf.xlu2 }
 0x399   : > { %v3194_v39 = vpop.f32.mrf.mxu1  ;;  %v9768_v44 = vpop.f32.mrf.mxu0  ;;  %4507 = vmatpush.bf16.msra.mxu2 %v9687_v1 }
 0x39a   : > { %11371 = vst [vmem:[#allocation60_spill] sm:$0xff] %v9768_v44  ;;  %v2923_v11 = vmul.f32 0.088388346, %v2885_v38  ;;  %v7058_v19 = vpack.c.bf16 %v3194_v39, %v3192_v22  ;;  %v9781_v1 = vpop.f32.mrf.mxu3  ;;  %v8070_v22 = vld [vmem:[%s8934_s7 + $0xf0] sm:$0xff]  ;;  %3391 = vmatmul.bf16.gmra.mxu3 %v9725_v25 }
 0x39b   : > { %8205 = vmatpush.lsf.bf16.msrb.mxu0 %v8070_v22  ;;  %4859 = vmatpush.bf16.xpose.msrb.mxu1 %v8070_v22 }
 0x39c   : > { %4652 = vmatmul.bf16.gmra.mxu0 %v4628_v21  ;;  %3987 = vrot.lane.b32.xlu1 %v2923_v11, %s8417_s12 }
 0x39d   : > { %7059 = vmatmul.msk.bf16.gmra.mxu2 %vm9239_vm6, %v7058_v19  ;;  %v8068_v19 = vld [vmem:[%s8934_s7 + $0xe0] sm:$0xff] }
 0x39e   : > { %4508 = vmatpush.bf16.msra.mxu2 %v9693_v3 }
 0x39f   : > { %v2838_v0 = vpop.f32.mrf.mxu2 }
 0x3a0   : > { %v2888_v18 = vadd.f32 %v2887_v40, %v2838_v0  ;;  %v8069_v40 = vld [vmem:[%s8934_s7 + $0xe8] sm:$0xff]  ;;  %v9797_v0 = vadd.f32 %v8300_v5, %v9540_v56  ;;  %v9810_v56 = vld [vmem:[%s8934_s7 + $0xd8] sm:$0xff] }
 0x3a1   : > { %v3197_v21 = vpop.f32.mrf.mxu1  ;;  %v9785_v38 = vpop.f32.mrf.mxu0  ;;  %8206 = vmatpush.lsf.bf16.msrb.mxu0 %v8069_v40  ;;  %v8303_v5 = vld [vmem:[#allocation2 + $0xe8] sm:$0xff] }
 0x3a2   : > { %11372 = vst [vmem:[#allocation61_spill] sm:$0xff] %v9785_v38  ;;  %v2924_v39 = vmul.f32 0.088388346, %v2888_v18  ;;  %4509 = vmatpush.bf16.msra.mxu2 %v9699_v48  ;;  %v9793_v25 = vpop.f32.mrf.mxu3  ;;  %v8301_v48 = vld [vmem:[#allocation2 + $0xf8] sm:$0xff] }
 0x3a3   : > { %11373 = vst [vmem:[#allocation62_spill] sm:$0xff] %v9797_v0  ;;  %v9800_v18 = vadd.f32 %v8301_v48, %v9562_v7  ;;  %v8302_v7 = vld [vmem:[#allocation2 + $0xe0] sm:$0xff]  ;;  %4860 = vmatpush.bf16.xpose.msrb.mxu1 %v8069_v40 }
 0x3a4   : > { %3989 = vrot.lane.b32.xlu2 %v2924_v39, %s8417_s12  ;;  %3671 = vmatmul.bf16.gmra.mxu1 %v9777_v60 }
 0x3a5   : > { %11374 = vst [vmem:[#allocation63_spill] sm:$0xff] %v9800_v18  ;;  %8207 = vmatpush.lsf.bf16.msrb.mxu0 %v8068_v19  ;;  %v4761_v48 = vpack.c.bf16 %v9800_v18, %v9797_v0  ;;  %v11382_v18 = vld [vmem:[#allocation33_spill] sm:$0xff] }
 0x3a6   : > { %4510 = vmatpush.bf16.msra.mxu2 %v9706_v27  ;;  %v9804_v27 = vpop.trf.xlu2 }
 0x3a7   : > { %v2840_v3 = vpop.f32.mrf.mxu2 }
 0x3a8   : > { %v2890_v11 = vadd.f32 %v9737_v57, %v2840_v3  ;;  %v11376_v57 = vld [vmem:[#allocation36_spill] sm:$0xff] }
 0x3a9   : > { %v3199_v39 = vpop.f32.mrf.mxu1  ;;  %v9802_v8 = vpop.f32.mrf.mxu0  ;;  %v9813_v3 = vadd.f32 %v8302_v7, %v11376_v57  ;;  %8208 = vmatpush.lsf.bf16.msrb.mxu0 %v9810_v56  ;;  %v9830_v7 = vld [vmem:[%s8934_s7 + $0xd0] sm:$0xff] }
 0x3aa   : > { %11375 = vst [vmem:[#allocation64_spill] sm:$0xff] %v9802_v8  ;;  %v2925_v22 = vmul.f32 0.088388346, %v2890_v11  ;;  %v7061_v29 = vpack.c.bf16 %v3199_v39, %v3197_v21  ;;  %4511 = vmatpush.bf16.msra.mxu2 %v9710_v24  ;;  %v11378_v11 = vld [vmem:[#allocation37_spill] sm:$0xff]  ;;  %v8304_v57 = vld [vmem:[#allocation2 + $0xd0] sm:$0xff]  ;;  %v9864_v8 = vld [vmem:[%s8934_s7 + $0xc0] sm:$0xff] }
 0x3ab   : > { %11377 = vst [vmem:[#allocation36_spill] sm:$0xff] %v9813_v3  ;;  %v9816_v21 = vadd.f32 %v8303_v5, %v11378_v11  ;;  %v9825_v39 = vld [vmem:[%s8932_s6 + $0x198] sm:$0xff]  ;;  %v11380_v5 = vld [vmem:[#allocation31_spill] sm:$0xff]  ;;  %4861 = vmatpush.bf16.xpose.msrb.mxu1 %v8068_v19 }
 0x3ac   : > { %4657 = vmatmul.bf16.gmra.mxu0 %v9750_v10  ;;  %3991 = vrot.lane.b32.xlu1 %v2925_v22, %s8417_s12  ;;  %v9827_v22 = vpop.f32.mrf.mxu3  ;;  %v9834_v11 = vadd.f32 %v8304_v57, %v11380_v5  ;;  %v9849_v57 = vld [vmem:[%s8934_s7 + $0xc8] sm:$0xff]  ;;  %v8306_v5 = vld [vmem:[#allocation2 + $0xc0] sm:$0xff] }
 0x3ad   : > { %11379 = vst [vmem:[#allocation37_spill] sm:$0xff] %v9816_v21  ;;  %7062 = vmatmul.msk.bf16.gmra.mxu2 %vm9251_vm9, %v7061_v29  ;;  %3831 = vmatmul.bf16.vlgmr.msrb.gmra.mxu3 %v9735_v4  ;;  %v8305_v29 = vld [vmem:[#allocation2 + $0xd8] sm:$0xff] }
 0x3ae   : > { %11381 = vst [vmem:[#allocation31_spill] sm:$0xff] %v9834_v11  ;;  %v9837_v0 = vadd.f32 %v8305_v29, %v11382_v18  ;;  %5028 = vmatpush.bf16.msrb.mxu3 %v4761_v48  ;;  %8209 = vmatpush.lsf.bf16.msrb.mxu0 %v9830_v7  ;;  %v9846_v4 = vpop.trf.xlu2  ;;  %v11385_v29 = vld [vmem:[#allocation26_spill] sm:$0xff]  ;;  %v8307_v48 = vld [vmem:[#allocation2 + $0xc8] sm:$0xff] }
 0x3af   : > { %v2843_v24 = vpop.f32.mrf.mxu2 }
 0x3b0   : > { %v2893_v10 = vadd.f32 %v9744_v32, %v2843_v24  ;;  %11383 = vst [vmem:[#allocation33_spill] sm:$0xff] %v9837_v0  ;;  %v4760_v32 = vpack.c.bf16 %v9816_v21, %v9813_v3  ;;  %v4759_v18 = vpack.c.bf16 %v9837_v0, %v9834_v11  ;;  %v9854_v21 = vadd.f32 %v8306_v5, %v11385_v29  ;;  %v11389_v0 = vld [vmem:[#allocation22_spill] sm:$0xff] }
 0x3b1   : > { %v3202_v40 = vpop.f32.mrf.mxu1  ;;  %v9841_v24 = vpop.f32.mrf.mxu0 }
 0x3b2   : > { %11384 = vst [vmem:[#allocation65_spill] sm:$0xff] %v9841_v24  ;;  %v2926_v38 = vmul.f32 0.088388346, %v2893_v10  ;;  %5029 = vmatpush.bf16.msrb.mxu3 %v4760_v32  ;;  %v11387_v10 = vld [vmem:[#allocation28_spill] sm:$0xff]  ;;  %8210 = vmatpush.lsf.bf16.msrb.mxu0 %v9849_v57 }
 0x3b3   : > { %11386 = vst [vmem:[#allocation26_spill] sm:$0xff] %v9854_v21  ;;  %v9857_v3 = vadd.f32 %v8307_v48, %v11387_v10  ;;  %v8308_v32 = vld [vmem:[#allocation2 + $0xb0] sm:$0xff]  ;;  %v8309_v48 = vld [vmem:[#allocation2 + $0xb8] sm:$0xff]  ;;  %v11392_v10 = vld [vmem:[#allocation23_spill] sm:$0xff]  ;;  %4862 = vmatpush.bf16.xpose.msrb.mxu1 %v9810_v56 }
 0x3b4   : > { %3993 = vrot.lane.b32.xlu1 %v2926_v38, %s8417_s12  ;;  %3676 = vmatmul.bf16.gmra.mxu1 %v9825_v39  ;;  %v9861_v24 = vpop.f32.mrf.mxu3  ;;  %v9867_v11 = vadd.f32 %v8308_v32, %v11389_v0  ;;  %v9872_v59 = vadd.f32 %v8309_v48, %v11392_v10  ;;  %v9880_v0 = vld [vmem:[%s8936_s8 + $0xf8] sm:$0xff] }
 0x3b5   : > { %11388 = vst [vmem:[#allocation28_spill] sm:$0xff] %v9857_v3  ;;  %v11394_v32 = vld [vmem:[#allocation17_spill] sm:$0xff] }
 0x3b6   : > { %11390 = vst [vmem:[#allocation22_spill] sm:$0xff] %v9867_v11  ;;  %5030 = vmatpush.bf16.msrb.mxu3 %v4759_v18  ;;  %8211 = vmatpush.lsf.bf16.msrb.mxu0 %v9864_v8  ;;  %v8310_v18 = vld [vmem:[#allocation2 + $0xa0] sm:$0xff]  ;;  %v9892_v10 = vpop.trf.xlu2  ;;  %v11401_v56 = vld [vmem:[#allocation13_spill] sm:$0xff] }
 0x3b7   : > { %v2845_v38 = vpop.f32.mrf.mxu2  ;;  %11393 = vst [vmem:[#allocation23_spill] sm:$0xff] %v9872_v59  ;;  %v9885_v48 = vadd.f32 %v8310_v18, %v11394_v32  ;;  %v9903_v32 = vld [vmem:[%s8936_s8 + $0xf0] sm:$0xff] }
 0x3b8   : > { %v2895_v44 = vadd.f32 %v9756_v63, %v2845_v38  ;;  %v4758_v63 = vpack.c.bf16 %v9857_v3, %v9854_v21  ;;  %11398 = vst [vmem:[#allocation67_spill] sm:$0xff] %v9892_v10  ;;  %v9898_v3 = vld [vmem:[%s8932_s6 + $0x1a0] sm:$0xff]  ;;  %v8312_v10 = vld [vmem:[#allocation2 + $0x90] sm:$0xff] }
 0x3b9   : > { %v3204_v5 = vpop.f32.mrf.mxu1  ;;  %v9869_v29 = vpop.f32.mrf.mxu0  ;;  %11395 = vst [vmem:[#allocation17_spill] sm:$0xff] %v9885_v48  ;;  %v11400_v21 = vld [vmem:[#allocation12_spill] sm:$0xff] }
 0x3ba   : > { %11391 = vst [vmem:[#allocation66_spill] sm:$0xff] %v9869_v29  ;;  %v2927_v19 = vmul.f32 0.088388346, %v2895_v44  ;;  %v7064_v38 = vpack.c.bf16 %v3204_v5, %v3202_v40  ;;  %v8311_v44 = vld [vmem:[#allocation2 + $0xa8] sm:$0xff]  ;;  %v11396_v40 = vld [vmem:[#allocation18_spill] sm:$0xff]  ;;  %5109 = vmatpush.bf16.msra.mxu0 %v9880_v0  ;;  %5031 = vmatpush.bf16.msrb.mxu3 %v4758_v63  ;;  %v9909_v63 = vadd.f32 %v8312_v10, %v11400_v21  ;;  %v8313_v29 = vld [vmem:[#allocation2 + $0x98] sm:$0xff] }
 0x3bb   : > { %v9888_v5 = vadd.f32 %v8311_v44, %v11396_v40  ;;  %v8314_v21 = vld [vmem:[#allocation2 + $0x80] sm:$0xff]  ;;  %v11403_v10 = vld [vmem:[#allocation7_spill] sm:$0xff]  ;;  %4863 = vmatpush.bf16.xpose.msrb.mxu1 %v9830_v7 }
 0x3bc   : > { %4662 = vmatmul.bf16.gmra.mxu0 %v9764_v13  ;;  %3995 = vrot.lane.b32.xlu2 %v2927_v19, %s8417_s12  ;;  %v4757_v13 = vpack.c.bf16 %v9872_v59, %v9867_v11  ;;  %v9900_v18 = vpop.f32.mrf.mxu3  ;;  %v9912_v59 = vadd.f32 %v8313_v29, %v11401_v56  ;;  %v8315_v29 = vld [vmem:[#allocation2 + $0x88] sm:$0xff]  ;;  %v11404_v56 = vld [vmem:[#allocation9_spill] sm:$0xff] }
 0x3bd   : > { %7065 = vmatmul.msk.bf16.gmra.mxu2 %vm9266_vm12, %v7064_v38  ;;  %11397 = vst [vmem:[#allocation18_spill] sm:$0xff] %v9888_v5  ;;  %3836 = vmatmul.bf16.gmra.mxu3 %v9754_v31  ;;  %v9920_v31 = vld [vmem:[%s8936_s8 + $0xe8] sm:$0xff]  ;;  %v9926_v11 = vadd.f32 %v8315_v29, %v11404_v56 }
 0x3be   : > { %11402 = vst [vmem:[#allocation12_spill] sm:$0xff] %v9912_v59  ;;  %5110 = vmatpush.bf16.msra.mxu0 %v9903_v32  ;;  %5032 = vmatpush.bf16.msrb.mxu3 %v4757_v13 }
 0x3bf   : > { %v2848_v19 = vpop.f32.mrf.mxu2 }
 0x3c0   : > { %v2898_v38 = vadd.f32 %v9766_v46, %v2848_v19  ;;  %v4756_v46 = vpack.c.bf16 %v9888_v5, %v9885_v48 }
 0x3c1   : > { %v3207_v44 = vpop.f32.mrf.mxu1  ;;  %v9906_v40 = vpop.f32.mrf.mxu0 }
 0x3c2   : > { %11399 = vst [vmem:[#allocation68_spill] sm:$0xff] %v9906_v40  ;;  %v2928_v19 = vmul.f32 0.088388346, %v2898_v38  ;;  %v9923_v40 = vadd.f32 %v8314_v21, %v11403_v10  ;;  %v4755_v38 = vpack.c.bf16 %v9912_v59, %v9909_v63  ;;  %5111 = vmatpush.bf16.msra.mxu0 %v9920_v31  ;;  %5033 = vmatpush.bf16.msrb.mxu3 %v4756_v46  ;;  %v9938_v10 = vld [vmem:[%s8936_s8 + $0xe0] sm:$0xff] }
 0x3c3   : > { %4864 = vmatpush.bf16.xpose.msrb.mxu1 %v9849_v57 }
 0x3c4   : > { %3997 = vrot.lane.b32.xlu1 %v2928_v19, %s8417_s12  ;;  %3681 = vmatmul.bf16.gmra.mxu1 %v9898_v3  ;;  %v9932_v19 = vpop.trf.xlu2  ;;  %v9935_v21 = vpop.f32.mrf.mxu3  ;;  %v4754_v48 = vpack.c.bf16 %v9926_v11, %v9923_v40 }
 0x3c5   : > { %11405 = vst [vmem:[#allocation13_spill] sm:$0xff] %v9932_v19 }
 0x3c6   : > { %5112 = vmatpush.bf16.msra.mxu0 %v9938_v10  ;;  %5034 = vmatpush.bf16.msrb.mxu3 %v4755_v38 }
 0x3c7   : > { %v2850_v13 = vpop.f32.mrf.mxu2 }
 0x3c8   : > { %v2900_v5 = vadd.f32 %v9781_v1, %v2850_v13  ;;  %v9948_v1 = vld [vmem:[%s8936_s8 + $0xd8] sm:$0xff] }
 0x3c9   : > { %v3209_v29 = vpop.f32.mrf.mxu1  ;;  %v9940_v56 = vpop.f32.mrf.mxu0 }
 0x3ca   : > { %11406 = vst [vmem:[#allocation7_spill] sm:$0xff] %v9940_v56  ;;  %v2929_v46 = vmul.f32 0.088388346, %v2900_v5  ;;  %v7067_v59 = vpack.c.bf16 %v3209_v29, %v3207_v44  ;;  %5113 = vmatpush.bf16.msra.mxu0 %v9948_v1  ;;  %5035 = vmatpush.bf16.msrb.mxu3 %v4754_v48  ;;  %v9956_v44 = vld [vmem:[%s8932_s6 + $0x1a8] sm:$0xff] }
 0x3cb   : > { %8212 = vllmr.16.mxu0  ;;  %4865 = vmatpush.bf16.xpose.msrb.mxu1 %v9864_v8 }
 0x3cc   : > { %4667 = vmatmul.bf16.gmra.mxu0 %v9779_v16  ;;  %3999 = vrot.lane.b32.xlu0 %v2929_v46, %s8417_s12  ;;  %v2914_v38 = vpop.f32.mrf.mxu3  ;;  %v9959_v16 = vld [vmem:[%s8936_s8 + $0xd0] sm:$0xff] }
 0x3cd   : > { %7068 = vmatmul.msk.bf16.gmra.mxu2 %vm9285_vm15, %v7067_v59  ;;  %3841 = vmatmul.bf16.gmra.mxu3 %v9777_v60  ;;  %v9964_v59 = vpop.trf.xlu2 }
 0x3ce   : > { %11408 = vst [vmem:[#allocation69_spill] sm:$0xff] %v9964_v59  ;;  %5114 = vmatpush.bf16.msra.mxu0 %v9959_v16 }
 0x3cf   : > { %v2853_v7 = vpop.f32.mrf.mxu2 }
 0x3d0   : > { %v2903_v5 = vadd.f32 %v9793_v25, %v2853_v7  ;;  %v9970_v25 = vld [vmem:[%s8936_s8 + $0xc8] sm:$0xff]  ;;  %v9976_v7 = vld [vmem:[%s8936_s8 + $0xc0] sm:$0xff] }
 0x3d1   : > { %v3212_v13 = vpop.f32.mrf.mxu1  ;;  %v9962_v29 = vpop.f32.mrf.mxu0 }
 0x3d2   : > { %11407 = vst [vmem:[#allocation9_spill] sm:$0xff] %v9962_v29  ;;  %v2930_v46 = vmul.f32 0.088388346, %v2903_v5  ;;  %5115 = vmatpush.bf16.msra.mxu0 %v9970_v25 }
 0x3d4   : > { %4001 = vrot.lane.b32.xlu2 %v2930_v46, %s8417_s12  ;;  %3686 = vmatmul.bf16.gmra.mxu1 %v9956_v44  ;;  %v2917_v48 = vpop.f32.mrf.mxu3 }
 0x3d5   : > { %v9981_v29 = vpop.trf.xlu2 }
 0x3d6   : > { %5116 = vmatpush.bf16.msra.mxu0 %v9976_v7  ;;  %11410 = vst [vmem:[#allocation71_spill] sm:$0xff] %v9981_v29 }
 0x3d7   : > { %v2855_v57 = vpop.f32.mrf.mxu2 }
 0x3d8   : > { %v2905_v60 = vadd.f32 %v9827_v22, %v2855_v57  ;;  %v9989_v57 = vld [vmem:[%s8932_s6 + $0x1b0] sm:$0xff] }
 0x3d9   : > { %v3214_v5 = vpop.f32.mrf.mxu1  ;;  %v9978_v59 = vpop.f32.mrf.mxu0 }
 0x3da   : > { %11409 = vst [vmem:[#allocation70_spill] sm:$0xff] %v9978_v59  ;;  %v2931_v19 = vmul.f32 0.088388346, %v2905_v60  ;;  %v7070_v46 = vpack.c.bf16 %v3214_v5, %v3212_v13 }
 0x3dc   : > { %4672 = vmatmul.bf16.gmra.mxu0 %v9804_v27  ;;  %4003 = vrot.lane.b32.xlu1 %v2931_v19, %s8417_s12  ;;  %v2919_v56 = vpop.f32.mrf.mxu3 }
 0x3dd   : > { %7071 = vmatmul.msk.bf16.gmra.mxu2 %vm9306_vm2, %v7070_v46  ;;  %3846 = vmatmul.bf16.gmra.mxu3 %v9825_v39  ;;  %v9996_v27 = vpop.trf.xlu2 }
 0x3de   : > { %11412 = vst [vmem:[#allocation73_spill] sm:$0xff] %v9996_v27 }
 0x3df   : > { %v2858_v8 = vpop.f32.mrf.mxu2 }
 0x3e0   : > { %v2908_v22 = vadd.f32 %v9861_v24, %v2858_v8 }
 0x3e1   : > { %v3217_v13 = vpop.f32.mrf.mxu1  ;;  %v9992_v60 = vpop.f32.mrf.mxu0 }
 0x3e2   : > { %11411 = vst [vmem:[#allocation72_spill] sm:$0xff] %v9992_v60  ;;  %v2932_v5 = vmul.f32 0.088388346, %v2908_v22 }
 0x3e4   : > { %4005 = vrot.lane.b32.xlu0 %v2932_v5, %s8417_s12  ;;  %3691 = vmatmul.bf16.gmra.mxu1 %v9989_v57  ;;  %v9999_v24 = vpop.f32.mrf.mxu3 }
 0x3e5   : > { %v10007_v5 = vpop.trf.xlu2 }
 0x3e6   : > { %11414 = vst [vmem:[#allocation75_spill] sm:$0xff] %v10007_v5 }
 0x3e7   : > { %v2860_v19 = vpop.f32.mrf.mxu2 }
 0x3e8   : > { %v2910_v46 = vadd.f32 %v9900_v18, %v2860_v19  ;;  %v10011_v18 = vld [vmem:[%s8932_s6 + $0x1b8] sm:$0xff] }
 0x3e9   : > { %v3219_v8 = vpop.f32.mrf.mxu1  ;;  %v10001_v29 = vpop.f32.mrf.mxu0 }
 0x3ea   : > { %11413 = vst [vmem:[#allocation74_spill] sm:$0xff] %v10001_v29  ;;  %v2933_v39 = vmul.f32 0.088388346, %v2910_v46  ;;  %v7073_v59 = vpack.c.bf16 %v3219_v8, %v3217_v13 }
 0x3ec   : > { %4677 = vmatmul.bf16.gmra.mxu0 %v9846_v4  ;;  %4007 = vrot.lane.b32.xlu2 %v2933_v39, %s8417_s12  ;;  %v10013_v19 = vpop.f32.mrf.mxu3 }
 0x3ed   : > { %7074 = vmatmul.msk.bf16.gmra.mxu2 %vm9323_vm7, %v7073_v59  ;;  %3851 = vmatmul.bf16.gmra.mxu3 %v9898_v3  ;;  %v10022_v5 = vpop.trf.xlu2 }
 0x3ee   : > { %11415 = vst [vmem:[#allocation76_spill] sm:$0xff] %v10022_v5 }
 0x3ef   : > { %v2863_v22 = vpop.f32.mrf.mxu2 }
 0x3f0   : > { %v2913_v27 = vadd.f32 %v9935_v21, %v2863_v22 }
 0x3f1   : > { %v3222_v46 = vpop.f32.mrf.mxu1  ;;  %v10016_v13 = vpop.f32.mrf.mxu0 }
 0x3f2   : > { %v2934_v4 = vmul.f32 0.088388346, %v2913_v27 }
 0x3f4   : > { %4009 = vrot.lane.b32.xlu1 %v2934_v4, %s8417_s12  ;;  %3696 = vmatmul.bf16.gmra.mxu1 %v10011_v18  ;;  %v10020_v39 = vpop.f32.mrf.mxu3  ;;  %v10030_v4 = vld [vmem:[%s8932_s6 + $0x40] sm:$0xff] }
 0x3f7   : > { %v2865_v59 = vpop.f32.mrf.mxu2 }
 0x3f8   : > { %v2915_v8 = vadd.f32 %v2914_v38, %v2865_v59 }
 0x3f9   : > { %v3224_v21 = vpop.f32.mrf.mxu1  ;;  %v4643_v22 = vpop.f32.mrf.mxu0 }
 0x3fa   : > { %v2935_v60 = vmul.f32 0.088388346, %v2915_v8  ;;  %v7076_v3 = vpack.c.bf16 %v3224_v21, %v3222_v46  ;;  %v4683_v29 = vadd.f32 %v4643_v22, %v9605_v23 }
 0x3fc   : > { %6381 = vst.msk [vmem:[#allocation2] sm:$0xff] %vm4161_vm13, %v4683_v29  ;;  %8213 = vmatmul.lmr.bf16.vlgmr.msra.gmra.16.mxu0  ;;  %4011 = vrot.lane.b32.xlu0 %v2935_v60, %s8417_s12  ;;  %v10032_v59 = vpop.f32.mrf.mxu3  ;;  %v10036_v29 = vpop.trf.xlu2 }
 0x3fd   : > { %7077 = vmatmul.msk.bf16.gmra.mxu2 %vm9342_vm11, %v7076_v3  ;;  %3856 = vmatmul.bf16.gmra.mxu3 %v9956_v44  ;;  %11416 = vst [vmem:[#allocation77_spill] sm:$0xff] %v10036_v29 }
 0x3ff   : > { %v2868_v38 = vpop.f32.mrf.mxu2 }
 0x400   : > { %v2918_v27 = vadd.f32 %v2917_v48, %v2868_v38 }
 0x401   : > { %v3662_v8 = vpop.f32.mrf.mxu1  ;;  %v4645_v46 = vpop.f32.mrf.mxu0 }
 0x402   : > { %v2936_v21 = vmul.f32 0.088388346, %v2918_v27  ;;  %v4684_v23 = vadd.f32 %v4645_v46, %v9609_v2 }
 0x404   : > { %6382 = vst.msk [vmem:[#allocation2 + $0x8] sm:$0xff] %vm4161_vm13, %v4684_v23  ;;  %4391 = vmatmul.bf16.vlgmr.msra.gmra.mxu1 %v10030_v4  ;;  %8214 = vmatmul.lmr.bf16.gmra.16.mxu0  ;;  %v10042_v44 = vpop.f32.mrf.mxu3  ;;  %v11418_v23 = vld [vmem:[#allocation15_spill] sm:$0xff] }
 0x405   : > { %4013 = vrot.lane.b32.xlu2 %v2936_v21, %s8417_s12  ;;  %5333 = vmatpush.bf16.xpose.msra.mxu1 %v9649_v14  ;;  %v10050_v14 = vpop.permute.xlu2 %3989  ;;  %v11417_v21 = vld [vmem:[#allocation21_spill] sm:$0xff] }
 0x407   : > { %v2870_v48 = vpop.f32.mrf.mxu2 }
 0x408   : > { %v2920_v60 = vadd.f32 %v2919_v56, %v2870_v48  ;;  %v2420_v48 = vadd.f32 %v11418_v23, %v11417_v21 }
 0x409   : > { %v3664_v22 = vpop.f32.mrf.mxu1  ;;  %v4648_v3 = vpop.f32.mrf.mxu0 }
 0x40a   : > { %v2937_v38 = vmul.f32 0.088388346, %v2920_v60  ;;  %v7223_v2 = vpack.c.bf16 %v3664_v22, %v3662_v8  ;;  %v4685_v27 = vadd.f32 %v4648_v3, %v9595_v54  ;;  %v10055_v8 = vld [vmem:[%s8932_s6 + $0x48] sm:$0xff] }
 0x40c   : > { %6383 = vst.msk [vmem:[#allocation2 + $0x10] sm:$0xff] %vm4161_vm13, %v4685_v27  ;;  %8215 = vmatmul.lmr.bf16.gmra.16.mxu0  ;;  %4015 = vrot.lane.b32.xlu0 %v2937_v38, %s8417_s12  ;;  %v10057_v54 = vpop.f32.mrf.mxu3 }
 0x40d   : > { %7224 = vmatmul.msk.bf16.vlgmr.msrb.gmra.mxu2 %vm9225_vm3, %v7223_v2  ;;  %5334 = vmatpush.bf16.xpose.msra.mxu1 %v9631_v43 }
 0x40e   : > { %4979 = vmatpush.bf16.msrb.mxu2 %v9880_v0  ;;  %3861 = vmatmul.bf16.gmra.mxu3 %v9989_v57  ;;  %v2452_v0 = vmul.f32 0.088388346, %v2420_v48 }
 0x40f   : > { %v3308_v56 = vpop.f32.mrf.mxu2 }
 0x410   : > { %v3358_v46 = vadd.f32 %v9999_v24, %v3308_v56 }
 0x411   : > { %v3667_v60 = vpop.f32.mrf.mxu1  ;;  %v4650_v22 = vpop.f32.mrf.mxu0 }
 0x412   : > { %v3397_v3 = vmul.f32 0.088388346, %v3358_v46  ;;  %v4686_v43 = vadd.f32 %v4650_v22, %v9599_v55  ;;  %4980 = vmatpush.bf16.msrb.mxu2 %v9903_v32 }
 0x414   : > { %6384 = vst.msk [vmem:[#allocation2 + $0x18] sm:$0xff] %vm4161_vm13, %v4686_v43  ;;  %4396 = vmatmul.bf16.gmra.mxu1 %v10055_v8  ;;  %8216 = vmatmul.lmr.bf16.gmra.16.mxu0  ;;  %v10073_v38 = vpop.f32.mrf.mxu3 }
 0x415   : > { %4049 = vrot.lane.b32.xlu2 %v3397_v3, %s8418_s14  ;;  %5335 = vmatpush.bf16.xpose.msra.mxu1 %v9614_v58 }
 0x416   : > { %v3996_v57 = vpop.permute.xlu2 %3995  ;;  %4981 = vmatpush.bf16.msrb.mxu2 %v9920_v31  ;;  %v10084_v31 = vld [vmem:[%s8932_s6 + $0x50] sm:$0xff] }
 0x417   : > { %v10070_v24 = vsel %vm4161_vm13, %v2452_v0, %v3996_v57  ;;  %v3310_v55 = vpop.f32.mrf.mxu2 }
 0x418   : > { %v3360_v32 = vadd.f32 %v10013_v19, %v3310_v55 }
 0x419   : > { %v3669_v2 = vpop.f32.mrf.mxu1  ;;  %v4653_v27 = vpop.f32.mrf.mxu0 }
 0x41a   : > { %v3398_v56 = vmul.f32 0.088388346, %v3360_v32  ;;  %v7226_v46 = vpack.c.bf16 %v3669_v2, %v3667_v60  ;;  %v4687_v21 = vadd.f32 %v4653_v27, %v9579_v35  ;;  %4982 = vmatpush.bf16.msrb.mxu2 %v9938_v10  ;;  %v8319_v2 = vld [vmem:[#allocation2 + $0x160] sm:$0xff] }
 0x41c   : > { %6385 = vst.msk [vmem:[#allocation2 + $0x20] sm:$0xff] %vm4161_vm13, %v4687_v21  ;;  %8217 = vmatmul.lmr.bf16.gmra.16.mxu0  ;;  %4051 = vrot.lane.b32.xlu0 %v3398_v56, %s8418_s14  ;;  %v10086_v19 = vpop.f32.mrf.mxu3  ;;  %v8321_v56 = vld [vmem:[%s8934_s7 + $0x150] sm:$0xff]  ;;  %v10126_v21 = vld [vmem:[%s8932_s6 + $0x58] sm:$0xff] }
 0x41d   : > { %7227 = vmatmul.msk.bf16.gmra.mxu2 %vm9239_vm6, %v7226_v46  ;;  %5336 = vmatpush.bf16.xpose.msra.mxu1 %v9560_v36  ;;  %v8316_v36 = vld [vmem:[%s8934_s7 + $0x158] sm:$0xff] }
 0x41e   : > { %4983 = vmatpush.bf16.msrb.mxu2 %v9948_v1  ;;  %3866 = vmatmul.bf16.gmra.mxu3 %v10011_v18 }
 0x420   : > { %v3313_v58 = vpop.f32.mrf.mxu2 }
 0x421   : > { %v3363_v35 = vadd.f32 %v10020_v39, %v3313_v58  ;;  %v3672_v10 = vpop.f32.mrf.mxu1  ;;  %v4655_v23 = vpop.f32.mrf.mxu0  ;;  %v8317_v39 = vld [vmem:[#allocation2 + $0x170] sm:$0xff] }
 0x422   : > { %v4688_v48 = vadd.f32 %v4655_v23, %v9583_v62  ;;  %4984 = vmatpush.bf16.msrb.mxu2 %v9959_v16  ;;  %v10100_v62 = vadd.f32 %v8317_v39, %v9720_v53  ;;  %v8318_v16 = vld [vmem:[#allocation2 + $0x178] sm:$0xff] }
 0x423   : > { %v3399_v60 = vmul.f32 0.088388346, %v3363_v35  ;;  %v10103_v22 = vadd.f32 %v8318_v16, %v9727_v42  ;;  %v11421_v53 = vld [vmem:[#allocation29_spill] sm:$0xff]  ;;  %v10111_v42 = vadd.f32 %v8319_v2, %v9712_v47 }
 0x424   : > { %6386 = vst.msk [vmem:[#allocation2 + $0x28] sm:$0xff] %vm4161_vm13, %v4688_v48  ;;  %4401 = vmatmul.bf16.gmra.mxu1 %v10084_v31  ;;  %8218 = vmatmul.lmr.bf16.gmra.16.mxu0  ;;  %v10097_v18 = vpop.f32.mrf.mxu3  ;;  %v2455_v32 = vmul.f32 0.088388346, %v11421_v53 }
 0x425   : > { %4053 = vrot.lane.b32.xlu2 %v3399_v60, %s8418_s14  ;;  %5337 = vmatpush.bf16.xpose.msra.mxu1 %v8316_v36  ;;  %11419 = vst [vmem:[#allocation21_spill] sm:$0xff] %v10100_v62 }
 0x426   : > { %4985 = vmatpush.bf16.msrb.mxu2 %v9970_v25  ;;  %11420 = vst [vmem:[#allocation15_spill] sm:$0xff] %v10103_v22 }
 0x427   : > { %11422 = vst [vmem:[#allocation29_spill] sm:$0xff] %v10111_v42 }
 0x428   : > { %v3315_v1 = vpop.f32.mrf.mxu2 }
 0x429   : > { %v3365_v3 = vadd.f32 %v10032_v59, %v3315_v1  ;;  %v3674_v43 = vpop.f32.mrf.mxu1  ;;  %v4658_v0 = vpop.f32.mrf.mxu0  ;;  %v8320_v59 = vld [vmem:[#allocation2 + $0x168] sm:$0xff] }
 0x42a   : > { %v7229_v57 = vpack.c.bf16 %v3674_v43, %v3672_v10  ;;  %v4689_v55 = vadd.f32 %v4658_v0, %v9569_v26  ;;  %4986 = vmatpush.bf16.msrb.mxu2 %v9976_v7  ;;  %v10114_v27 = vadd.f32 %v8320_v59, %v9718_v45  ;;  %v5236_v26 = vpack.c.bf16 %v10103_v22, %v10100_v62  ;;  %v8322_v45 = vld [vmem:[#allocation2 + $0x150] sm:$0xff]  ;;  %v8323_v10 = vld [vmem:[#allocation2 + $0x158] sm:$0xff]  ;;  %v8326_v43 = vld [vmem:[%s8934_s7 + $0x148] sm:$0xff] }
 0x42b   : > { %v3400_v25 = vmul.f32 0.088388346, %v3365_v3  ;;  %v10132_v35 = vadd.f32 %v8322_v45, %v9689_v6  ;;  %v10135_v23 = vadd.f32 %v8323_v10, %v9702_v33  ;;  %v10145_v33 = vpop.trf.xlu1  ;;  %v8325_v3 = vld [vmem:[#allocation2 + $0x148] sm:$0xff]  ;;  %v11429_v45 = vld [vmem:[#allocation54_spill] sm:$0xff]  ;;  %v11440_v22 = vld [vmem:[#allocation48_spill] sm:$0xff] }
 0x42c   : > { %6387 = vst.msk [vmem:[#allocation2 + $0x30] sm:$0xff] %vm4161_vm13, %v4689_v55  ;;  %8219 = vmatmul.lmr.bf16.gmra.16.mxu0  ;;  %v10128_v58 = vpop.f32.mrf.mxu3  ;;  %v5235_v48 = vpack.c.bf16 %v10114_v27, %v10111_v42  ;;  %v8327_v55 = vld [vmem:[#allocation2 + $0x130] sm:$0xff]  ;;  %v2461_v62 = vmul.f32 0.088388346, %v11440_v22  ;;  %v11441_v22 = vld [vmem:[#allocation43_spill] sm:$0xff] }
 0x42d   : > { %11423 = vst [vmem:[#allocation78_spill] sm:$0xff] %v10114_v27  ;;  %7230 = vmatmul.msk.bf16.gmra.mxu2 %vm9251_vm9, %v7229_v57  ;;  %4055 = vrot.lane.b32.xlu0 %v3400_v25, %s8418_s14  ;;  %v5234_v6 = vpack.c.bf16 %v10135_v23, %v10132_v35  ;;  %v10158_v25 = vadd.f32 %v8327_v55, %v9657_v61  ;;  %v10169_v61 = vld [vmem:[%s8936_s8 + $0x178] sm:$0xff] }
 0x42e   : > { %v4002_v7 = vpop.permute.xlu2 %4001  ;;  %5338 = vmatpush.bf16.xpose.msra.mxu1 %v8321_v56  ;;  %4561 = vmatmul.bf16.vlgmr.msra.gmra.mxu3 %v10030_v4  ;;  %11425 = vst [vmem:[#allocation80_spill] sm:$0xff] %v10132_v35 }
 0x42f   : > { %v10123_v46 = vsel %vm4161_vm13, %v2455_v32, %v4002_v7  ;;  %11426 = vst [vmem:[#allocation81_spill] sm:$0xff] %v10135_v23  ;;  %5503 = vmatpush.bf16.msra.mxu3 %v5236_v26  ;;  %5584 = vmatpush.bf16.msra.mxu0 %v10169_v61  ;;  %v11444_v23 = vld [vmem:[#allocation40_spill] sm:$0xff] }
 0x430   : > { %11424 = vst [vmem:[#allocation79_spill] sm:$0xff] %v10123_v46  ;;  %v3318_v47 = vpop.f32.mrf.mxu2 }
 0x431   : > { %v3368_v60 = vadd.f32 %v10042_v44, %v3318_v47  ;;  %v3677_v36 = vpop.f32.mrf.mxu1  ;;  %v4660_v1 = vpop.f32.mrf.mxu0  ;;  %v8324_v44 = vld [vmem:[#allocation2 + $0x140] sm:$0xff]  ;;  %v8330_v47 = vld [vmem:[#allocation2 + $0x128] sm:$0xff] }
 0x432   : > { %v4690_v39 = vadd.f32 %v4660_v1, %v9573_v30  ;;  %v10149_v16 = vadd.f32 %v8324_v44, %v9666_v15  ;;  %v10152_v30 = vadd.f32 %v8325_v3, %v9679_v20  ;;  %v8328_v15 = vld [vmem:[#allocation2 + $0x138] sm:$0xff]  ;;  %v10187_v1 = vld [vmem:[%s8932_s6 + $0x60] sm:$0xff]  ;;  %v8332_v3 = vld [vmem:[#allocation2 + $0x110] sm:$0xff] }
 0x433   : > { %v3401_v4 = vmul.f32 0.088388346, %v3368_v60  ;;  %5504 = vmatpush.bf16.msra.mxu3 %v5235_v48  ;;  %v10162_v59 = vadd.f32 %v8328_v15, %v9663_v50  ;;  %v8329_v50 = vld [vmem:[#allocation2 + $0x120] sm:$0xff]  ;;  %v10183_v48 = vpop.trf.xlu1  ;;  %v11433_v15 = vld [vmem:[#allocation53_spill] sm:$0xff] }
 0x434   : > { %6388 = vst.msk [vmem:[#allocation2 + $0x38] sm:$0xff] %vm4161_vm13, %v4690_v39  ;;  %4406 = vmatmul.bf16.gmra.mxu1 %v10126_v21  ;;  %8220 = vmatmul.lmr.bf16.gmra.16.mxu0  ;;  %v10155_v57 = vpop.f32.mrf.mxu3  ;;  %v5233_v20 = vpack.c.bf16 %v10152_v30, %v10149_v16  ;;  %v8331_v60 = vld [vmem:[%s8934_s7 + $0x140] sm:$0xff] }
 0x435   : > { %4057 = vrot.lane.b32.xlu2 %v3401_v4, %s8418_s14  ;;  %11427 = vst [vmem:[#allocation82_spill] sm:$0xff] %v10149_v16  ;;  %v5232_v10 = vpack.c.bf16 %v10162_v59, %v10158_v25  ;;  %v11430_v4 = vld [vmem:[#allocation35_spill] sm:$0xff] }
 0x436   : > { %11428 = vst [vmem:[#allocation83_spill] sm:$0xff] %v10152_v30  ;;  %5339 = vmatpush.bf16.xpose.msra.mxu1 %v8326_v43  ;;  %v11432_v43 = vld [vmem:[#allocation52_spill] sm:$0xff] }
 0x437   : > { %5505 = vmatpush.bf16.msra.mxu3 %v5234_v6  ;;  %v11431_v6 = vld [vmem:[#allocation32_spill] sm:$0xff] }
 0x438   : > { %v3320_v0 = vpop.f32.mrf.mxu2  ;;  %v2435_v44 = vadd.f32 %v11431_v6, %v11430_v4  ;;  %v11436_v4 = vld [vmem:[#allocation51_spill] sm:$0xff] }
 0x439   : > { %v3370_v53 = vadd.f32 %v10057_v54, %v3320_v0  ;;  %v3679_v32 = vpop.f32.mrf.mxu1  ;;  %v4663_v2 = vpop.f32.mrf.mxu0  ;;  %v10175_v54 = vadd.f32 %v8329_v50, %v9640_v49  ;;  %v10192_v49 = vld [vmem:[%s8936_s8 + $0x170] sm:$0xff]  ;;  %v10198_v0 = vadd.f32 %v8332_v3, %v11432_v43 }
 0x43a   : > { %v7232_v26 = vpack.c.bf16 %v3679_v32, %v3677_v36  ;;  %v4691_v7 = vadd.f32 %v4663_v2, %v9552_v51  ;;  %v10178_v51 = vadd.f32 %v8330_v47, %v11429_v45  ;;  %v8333_v2 = vld [vmem:[#allocation2 + $0x118] sm:$0xff]  ;;  %5585 = vmatpush.bf16.msra.mxu0 %v10192_v49  ;;  %v2458_v50 = vmul.f32 0.088388346, %v2435_v44  ;;  %v8334_v47 = vld [vmem:[#allocation2 + $0x100] sm:$0xff] }
 0x43b   : > { %v3402_v56 = vmul.f32 0.088388346, %v3370_v53  ;;  %5506 = vmatpush.bf16.msra.mxu3 %v5233_v20  ;;  %v10202_v20 = vadd.f32 %v8333_v2, %v11433_v15  ;;  %v11435_v45 = vld [vmem:[#allocation50_spill] sm:$0xff] }
 0x43c   : > { %6389 = vst.msk [vmem:[#allocation2 + $0x40] sm:$0xff] %vm4161_vm13, %v4691_v7  ;;  %8221 = vmatmul.lmr.bf16.gmra.16.mxu0  ;;  %v10189_v39 = vpop.f32.mrf.mxu3 }
 0x43d   : > { %7233 = vmatmul.msk.bf16.gmra.mxu2 %vm9266_vm12, %v7232_v26  ;;  %4059 = vrot.lane.b32.xlu0 %v3402_v56, %s8418_s14  ;;  %v5231_v26 = vpack.c.bf16 %v10178_v51, %v10175_v54 }
 0x43e   : > { %5340 = vmatpush.bf16.xpose.msra.mxu1 %v8331_v60  ;;  %4566 = vmatmul.bf16.gmra.mxu3 %v10055_v8  ;;  %v11434_v8 = vld [vmem:[#allocation47_spill] sm:$0xff]  ;;  %v10215_v60 = vadd.f32 %v8334_v47, %v11435_v45  ;;  %v11437_v47 = vld [vmem:[#allocation45_spill] sm:$0xff] }
 0x43f   : > { %5507 = vmatpush.bf16.msra.mxu3 %v5232_v10  ;;  %v5230_v10 = vpack.c.bf16 %v10202_v20, %v10198_v0 }
 0x440   : > { %v3323_v36 = vpop.f32.mrf.mxu2 }
 0x441   : > { %v3373_v55 = vadd.f32 %v10073_v38, %v3323_v36  ;;  %v3682_v53 = vpop.f32.mrf.mxu1  ;;  %v4665_v32 = vpop.f32.mrf.mxu0  ;;  %v10211_v38 = vld [vmem:[%s8936_s8 + $0x168] sm:$0xff] }
 0x442   : > { %v4692_v7 = vadd.f32 %v4665_v32, %v11434_v8  ;;  %v8335_v36 = vld [vmem:[#allocation2 + $0x108] sm:$0xff]  ;;  %5586 = vmatpush.bf16.msra.mxu0 %v10211_v38  ;;  %v10229_v32 = vld [vmem:[%s8936_s8 + $0x160] sm:$0xff] }
 0x443   : > { %v3403_v56 = vmul.f32 0.088388346, %v3373_v55  ;;  %v10218_v6 = vadd.f32 %v8335_v36, %v11436_v4  ;;  %5508 = vmatpush.bf16.msra.mxu3 %v5231_v26  ;;  %v10247_v36 = vld [vmem:[%s8932_s6 + $0x68] sm:$0xff] }
 0x444   : > { %6390 = vst.msk [vmem:[#allocation2 + $0x48] sm:$0xff] %vm4161_vm13, %v4692_v7  ;;  %4411 = vmatmul.bf16.gmra.mxu1 %v10187_v1  ;;  %8222 = vmatmul.lmr.bf16.gmra.16.mxu0  ;;  %v10226_v55 = vpop.f32.mrf.mxu3 }
 0x445   : > { %4061 = vrot.lane.b32.xlu2 %v3403_v56, %s8418_s14  ;;  %v5229_v7 = vpack.c.bf16 %v10218_v6, %v10215_v60 }
 0x446   : > { %v4008_v3 = vpop.permute.xlu2 %4007  ;;  %5587 = vmatpush.bf16.msra.mxu0 %v10229_v32 }
 0x447   : > { %v10224_v43 = vsel %vm4161_vm13, %v2458_v50, %v4008_v3  ;;  %5509 = vmatpush.bf16.msra.mxu3 %v5230_v10  ;;  %v10236_v50 = vpop.trf.xlu1  ;;  %v10252_v10 = vld [vmem:[%s8936_s8 + $0x150] sm:$0xff] }
 0x448   : > { %v3325_v44 = vpop.f32.mrf.mxu2 }
 0x449   : > { %v3375_v2 = vadd.f32 %v10086_v19, %v3325_v44  ;;  %v3684_v15 = vpop.f32.mrf.mxu1  ;;  %v4668_v8 = vpop.f32.mrf.mxu0  ;;  %v10240_v19 = vld [vmem:[%s8936_s8 + $0x158] sm:$0xff] }
 0x44a   : > { %v7235_v56 = vpack.c.bf16 %v3684_v15, %v3682_v53  ;;  %v4693_v26 = vadd.f32 %v4668_v8, %v11437_v47  ;;  %5588 = vmatpush.bf16.msra.mxu0 %v10240_v19  ;;  %v11438_v15 = vld [vmem:[#allocation46_spill] sm:$0xff] }
 0x44b   : > { %v3404_v45 = vmul.f32 0.088388346, %v3375_v2  ;;  %5510 = vmatpush.bf16.msra.mxu3 %v5229_v7  ;;  %v10261_v7 = vld [vmem:[%s8936_s8 + $0x148] sm:$0xff] }
 0x44c   : > { %6391 = vst.msk [vmem:[#allocation2 + $0x50] sm:$0xff] %vm4161_vm13, %v4693_v26  ;;  %8223 = vmatmul.lmr.bf16.gmra.16.mxu0  ;;  %v10249_v4 = vpop.f32.mrf.mxu3 }
 0x44d   : > { %7236 = vmatmul.msk.bf16.gmra.mxu2 %vm9285_vm15, %v7235_v56  ;;  %4063 = vrot.lane.b32.xlu0 %v3404_v45, %s8418_s14  ;;  %v10272_v45 = vld [vmem:[%s8936_s8 + $0x140] sm:$0xff] }
 0x44e   : > { %4571 = vmatmul.bf16.gmra.mxu3 %v10084_v31  ;;  %5589 = vmatpush.bf16.msra.mxu0 %v10252_v10  ;;  %v10266_v31 = vpop.permute.xlu0 %3985 }
 0x44f   : > { %v10263_v47 = vpop.trf.xlu1 }
 0x450   : > { %v3328_v53 = vpop.f32.mrf.mxu2 }
 0x451   : > { %v3378_v3 = vadd.f32 %v10097_v18, %v3328_v53  ;;  %v3687_v44 = vpop.f32.mrf.mxu1  ;;  %v4670_v2 = vpop.f32.mrf.mxu0 }
 0x452   : > { %v4694_v8 = vadd.f32 %v4670_v2, %v11438_v15  ;;  %5590 = vmatpush.bf16.msra.mxu0 %v10261_v7 }
 0x453   : > { %v3405_v56 = vmul.f32 0.088388346, %v3378_v3 }
 0x454   : > { %6392 = vst.msk [vmem:[#allocation2 + $0x58] sm:$0xff] %vm4161_vm13, %v4694_v8  ;;  %4416 = vmatmul.bf16.gmra.mxu1 %v10247_v36  ;;  %8224 = vmatmul.lmr.bf16.gmra.16.mxu0  ;;  %v10269_v26 = vpop.f32.mrf.mxu3  ;;  %v11439_v8 = vld [vmem:[#allocation42_spill] sm:$0xff] }
 0x455   : > { %4065 = vrot.lane.b32.xlu2 %v3405_v56, %s8418_s14 }
 0x456   : > { %5591 = vmatpush.bf16.msra.mxu0 %v10272_v45 }
 0x458   : > { %v3330_v18 = vpop.f32.mrf.mxu2 }
 0x459   : > { %v3380_v53 = vadd.f32 %v10128_v58, %v3330_v18  ;;  %v3689_v3 = vpop.f32.mrf.mxu1  ;;  %v4673_v2 = vpop.f32.mrf.mxu0 }
 0x45a   : > { %v7238_v15 = vpack.c.bf16 %v3689_v3, %v3687_v44  ;;  %v4695_v29 = vadd.f32 %v4673_v2, %v11439_v8  ;;  %v10282_v58 = vpop.permute.xlu0 %3999  ;;  %v10284_v18 = vpop.trf.xlu1 }
 0x45b   : > { %v3406_v56 = vmul.f32 0.088388346, %v3380_v53  ;;  %v10290_v53 = vld [vmem:[%s8932_s6 + $0x70] sm:$0xff] }
 0x45c   : > { %6393 = vst.msk [vmem:[#allocation2 + $0x60] sm:$0xff] %vm4161_vm13, %v4695_v29  ;;  %8225 = vmatmul.lmr.bf16.gmra.16.mxu0  ;;  %v10292_v29 = vpop.f32.mrf.mxu3 }
 0x45d   : > { %7239 = vmatmul.msk.bf16.gmra.mxu2 %vm9306_vm2, %v7238_v15  ;;  %4067 = vrot.lane.b32.xlu0 %v3406_v56, %s8418_s14 }
 0x45e   : > { %4576 = vmatmul.bf16.gmra.mxu3 %v10126_v21  ;;  %v11443_v21 = vld [vmem:[#allocation44_spill] sm:$0xff] }
 0x45f   : > { %v4014_v44 = vpop.permute.xlu2 %4013 }
 0x460   : > { %v10287_v3 = vsel %vm4161_vm13, %v2461_v62, %v4014_v44  ;;  %v3333_v2 = vpop.f32.mrf.mxu2 }
 0x461   : > { %v3383_v15 = vadd.f32 %v10155_v57, %v3333_v2  ;;  %v3692_v8 = vpop.f32.mrf.mxu1  ;;  %v4675_v56 = vpop.f32.mrf.mxu0  ;;  %v2440_v57 = vadd.f32 %v11444_v23, %v11443_v21 }
 0x462   : > { %v4696_v27 = vadd.f32 %v4675_v56, %v11441_v22  ;;  %v10300_v62 = vpop.permute.xlu0 %4005  ;;  %v10308_v46 = vpop.trf.xlu1 }
 0x463   : > { %v3407_v5 = vmul.f32 0.088388346, %v3383_v15  ;;  %11442 = vst [vmem:[#allocation54_spill] sm:$0xff] %v10300_v62 }
 0x464   : > { %6394 = vst.msk [vmem:[#allocation2 + $0x68] sm:$0xff] %vm4161_vm13, %v4696_v27  ;;  %4421 = vmatmul.bf16.gmra.mxu1 %v10290_v53  ;;  %8226 = vmatmul.lmr.bf16.gmra.16.mxu0  ;;  %v10302_v42 = vpop.f32.mrf.mxu3  ;;  %v11445_v27 = vld [vmem:[#allocation39_spill] sm:$0xff] }
 0x465   : > { %4069 = vrot.lane.b32.xlu2 %v3407_v5, %s8418_s14  ;;  %v2460_v5 = vmul.f32 0.088388346, %v2440_v57 }
 0x468   : > { %v3335_v44 = vpop.f32.mrf.mxu2 }
 0x469   : > { %v3385_v2 = vadd.f32 %v10189_v39, %v3335_v44  ;;  %v3694_v56 = vpop.f32.mrf.mxu1  ;;  %v4678_v15 = vpop.f32.mrf.mxu0 }
 0x46a   : > { %v7241_v22 = vpack.c.bf16 %v3694_v56, %v3692_v8  ;;  %v4697_v35 = vadd.f32 %v4678_v15, %v11445_v27  ;;  %v10318_v8 = vld [vmem:[%s8932_s6 + $0x78] sm:$0xff] }
 0x46b   : > { %v3408_v30 = vmul.f32 0.088388346, %v3385_v2  ;;  %v11446_v56 = vld [vmem:[#allocation41_spill] sm:$0xff] }
 0x46c   : > { %6395 = vst.msk [vmem:[#allocation2 + $0x70] sm:$0xff] %vm4161_vm13, %v4697_v35  ;;  %8227 = vmatmul.lmr.bf16.gmra.16.mxu0  ;;  %v10320_v21 = vpop.f32.mrf.mxu3 }
 0x46d   : > { %7242 = vmatmul.msk.bf16.gmra.mxu2 %vm9323_vm7, %v7241_v22  ;;  %4071 = vrot.lane.b32.xlu0 %v3408_v30, %s8418_s14  ;;  %v10327_v30 = vpop.trf.xlu1 }
 0x46e   : > { %v4012_v23 = vpop.permute.xlu0 %4011  ;;  %4581 = vmatmul.bf16.gmra.mxu3 %v10187_v1  ;;  %v11447_v1 = vld [vmem:[#allocation49_spill] sm:$0xff] }
 0x46f   : > { %v10315_v39 = vsel %vm4161_vm13, %v2460_v5, %v4012_v23  ;;  %v11448_v23 = vld [vmem:[#allocation57_spill] sm:$0xff] }
 0x470   : > { %v3338_v44 = vpop.f32.mrf.mxu2 }
 0x471   : > { %v3388_v35 = vadd.f32 %v10226_v55, %v3338_v44  ;;  %v3697_v2 = vpop.f32.mrf.mxu1  ;;  %v4680_v57 = vpop.f32.mrf.mxu0  ;;  %v2445_v55 = vadd.f32 %v11448_v23, %v11447_v1 }
 0x472   : > { %v4698_v15 = vadd.f32 %v4680_v57, %v11446_v56 }
 0x473   : > { %v3409_v22 = vmul.f32 0.088388346, %v3388_v35 }
 0x474   : > { %6396 = vst.msk [vmem:[#allocation2 + $0x78] sm:$0xff] %vm4161_vm13, %v4698_v15  ;;  %4426 = vmatmul.bf16.gmra.mxu1 %v10318_v8  ;;  %8228 = vmatmul.lmr.bf16.gmra.16.mxu0  ;;  %v10330_v5 = vpop.f32.mrf.mxu3 }
 0x475   : > { %4073 = vrot.lane.b32.xlu0 %v3409_v22, %s8418_s14  ;;  %v2462_v22 = vmul.f32 0.088388346, %v2445_v55  ;;  %v10341_v23 = vpop.trf.xlu1 }
 0x478   : > { %v3340_v27 = vpop.f32.mrf.mxu2 }
 0x479   : > { %v3390_v44 = vadd.f32 %v10249_v4, %v3340_v27  ;;  %v3699_v57 = vpop.f32.mrf.mxu1  ;;  %v5118_v35 = vpop.f32.mrf.mxu0 }
 0x47a   : > { %v7244_v56 = vpack.c.bf16 %v3699_v57, %v3697_v2  ;;  %v5158_v15 = vadd.f32 %v5118_v35, %v9923_v40  ;;  %v10347_v40 = vld [vmem:[%s8932_s6 + $0xc0] sm:$0xff]  ;;  %v8336_v35 = vld [vmem:[%s8934_s7 + $0x1f8] sm:$0xff] }
 0x47b   : > { %v3410_v62 = vmul.f32 0.088388346, %v3390_v44 }
 0x47c   : > { %6397 = vst.msk [vmem:[#allocation2 + $0x80] sm:$0xff] %vm4161_vm13, %v5158_v15  ;;  %5592 = vmatmul.bf16.vlgmr.msra.gmra.mxu0 %v10145_v33  ;;  %v10349_v27 = vpop.f32.mrf.mxu3  ;;  %v11450_v15 = vld [vmem:[#allocation6_spill] sm:$0xff] }
 0x47d   : > { %7245 = vmatmul.msk.bf16.gmra.mxu2 %vm9342_vm11, %v7244_v56  ;;  %4075 = vrot.lane.b32.xlu0 %v3410_v62, %s8418_s14  ;;  %v11449_v56 = vld [vmem:[#allocation11_spill] sm:$0xff] }
 0x47e   : > { %v4016_v1 = vpop.permute.xlu0 %4015  ;;  %4586 = vmatmul.bf16.gmra.mxu3 %v10247_v36 }
 0x47f   : > { %v10344_v4 = vsel %vm4161_vm13, %v2462_v22, %v4016_v1  ;;  %v2410_v22 = vadd.f32 %v11450_v15, %v11449_v56  ;;  %v10376_v15 = vld [vmem:[%s8932_s6 + $0xc8] sm:$0xff] }
 0x480   : > { %v3343_v2 = vpop.f32.mrf.mxu2 }
 0x481   : > { %v3393_v33 = vadd.f32 %v10269_v26, %v3343_v2  ;;  %v4392_v55 = vpop.f32.mrf.mxu1  ;;  %v5120_v44 = vpop.f32.mrf.mxu0 }
 0x482   : > { %v5159_v62 = vadd.f32 %v5120_v44, %v9926_v11 }
 0x483   : > { %v3411_v57 = vmul.f32 0.088388346, %v3393_v33 }
 0x484   : > { %6398 = vst.msk [vmem:[#allocation2 + $0x88] sm:$0xff] %vm4161_vm13, %v5159_v62  ;;  %4866 = vmatmul.bf16.vlgmr.msrb.gmra.mxu1 %v10347_v40  ;;  %v10360_v36 = vpop.f32.mrf.mxu3  ;;  %v3988_v62 = vpop.permute.xlu1 %3987 }
 0x485   : > { %4077 = vrot.lane.b32.xlu0 %v3411_v57, %s8418_s14  ;;  %5808 = vmatpush.bf16.xpose.msrb.mxu1 %v8336_v35  ;;  %v2448_v57 = vmul.f32 0.088388346, %v2410_v22 }
 0x488   : > { %v3345_v1 = vpop.f32.mrf.mxu2 }
 0x489   : > { %v3395_v26 = vadd.f32 %v10292_v29, %v3345_v1  ;;  %v4394_v2 = vpop.f32.mrf.mxu1  ;;  %v5123_v11 = vpop.f32.mrf.mxu0  ;;  %v4163_v29 = vsel %vm4161_vm13, %v2448_v57, %v3988_v62 }
 0x48a   : > { %v7391_v33 = vpack.c.bf16 %v4394_v2, %v4392_v55  ;;  %v5160_v44 = vadd.f32 %v5123_v11, %v9909_v63  ;;  %v8337_v63 = vld [vmem:[%s8934_s7 + $0x1f0] sm:$0xff]  ;;  %v8338_v11 = vld [vmem:[%s8934_s7 + $0x1e8] sm:$0xff] }
 0x48b   : > { %v3412_v16 = vmul.f32 0.088388346, %v3395_v26  ;;  %v11451_v26 = vld [vmem:[#allocation12_spill] sm:$0xff] }
 0x48c   : > { %6399 = vst.msk [vmem:[#allocation2 + $0x90] sm:$0xff] %vm4161_vm13, %v5160_v44  ;;  %5597 = vmatmul.bf16.gmra.mxu0 %v10183_v48  ;;  %v10378_v48 = vpop.f32.mrf.mxu3  ;;  %v11453_v44 = vld [vmem:[#allocation8_spill] sm:$0xff] }
 0x48d   : > { %7392 = vmatmul.msk.bf16.vlgmr.msra.gmra.mxu2 %vm9225_vm3, %v7391_v33  ;;  %4079 = vrot.lane.b32.xlu0 %v3412_v16, %s8418_s14  ;;  %v11452_v33 = vld [vmem:[#allocation16_spill] sm:$0xff] }
 0x48e   : > { %v4052_v35 = vpop.permute.xlu0 %4051  ;;  %5454 = vmatpush.bf16.msra.mxu2 %v10169_v61  ;;  %5809 = vmatpush.bf16.xpose.msrb.mxu1 %v8337_v63  ;;  %v2415_v62 = vadd.f32 %v11453_v44, %v11452_v33  ;;  %v11454_v63 = vld [vmem:[#allocation17_spill] sm:$0xff]  ;;  %v11455_v44 = vld [vmem:[#allocation18_spill] sm:$0xff] }
 0x48f   : > { %v10373_v55 = vsel %vm4178_vm14, %v4163_v29, %v4052_v35  ;;  %4591 = vmatmul.bf16.gmra.mxu3 %v10290_v53 }
 0x490   : > { %v3783_v56 = vpop.f32.mrf.mxu2 }
 0x491   : > { %v3833_v16 = vadd.f32 %v10302_v42, %v3783_v56  ;;  %v4397_v22 = vpop.f32.mrf.mxu1  ;;  %v5125_v1 = vpop.f32.mrf.mxu0 }
 0x492   : > { %v5161_v2 = vadd.f32 %v5125_v1, %v11451_v26  ;;  %5455 = vmatpush.bf16.msra.mxu2 %v10192_v49  ;;  %v3992_v1 = vpop.permute.xlu1 %3991 }
 0x493   : > { %v3872_v61 = vmul.f32 0.088388346, %v3833_v16 }
 0x494   : > { %6400 = vst.msk [vmem:[#allocation2 + $0x98] sm:$0xff] %vm4161_vm13, %v5161_v2  ;;  %4871 = vmatmul.bf16.gmra.mxu1 %v10376_v15  ;;  %v10389_v42 = vpop.f32.mrf.mxu3 }
 0x495   : > { %4113 = vrot.lane.b32.xlu0 %v3872_v61, %s8419_s15  ;;  %v10408_v61 = vld [vmem:[%s8932_s6 + $0xd0] sm:$0xff] }
 0x496   : > { %5810 = vmatpush.bf16.xpose.msrb.mxu1 %v8338_v11  ;;  %5456 = vmatpush.bf16.msra.mxu2 %v10211_v38  ;;  %v2450_v38 = vmul.f32 0.088388346, %v2415_v62 }
 0x498   : > { %v3785_v53 = vpop.f32.mrf.mxu2 }
 0x499   : > { %v3835_v49 = vadd.f32 %v10320_v21, %v3785_v53  ;;  %v4399_v57 = vpop.f32.mrf.mxu1  ;;  %v5128_v29 = vpop.f32.mrf.mxu0  ;;  %v8339_v21 = vld [vmem:[%s8934_s7 + $0x1e0] sm:$0xff] }
 0x49a   : > { %v7394_v35 = vpack.c.bf16 %v4399_v57, %v4397_v22  ;;  %v5162_v56 = vadd.f32 %v5128_v29, %v11454_v63  ;;  %5457 = vmatpush.bf16.msra.mxu2 %v10229_v32  ;;  %v4165_v22 = vsel %vm4161_vm13, %v2450_v38, %v3992_v1  ;;  %v11456_v29 = vld [vmem:[#allocation74_spill] sm:$0xff]  ;;  %v8342_v63 = vld [vmem:[#allocation2 + $0x1f8] sm:$0xff] }
 0x49b   : > { %v3873_v16 = vmul.f32 0.088388346, %v3835_v49  ;;  %v8340_v49 = vld [vmem:[%s8934_s7 + $0x1d8] sm:$0xff] }
 0x49c   : > { %6401 = vst.msk [vmem:[#allocation2 + $0xa0] sm:$0xff] %vm4161_vm13, %v5162_v56  ;;  %5602 = vmatmul.bf16.gmra.mxu0 %v10236_v50  ;;  %v10410_v50 = vpop.f32.mrf.mxu3 }
 0x49d   : > { %7395 = vmatmul.msk.bf16.gmra.mxu2 %vm9239_vm6, %v7394_v35  ;;  %4115 = vrot.lane.b32.xlu0 %v3873_v16, %s8419_s15 }
 0x49e   : > { %5811 = vmatpush.bf16.xpose.msrb.mxu1 %v8339_v21  ;;  %5458 = vmatpush.bf16.msra.mxu2 %v10240_v19  ;;  %v11459_v21 = vld [vmem:[#allocation22_spill] sm:$0xff] }
 0x49f   : > { %v4056_v32 = vpop.permute.xlu0 %4055  ;;  %4596 = vmatmul.bf16.gmra.mxu3 %v10318_v8 }
 0x4a0   : > { %v10405_v26 = vsel %vm4178_vm14, %v4165_v22, %v4056_v32  ;;  %v3788_v2 = vpop.f32.mrf.mxu2  ;;  %v8343_v32 = vld [vmem:[#allocation2 + $0x1e0] sm:$0xff] }
 0x4a1   : > { %v3838_v11 = vadd.f32 %v10330_v5, %v3788_v2  ;;  %v4402_v53 = vpop.f32.mrf.mxu1  ;;  %v5130_v33 = vpop.f32.mrf.mxu0  ;;  %v8341_v5 = vld [vmem:[#allocation2 + $0x1f0] sm:$0xff]  ;;  %v11460_v2 = vld [vmem:[#allocation70_spill] sm:$0xff] }
 0x4a2   : > { %v5163_v19 = vadd.f32 %v5130_v33, %v11455_v44  ;;  %5459 = vmatpush.bf16.msra.mxu2 %v10252_v10  ;;  %v10424_v35 = vadd.f32 %v8341_v5, %v11456_v29  ;;  %v10427_v10 = vadd.f32 %v8342_v63, %v10016_v13  ;;  %v10435_v13 = vadd.f32 %v8343_v32, %v11460_v2  ;;  %v11464_v5 = vld [vmem:[#allocation7_spill] sm:$0xff]  ;;  %v8347_v63 = vld [vmem:[#allocation2 + $0x1d8] sm:$0xff]  ;;  %v8348_v2 = vld [vmem:[#allocation2 + $0x1c0] sm:$0xff] }
 0x4a3   : > { %v3874_v62 = vmul.f32 0.088388346, %v3838_v11  ;;  %v8344_v11 = vld [vmem:[#allocation2 + $0x1e8] sm:$0xff] }
 0x4a4   : > { %6402 = vst.msk [vmem:[#allocation2 + $0xa8] sm:$0xff] %vm4161_vm13, %v5163_v19  ;;  %4876 = vmatmul.bf16.gmra.mxu1 %v10408_v61  ;;  %v10421_v57 = vpop.f32.mrf.mxu3 }
 0x4a5   : > { %4117 = vrot.lane.b32.xlu0 %v3874_v62, %s8419_s15  ;;  %11457 = vst [vmem:[#allocation35_spill] sm:$0xff] %v10424_v35  ;;  %v10451_v62 = vld [vmem:[%s8932_s6 + $0xd8] sm:$0xff] }
 0x4a6   : > { %5812 = vmatpush.bf16.xpose.msrb.mxu1 %v8340_v49  ;;  %5460 = vmatpush.bf16.msra.mxu2 %v10261_v7  ;;  %11458 = vst [vmem:[#allocation32_spill] sm:$0xff] %v10427_v10 }
 0x4a7   : > { %11461 = vst [vmem:[#allocation52_spill] sm:$0xff] %v10435_v13 }
 0x4a8   : > { %v3790_v8 = vpop.f32.mrf.mxu2 }
 0x4a9   : > { %v3840_v56 = vadd.f32 %v10349_v27, %v3790_v8  ;;  %v4404_v16 = vpop.f32.mrf.mxu1  ;;  %v5133_v1 = vpop.f32.mrf.mxu0  ;;  %v11462_v27 = vld [vmem:[#allocation72_spill] sm:$0xff] }
 0x4aa   : > { %v7397_v38 = vpack.c.bf16 %v4404_v16, %v4402_v53  ;;  %v5164_v22 = vadd.f32 %v5133_v1, %v11459_v21  ;;  %5461 = vmatpush.bf16.msra.mxu2 %v10272_v45  ;;  %v10438_v33 = vadd.f32 %v8344_v11, %v11462_v27  ;;  %v5711_v53 = vpack.c.bf16 %v10427_v10, %v10424_v35  ;;  %v8345_v45 = vld [vmem:[%s8934_s7 + $0x1d0] sm:$0xff]  ;;  %v11469_v11 = vld [vmem:[#allocation66_spill] sm:$0xff]  ;;  %v10492_v35 = vpop.permute.xlu1 %3993 }
 0x4ab   : > { %v3875_v7 = vmul.f32 0.088388346, %v3840_v56  ;;  %v8346_v8 = vld [vmem:[#allocation2 + $0x1d0] sm:$0xff]  ;;  %v11466_v56 = vld [vmem:[#allocation9_spill] sm:$0xff]  ;;  %v10472_v27 = vadd.f32 %v8348_v2, %v11469_v11  ;;  %v11479_v10 = vld [vmem:[#allocation26_spill] sm:$0xff] }
 0x4ac   : > { %6403 = vst.msk [vmem:[#allocation2 + $0xb0] sm:$0xff] %vm4161_vm13, %v5164_v22  ;;  %5607 = vmatmul.bf16.gmra.mxu0 %v10263_v47  ;;  %v10453_v49 = vpop.f32.mrf.mxu3  ;;  %v10457_v29 = vadd.f32 %v8346_v8, %v11464_v5  ;;  %v10460_v16 = vadd.f32 %v8347_v63, %v11466_v56  ;;  %v5710_v1 = vpack.c.bf16 %v10438_v33, %v10435_v13  ;;  %v11468_v22 = vld [vmem:[#allocation23_spill] sm:$0xff]  ;;  %v11473_v5 = vld [vmem:[#allocation25_spill] sm:$0xff]  ;;  %v11474_v63 = vld [vmem:[#allocation20_spill] sm:$0xff] }
 0x4ad   : > { %11463 = vst [vmem:[#allocation53_spill] sm:$0xff] %v10438_v33  ;;  %7398 = vmatmul.msk.bf16.gmra.mxu2 %vm9251_vm9, %v7397_v38  ;;  %4119 = vrot.lane.b32.xlu0 %v3875_v7, %s8419_s15  ;;  %v2425_v56 = vadd.f32 %v11474_v63, %v11473_v5  ;;  %v8352_v2 = vld [vmem:[#allocation2 + $0x1b8] sm:$0xff]  ;;  %v11488_v33 = vld [vmem:[#allocation28_spill] sm:$0xff] }
 0x4ae   : > { %5813 = vmatpush.bf16.xpose.msrb.mxu1 %v8345_v45  ;;  %11465 = vst [vmem:[#allocation47_spill] sm:$0xff] %v10457_v29  ;;  %v5709_v32 = vpack.c.bf16 %v10460_v16, %v10457_v29  ;;  %v11471_v45 = vld [vmem:[#allocation68_spill] sm:$0xff]  ;;  %v11477_v11 = vld [vmem:[#allocation65_spill] sm:$0xff]  ;;  %v11492_v29 = vld [vmem:[#allocation27_spill] sm:$0xff] }
 0x4af   : > { %v4060_v44 = vpop.permute.xlu0 %4059  ;;  %5036 = vmatmul.bf16.vlgmr.msrb.gmra.mxu3 %v10347_v40  ;;  %11467 = vst [vmem:[#allocation50_spill] sm:$0xff] %v10460_v16  ;;  %v10557_v16 = vld [vmem:[%s8936_s8 + $0x1e0] sm:$0xff] }
 0x4b0   : > { %v10448_v47 = vsel %vm4178_vm14, %v10070_v24, %v4060_v44  ;;  %v3793_v19 = vpop.f32.mrf.mxu2  ;;  %5978 = vmatpush.bf16.msrb.mxu3 %v5711_v53  ;;  %11470 = vst [vmem:[#allocation51_spill] sm:$0xff] %v10472_v27  ;;  %v8350_v44 = vld [vmem:[%s8934_s7 + $0x1c8] sm:$0xff] }
 0x4b1   : > { %v3843_v24 = vadd.f32 %v10360_v36, %v3793_v19  ;;  %v4407_v38 = vpop.f32.mrf.mxu1  ;;  %v5135_v21 = vpop.f32.mrf.mxu0  ;;  %v8349_v36 = vld [vmem:[#allocation2 + $0x1c8] sm:$0xff] }
 0x4b2   : > { %v5165_v7 = vadd.f32 %v5135_v21, %v11468_v22  ;;  %v10475_v53 = vadd.f32 %v8349_v36, %v11471_v45  ;;  %v11475_v21 = vld [vmem:[#allocation64_spill] sm:$0xff]  ;;  %v10487_v36 = vadd.f32 %v8352_v2, %v11477_v11 }
 0x4b3   : > { %v3876_v40 = vmul.f32 0.088388346, %v3843_v24  ;;  %v8351_v24 = vld [vmem:[#allocation2 + $0x1b0] sm:$0xff] }
 0x4b4   : > { %6404 = vst.msk [vmem:[#allocation2 + $0xb8] sm:$0xff] %vm4161_vm13, %v5165_v7  ;;  %4881 = vmatmul.bf16.gmra.mxu1 %v10451_v62  ;;  %5979 = vmatpush.bf16.msrb.mxu3 %v5710_v1  ;;  %v10478_v8 = vpop.f32.mrf.mxu3  ;;  %v10483_v1 = vadd.f32 %v8351_v24, %v11475_v21  ;;  %v5708_v45 = vpack.c.bf16 %v10475_v53, %v10472_v27  ;;  %v8354_v24 = vld [vmem:[#allocation2 + $0x1a8] sm:$0xff]  ;;  %v11482_v21 = vld [vmem:[#allocation61_spill] sm:$0xff] }
 0x4b5   : > { %4121 = vrot.lane.b32.xlu0 %v3876_v40, %s8419_s15  ;;  %11472 = vst [vmem:[#allocation45_spill] sm:$0xff] %v10475_v53 }
 0x4b6   : > { %5814 = vmatpush.bf16.xpose.msrb.mxu1 %v8350_v44  ;;  %11476 = vst [vmem:[#allocation46_spill] sm:$0xff] %v10483_v1 }
 0x4b7   : > { %11478 = vst [vmem:[#allocation42_spill] sm:$0xff] %v10487_v36 }
 0x4b8   : > { %v3795_v19 = vpop.f32.mrf.mxu2  ;;  %5980 = vmatpush.bf16.msrb.mxu3 %v5709_v32  ;;  %v2454_v32 = vmul.f32 0.088388346, %v2425_v56 }
 0x4b9   : > { %v3845_v22 = vadd.f32 %v10378_v48, %v3795_v19  ;;  %v4409_v7 = vpop.f32.mrf.mxu1  ;;  %v5138_v40 = vpop.f32.mrf.mxu0  ;;  %v10497_v48 = vld [vmem:[%s8936_s8 + $0x1f8] sm:$0xff] }
 0x4ba   : > { %v7400_v44 = vpack.c.bf16 %v4409_v7, %v4407_v38  ;;  %v5166_v5 = vadd.f32 %v5138_v40, %v11479_v10  ;;  %v8353_v38 = vld [vmem:[#allocation2 + $0x1a0] sm:$0xff]  ;;  %v11480_v10 = vld [vmem:[#allocation60_spill] sm:$0xff]  ;;  %6059 = vmatpush.bf16.msra.mxu0 %v10497_v48  ;;  %v4169_v56 = vsel %vm4161_vm13, %v2454_v32, %v10282_v58 }
 0x4bb   : > { %v3877_v63 = vmul.f32 0.088388346, %v3845_v22  ;;  %v10503_v19 = vadd.f32 %v8353_v38, %v11480_v10  ;;  %v10506_v22 = vadd.f32 %v8354_v24, %v11482_v21  ;;  %v8355_v40 = vld [vmem:[%s8934_s7 + $0x1c0] sm:$0xff]  ;;  %v8357_v21 = vld [vmem:[#allocation2 + $0x198] sm:$0xff] }
 0x4bc   : > { %6405 = vst.msk [vmem:[#allocation2 + $0xc0] sm:$0xff] %vm4161_vm13, %v5166_v5  ;;  %5612 = vmatmul.bf16.gmra.mxu0 %v10284_v18  ;;  %v5707_v18 = vpack.c.bf16 %v10487_v36, %v10483_v1  ;;  %5981 = vmatpush.bf16.msrb.mxu3 %v5708_v45  ;;  %v10520_v5 = vpop.f32.mrf.mxu3  ;;  %v8356_v45 = vld [vmem:[#allocation2 + $0x190] sm:$0xff]  ;;  %v11484_v38 = vld [vmem:[#allocation58_spill] sm:$0xff]  ;;  %v11493_v36 = vld [vmem:[#allocation31_spill] sm:$0xff] }
 0x4bd   : > { %7401 = vmatmul.msk.bf16.gmra.mxu2 %vm9266_vm12, %v7400_v44  ;;  %4123 = vrot.lane.b32.xlu0 %v3877_v63, %s8419_s15  ;;  %11481 = vst [vmem:[#allocation48_spill] sm:$0xff] %v10503_v19  ;;  %v10518_v44 = vld [vmem:[%s8932_s6 + $0xe0] sm:$0xff]  ;;  %v10523_v63 = vld [vmem:[%s8936_s8 + $0x1f0] sm:$0xff]  ;;  %v10527_v10 = vadd.f32 %v8356_v45, %v11484_v38  ;;  %v10537_v45 = vpop.permute.xlu1 %3997  ;;  %v11489_v38 = vld [vmem:[#allocation55_spill] sm:$0xff] }
 0x4be   : > { %11483 = vst [vmem:[#allocation43_spill] sm:$0xff] %v10506_v22  ;;  %5815 = vmatpush.bf16.xpose.msrb.mxu1 %v8355_v40  ;;  %v5706_v40 = vpack.c.bf16 %v10506_v22, %v10503_v19  ;;  %6060 = vmatpush.bf16.msra.mxu0 %v10523_v63 }
 0x4bf   : > { %v4064_v7 = vpop.permute.xlu0 %4063  ;;  %5041 = vmatmul.bf16.gmra.mxu3 %v10376_v15  ;;  %11485 = vst [vmem:[#allocation44_spill] sm:$0xff] %v10527_v10 }
 0x4c0   : > { %v10515_v2 = vsel %vm4178_vm14, %v4169_v56, %v4064_v7  ;;  %v3798_v11 = vpop.f32.mrf.mxu2  ;;  %v11486_v56 = vld [vmem:[#allocation59_spill] sm:$0xff]  ;;  %5982 = vmatpush.bf16.msrb.mxu3 %v5707_v18 }
 0x4c1   : > { %v3848_v58 = vadd.f32 %v10389_v42, %v3798_v11  ;;  %v4412_v32 = vpop.f32.mrf.mxu1  ;;  %v5140_v24 = vpop.f32.mrf.mxu0  ;;  %v10531_v7 = vadd.f32 %v8357_v21, %v11486_v56  ;;  %v10542_v42 = vld [vmem:[%s8936_s8 + $0x1e8] sm:$0xff]  ;;  %v8358_v11 = vld [vmem:[#allocation2 + $0x180] sm:$0xff] }
 0x4c2   : > { %v5167_v13 = vadd.f32 %v5140_v24, %v11488_v33  ;;  %v10546_v21 = vadd.f32 %v8358_v11, %v11489_v38  ;;  %v8359_v33 = vld [vmem:[#allocation2 + $0x188] sm:$0xff]  ;;  %v11490_v24 = vld [vmem:[#allocation56_spill] sm:$0xff]  ;;  %6061 = vmatpush.bf16.msra.mxu0 %v10542_v42 }
 0x4c3   : > { %11487 = vst [vmem:[#allocation40_spill] sm:$0xff] %v10531_v7  ;;  %v3878_v15 = vmul.f32 0.088388346, %v3848_v58  ;;  %v10549_v56 = vadd.f32 %v8359_v33, %v11490_v24  ;;  %v5705_v18 = vpack.c.bf16 %v10531_v7, %v10527_v10  ;;  %v11498_v7 = vld [vmem:[#allocation62_spill] sm:$0xff] }
 0x4c4   : > { %6406 = vst.msk [vmem:[#allocation2 + $0xc8] sm:$0xff] %vm4161_vm13, %v5167_v13  ;;  %4886 = vmatmul.bf16.gmra.mxu1 %v10518_v44  ;;  %5983 = vmatpush.bf16.msrb.mxu3 %v5706_v40  ;;  %v10554_v58 = vpop.f32.mrf.mxu3 }
 0x4c5   : > { %4125 = vrot.lane.b32.xlu0 %v3878_v15, %s8419_s15  ;;  %v11491_v15 = vld [vmem:[#allocation30_spill] sm:$0xff]  ;;  %v5704_v24 = vpack.c.bf16 %v10549_v56, %v10546_v21  ;;  %v4004_v22 = vpop.permute.xlu1 %4003 }
 0x4c6   : > { %v2430_v11 = vadd.f32 %v11492_v29, %v11491_v15  ;;  %6062 = vmatpush.bf16.msra.mxu0 %v10557_v16 }
 0x4c8   : > { %v3800_v13 = vpop.f32.mrf.mxu2  ;;  %5984 = vmatpush.bf16.msrb.mxu3 %v5705_v18  ;;  %v2456_v29 = vmul.f32 0.088388346, %v2430_v11 }
 0x4c9   : > { %v3850_v38 = vadd.f32 %v10410_v50, %v3800_v13  ;;  %v4414_v53 = vpop.f32.mrf.mxu1  ;;  %v5143_v33 = vpop.f32.mrf.mxu0  ;;  %v10569_v50 = vld [vmem:[%s8936_s8 + $0x1d8] sm:$0xff]  ;;  %v10585_v13 = vld [vmem:[%s8936_s8 + $0x1d0] sm:$0xff] }
 0x4ca   : > { %v7403_v27 = vpack.c.bf16 %v4414_v53, %v4412_v32  ;;  %v5168_v1 = vadd.f32 %v5143_v33, %v11493_v36  ;;  %6063 = vmatpush.bf16.msra.mxu0 %v10569_v50  ;;  %v4171_v53 = vsel %vm4161_vm13, %v2456_v29, %v4004_v22  ;;  %v11494_v22 = vld [vmem:[#allocation33_spill] sm:$0xff] }
 0x4cb   : > { %v3879_v40 = vmul.f32 0.088388346, %v3850_v38 }
 0x4cc   : > { %6407 = vst.msk [vmem:[#allocation2 + $0xd0] sm:$0xff] %vm4161_vm13, %v5168_v1  ;;  %5617 = vmatmul.bf16.gmra.mxu0 %v10308_v46  ;;  %5985 = vmatpush.bf16.msrb.mxu3 %v5704_v24  ;;  %v10580_v46 = vld [vmem:[%s8932_s6 + $0xe8] sm:$0xff]  ;;  %v10582_v18 = vpop.f32.mrf.mxu3 }
 0x4cd   : > { %7404 = vmatmul.msk.bf16.gmra.mxu2 %vm9285_vm15, %v7403_v27  ;;  %4127 = vrot.lane.b32.xlu0 %v3879_v40, %s8419_s15  ;;  %v10594_v24 = vld [vmem:[%s8936_s8 + $0x1c8] sm:$0xff] }
 0x4ce   : > { %6064 = vmatpush.bf16.msra.mxu0 %v10585_v13 }
 0x4cf   : > { %v4068_v36 = vpop.permute.xlu0 %4067  ;;  %5046 = vmatmul.bf16.gmra.mxu3 %v10408_v61 }
 0x4d0   : > { %v10577_v32 = vsel %vm4178_vm14, %v4171_v53, %v4068_v36  ;;  %v3803_v1 = vpop.f32.mrf.mxu2 }
 0x4d1   : > { %v3853_v27 = vadd.f32 %v10421_v57, %v3803_v1  ;;  %v4417_v15 = vpop.f32.mrf.mxu1  ;;  %v5145_v11 = vpop.f32.mrf.mxu0  ;;  %v10601_v57 = vld [vmem:[%s8936_s8 + $0x1c0] sm:$0xff] }
 0x4d2   : > { %v5169_v38 = vadd.f32 %v5145_v11, %v11494_v22  ;;  %6065 = vmatpush.bf16.msra.mxu0 %v10594_v24 }
 0x4d3   : > { %v3880_v33 = vmul.f32 0.088388346, %v3853_v27  ;;  %v11495_v27 = vld [vmem:[#allocation36_spill] sm:$0xff] }
 0x4d4   : > { %6408 = vst.msk [vmem:[#allocation2 + $0xd8] sm:$0xff] %vm4161_vm13, %v5169_v38  ;;  %4891 = vmatmul.bf16.gmra.mxu1 %v10580_v46  ;;  %v10598_v40 = vpop.f32.mrf.mxu3 }
 0x4d5   : > { %4129 = vrot.lane.b32.xlu0 %v3880_v33, %s8419_s15  ;;  %v10616_v33 = vld [vmem:[%s8932_s6 + $0xf0] sm:$0xff] }
 0x4d6   : > { %6066 = vmatpush.bf16.msra.mxu0 %v10601_v57 }
 0x4d8   : > { %v3805_v61 = vpop.f32.mrf.mxu2 }
 0x4d9   : > { %v3855_v29 = vadd.f32 %v10453_v49, %v3805_v61  ;;  %v4419_v53 = vpop.f32.mrf.mxu1  ;;  %v5148_v36 = vpop.f32.mrf.mxu0 }
 0x4da   : > { %v7406_v1 = vpack.c.bf16 %v4419_v53, %v4417_v15  ;;  %v5170_v11 = vadd.f32 %v5148_v36, %v11495_v27  ;;  %v11496_v36 = vld [vmem:[#allocation37_spill] sm:$0xff] }
 0x4db   : > { %v3881_v22 = vmul.f32 0.088388346, %v3855_v29 }
 0x4dc   : > { %6409 = vst.msk [vmem:[#allocation2 + $0xe0] sm:$0xff] %vm4161_vm13, %v5170_v11  ;;  %5622 = vmatmul.bf16.gmra.mxu0 %v10327_v30  ;;  %v10618_v61 = vpop.f32.mrf.mxu3  ;;  %v4010_v11 = vpop.permute.xlu1 %4009 }
 0x4dd   : > { %7407 = vmatmul.msk.bf16.gmra.mxu2 %vm9306_vm2, %v7406_v1  ;;  %4131 = vrot.lane.b32.xlu0 %v3881_v22, %s8419_s15 }
 0x4df   : > { %v4072_v38 = vpop.permute.xlu0 %4071  ;;  %5051 = vmatmul.bf16.gmra.mxu3 %v10451_v62 }
 0x4e0   : > { %v10613_v49 = vsel %vm4178_vm14, %v10224_v43, %v4072_v38  ;;  %v3808_v15 = vpop.f32.mrf.mxu2  ;;  %v11497_v43 = vld [vmem:[#allocation38_spill] sm:$0xff] }
 0x4e1   : > { %v3858_v29 = vadd.f32 %v10478_v8, %v3808_v15  ;;  %v4422_v30 = vpop.f32.mrf.mxu1  ;;  %v5150_v53 = vpop.f32.mrf.mxu0  ;;  %v2459_v22 = vmul.f32 0.088388346, %v11497_v43 }
 0x4e2   : > { %v5171_v1 = vadd.f32 %v5150_v53, %v11496_v36 }
 0x4e3   : > { %v3882_v27 = vmul.f32 0.088388346, %v3858_v29  ;;  %v4174_v38 = vsel %vm4161_vm13, %v2459_v22, %v4010_v11  ;;  %v10645_v11 = vld [vmem:[%s8932_s6 + $0xf8] sm:$0xff]  ;;  %v11499_v22 = vld [vmem:[#allocation63_spill] sm:$0xff] }
 0x4e4   : > { %6410 = vst.msk [vmem:[#allocation2 + $0xe8] sm:$0xff] %vm4161_vm13, %v5171_v1  ;;  %4896 = vmatmul.bf16.gmra.mxu1 %v10616_v33  ;;  %v10631_v15 = vpop.f32.mrf.mxu3 }
 0x4e5   : > { %4133 = vrot.lane.b32.xlu1 %v3882_v27, %s8419_s15 }
 0x4e7   : > { %v4074_v19 = vpop.permute.xlu0 %4073 }
 0x4e8   : > { %v10629_v62 = vsel %vm4178_vm14, %v4174_v38, %v4074_v19  ;;  %v3810_v8 = vpop.f32.mrf.mxu2 }
 0x4e9   : > { %v3860_v29 = vadd.f32 %v10520_v5, %v3810_v8  ;;  %v4424_v53 = vpop.f32.mrf.mxu1  ;;  %v5153_v36 = vpop.f32.mrf.mxu0 }
 0x4ea   : > { %v7409_v1 = vpack.c.bf16 %v4424_v53, %v4422_v30  ;;  %v5172_v10 = vadd.f32 %v5153_v36, %v11498_v7 }
 0x4eb   : > { %v3883_v43 = vmul.f32 0.088388346, %v3860_v29 }
 0x4ec   : > { %6411 = vst.msk [vmem:[#allocation2 + $0xf0] sm:$0xff] %vm4161_vm13, %v5172_v10  ;;  %5627 = vmatmul.bf16.gmra.mxu0 %v10341_v23  ;;  %v10647_v30 = vpop.f32.mrf.mxu3 }
 0x4ed   : > { %7410 = vmatmul.msk.bf16.gmra.mxu2 %vm9323_vm7, %v7409_v1  ;;  %4135 = vrot.lane.b32.xlu0 %v3883_v43, %s8419_s15 }
 0x4ef   : > { %v4076_v19 = vpop.permute.xlu0 %4075  ;;  %5056 = vmatmul.bf16.gmra.mxu3 %v10518_v44 }
 0x4f0   : > { %v10642_v27 = vsel %vm4178_vm14, %v10315_v39, %v4076_v19  ;;  %v3813_v5 = vpop.f32.mrf.mxu2 }
 0x4f1   : > { %v3863_v10 = vadd.f32 %v10554_v58, %v3813_v5  ;;  %v4427_v23 = vpop.f32.mrf.mxu1  ;;  %v5155_v7 = vpop.f32.mrf.mxu0 }
 0x4f2   : > { %v5173_v38 = vadd.f32 %v5155_v7, %v11499_v22  ;;  %v10673_v22 = vld [vmem:[%s8932_s6 + $0x140] sm:$0xff] }
 0x4f3   : > { %v3884_v8 = vmul.f32 0.088388346, %v3863_v10  ;;  %v11500_v10 = vld [vmem:[#allocation67_spill] sm:$0xff] }
 0x4f4   : > { %6412 = vst.msk [vmem:[#allocation2 + $0xf8] sm:$0xff] %vm4161_vm13, %v5173_v38  ;;  %4901 = vmatmul.bf16.gmra.mxu1 %v10645_v11  ;;  %v10659_v53 = vpop.f32.mrf.mxu3 }
 0x4f5   : > { %4137 = vrot.lane.b32.xlu0 %v3884_v8, %s8419_s15 }
 0x4f7   : > { %v4078_v39 = vpop.permute.xlu0 %4077 }
 0x4f8   : > { %v10657_v29 = vsel %vm4178_vm14, %v10287_v3, %v4078_v39  ;;  %v3815_v44 = vpop.f32.mrf.mxu2 }
 0x4f9   : > { %v3865_v58 = vadd.f32 %v10582_v18, %v3815_v44  ;;  %v4429_v36 = vpop.f32.mrf.mxu1  ;;  %v5593_v1 = vpop.f32.mrf.mxu0 }
 0x4fa   : > { %v7412_v43 = vpack.c.bf16 %v4429_v36, %v4427_v23  ;;  %v5633_v19 = vadd.f32 %v5593_v1, %v10215_v60  ;;  %v4050_v1 = vpop.permute.xlu2 %4049 }
 0x4fb   : > { %v3885_v5 = vmul.f32 0.088388346, %v3865_v58  ;;  %v11501_v58 = vld [vmem:[#allocation10_spill] sm:$0xff] }
 0x4fc   : > { %6413 = vst.msk [vmem:[#allocation2 + $0x100] sm:$0xff] %vm4161_vm13, %v5633_v19  ;;  %6067 = vmatmul.bf16.vlgmr.msra.gmra.mxu0 %v11500_v10  ;;  %v10675_v23 = vpop.f32.mrf.mxu3  ;;  %v2447_v36 = vmul.f32 0.088388346, %v11501_v58 }
 0x4fd   : > { %7413 = vmatmul.msk.bf16.gmra.mxu2 %vm9342_vm11, %v7412_v43  ;;  %4139 = vrot.lane.b32.xlu0 %v3885_v5, %s8419_s15 }
 0x4ff   : > { %v4080_v3 = vpop.permute.xlu0 %4079  ;;  %5061 = vmatmul.bf16.gmra.mxu3 %v10580_v46 }
 0x500   : > { %v10670_v7 = vsel %vm4178_vm14, %v10344_v4, %v4080_v3  ;;  %v3818_v18 = vpop.f32.mrf.mxu2  ;;  %v4162_v4 = vsel %vm4161_vm13, %v2447_v36, %v10266_v31 }
 0x501   : > { %v3868_v60 = vadd.f32 %v10598_v40, %v3818_v18  ;;  %v4867_v38 = vpop.f32.mrf.mxu1  ;;  %v5595_v8 = vpop.f32.mrf.mxu0  ;;  %v4179_v46 = vsel %vm4178_vm14, %v4162_v4, %v4050_v1 }
 0x502   : > { %v5634_v39 = vadd.f32 %v5595_v8, %v10218_v6  ;;  %v11502_v8 = vld [vmem:[#allocation13_spill] sm:$0xff] }
 0x503   : > { %v3886_v44 = vmul.f32 0.088388346, %v3868_v60 }
 0x504   : > { %6414 = vst.msk [vmem:[#allocation2 + $0x108] sm:$0xff] %vm4161_vm13, %v5634_v39  ;;  %5341 = vmatmul.bf16.vlgmr.msra.gmra.mxu1 %v10673_v22  ;;  %v10689_v19 = vpop.f32.mrf.mxu3 }
 0x505   : > { %4141 = vrot.lane.b32.xlu0 %v3886_v44, %s8419_s15  ;;  %8128 = vmatpush.bf16.msra.mxu1 %v10497_v48 }
 0x507   : > { %v4114_v40 = vpop.permute.xlu0 %4113 }
 0x508   : > { %v4196_v6 = vsel %vm4195_vm0, %v4179_v46, %v4114_v40  ;;  %v3820_v43 = vpop.f32.mrf.mxu2  ;;  %v4054_v46 = vpop.permute.xlu2 %4053 }
 0x509   : > { %4212 = vst [vmem:[%s8930_s5] sm:$0xff] %v4196_v6  ;;  %v3870_v5 = vadd.f32 %v10618_v61, %v3820_v43  ;;  %v4869_v10 = vpop.f32.mrf.mxu1  ;;  %v5598_v3 = vpop.f32.mrf.mxu0  ;;  %8129 = vmatpush.bf16.msra.mxu1 %v10523_v63 }
 0x50a   : > { %v7559_v18 = vpack.c.bf16 %v4869_v10, %v4867_v38  ;;  %v5635_v31 = vadd.f32 %v5598_v3, %v10198_v0  ;;  %v10705_v0 = vld [vmem:[%s8932_s6 + $0x148] sm:$0xff]  ;;  %v11504_v3 = vld [vmem:[#allocation69_spill] sm:$0xff] }
 0x50b   : > { %v3887_v60 = vmul.f32 0.088388346, %v3870_v5 }
 0x50c   : > { %6415 = vst.msk [vmem:[#allocation2 + $0x110] sm:$0xff] %vm4161_vm13, %v5635_v31  ;;  %6072 = vmatmul.bf16.gmra.mxu0 %v11502_v8  ;;  %v10707_v44 = vpop.f32.mrf.mxu3  ;;  %v10744_v31 = vld [vmem:[%s8932_s6 + $0x150] sm:$0xff] }
 0x50d   : > { %7560 = vmatmul.msk.bf16.vlgmr.msrb.gmra.mxu2 %vm9225_vm3, %v7559_v18  ;;  %4143 = vrot.lane.b32.xlu0 %v3887_v60, %s8419_s15 }
 0x50e   : > { %5929 = vmatpush.bf16.msrb.mxu2 %v10497_v48  ;;  %8130 = vmatpush.bf16.msra.mxu1 %v10542_v42 }
 0x50f   : > { %v4116_v61 = vpop.permute.xlu0 %4115  ;;  %5066 = vmatmul.bf16.gmra.mxu3 %v10616_v33 }
 0x510   : > { %v4197_v38 = vsel %vm4195_vm0, %v10373_v55, %v4116_v61  ;;  %v4513_v39 = vpop.f32.mrf.mxu2  ;;  %v11503_v55 = vld [vmem:[#allocation14_spill] sm:$0xff] }
 0x511   : > { %4213 = vst [vmem:[%s8930_s5 + $0x8] sm:$0xff] %v4197_v38  ;;  %v10712_v58 = vadd.f32 %v10631_v15, %v4513_v39  ;;  %v4872_v36 = vpop.f32.mrf.mxu1  ;;  %v5600_v1 = vpop.f32.mrf.mxu0  ;;  %v2449_v4 = vmul.f32 0.088388346, %v11503_v55 }
 0x512   : > { %v5636_v48 = vadd.f32 %v5600_v1, %v10202_v20  ;;  %5930 = vmatpush.bf16.msrb.mxu2 %v10523_v63  ;;  %8131 = vmatpush.bf16.msra.mxu1 %v10557_v16  ;;  %v4058_v39 = vpop.permute.xlu2 %4057 }
 0x513   : > { %v4164_v33 = vsel %vm4161_vm13, %v2449_v4, %v10050_v14 }
 0x514   : > { %6416 = vst.msk [vmem:[#allocation2 + $0x118] sm:$0xff] %vm4161_vm13, %v5636_v48  ;;  %5346 = vmatmul.bf16.gmra.mxu1 %v10705_v0  ;;  %v4181_v20 = vsel %vm4178_vm14, %v4164_v33, %v4054_v46  ;;  %v10726_v6 = vpop.f32.mrf.mxu3 }
 0x516   : > { %5931 = vmatpush.bf16.msrb.mxu2 %v10542_v42  ;;  %8132 = vmatpush.bf16.msra.mxu1 %v10569_v50 }
 0x517   : > { %v4118_v15 = vpop.permute.xlu0 %4117 }
 0x518   : > { %v4198_v63 = vsel %vm4195_vm0, %v4181_v20, %v4118_v15  ;;  %v4515_v40 = vpop.f32.mrf.mxu2  ;;  %v10779_v15 = vld [vmem:[%s8932_s6 + $0x158] sm:$0xff] }
 0x519   : > { %4214 = vst [vmem:[%s8930_s5 + $0x10] sm:$0xff] %v4198_v63  ;;  %v10730_v43 = vadd.f32 %v10647_v30, %v4515_v40  ;;  %v4874_v5 = vpop.f32.mrf.mxu1  ;;  %v5603_v10 = vpop.f32.mrf.mxu0 }
 0x51a   : > { %v7562_v14 = vpack.c.bf16 %v4874_v5, %v4872_v36  ;;  %v5637_v42 = vadd.f32 %v5603_v10, %v10175_v54  ;;  %5932 = vmatpush.bf16.msrb.mxu2 %v10557_v16  ;;  %8133 = vmatpush.bf16.msra.mxu1 %v10585_v13  ;;  %v11507_v10 = vld [vmem:[#allocation24_spill] sm:$0xff] }
 0x51c   : > { %6417 = vst.msk [vmem:[#allocation2 + $0x120] sm:$0xff] %vm4161_vm13, %v5637_v42  ;;  %6077 = vmatmul.bf16.gmra.mxu0 %v11504_v3  ;;  %v10746_v16 = vpop.f32.mrf.mxu3  ;;  %v4062_v42 = vpop.permute.xlu2 %4061 }
 0x51d   : > { %7563 = vmatmul.msk.bf16.gmra.mxu2 %vm9239_vm6, %v7562_v14  ;;  %v2453_v14 = vmul.f32 0.088388346, %v11507_v10 }
 0x51e   : > { %5933 = vmatpush.bf16.msrb.mxu2 %v10569_v50  ;;  %8134 = vmatpush.bf16.msra.mxu1 %v10594_v24 }
 0x51f   : > { %v4120_v30 = vpop.permute.xlu0 %4119  ;;  %5071 = vmatmul.bf16.gmra.mxu3 %v10645_v11 }
 0x520   : > { %v4199_v18 = vsel %vm4195_vm0, %v10405_v26, %v4120_v30  ;;  %v4518_v54 = vpop.f32.mrf.mxu2  ;;  %v11505_v26 = vld [vmem:[#allocation19_spill] sm:$0xff] }
 0x521   : > { %4215 = vst [vmem:[%s8930_s5 + $0x18] sm:$0xff] %v4199_v18  ;;  %v10751_v60 = vadd.f32 %v10659_v53, %v4518_v54  ;;  %v4877_v8 = vpop.f32.mrf.mxu1  ;;  %v5605_v50 = vpop.f32.mrf.mxu0  ;;  %v2451_v38 = vmul.f32 0.088388346, %v11505_v26 }
 0x522   : > { %v5638_v61 = vadd.f32 %v5605_v50, %v10178_v51  ;;  %5934 = vmatpush.bf16.msrb.mxu2 %v10585_v13  ;;  %8135 = vmatpush.bf16.msra.mxu1 %v10601_v57 }
 0x523   : > { %v4166_v11 = vsel %vm4161_vm13, %v2451_v38, %v10492_v35 }
 0x524   : > { %6418 = vst.msk [vmem:[#allocation2 + $0x128] sm:$0xff] %vm4161_vm13, %v5638_v61  ;;  %5351 = vmatmul.bf16.gmra.mxu1 %v10744_v31  ;;  %v4183_v53 = vsel %vm4178_vm14, %v4166_v11, %v4058_v39  ;;  %v10764_v1 = vpop.f32.mrf.mxu3  ;;  %v11508_v61 = vld [vmem:[#allocation82_spill] sm:$0xff] }
 0x526   : > { %5935 = vmatpush.bf16.msrb.mxu2 %v10594_v24  ;;  %v11506_v24 = vld [vmem:[#allocation71_spill] sm:$0xff] }
 0x527   : > { %v4122_v36 = vpop.permute.xlu0 %4121 }
 0x528   : > { %v4200_v51 = vsel %vm4195_vm0, %v4183_v53, %v4122_v36  ;;  %v4520_v13 = vpop.f32.mrf.mxu2  ;;  %v10810_v53 = vld [vmem:[%s8932_s6 + $0x160] sm:$0xff] }
 0x529   : > { %4216 = vst [vmem:[%s8930_s5 + $0x20] sm:$0xff] %v4200_v51  ;;  %v10768_v48 = vadd.f32 %v10675_v23, %v4520_v13  ;;  %v4879_v55 = vpop.f32.mrf.mxu1  ;;  %v5608_v4 = vpop.f32.mrf.mxu0 }
 0x52a   : > { %v7565_v46 = vpack.c.bf16 %v4879_v55, %v4877_v8  ;;  %v5639_v35 = vadd.f32 %v5608_v4, %v10158_v25  ;;  %5936 = vmatpush.bf16.msrb.mxu2 %v10601_v57  ;;  %v11510_v55 = vld [vmem:[#allocation83_spill] sm:$0xff] }
 0x52c   : > { %6419 = vst.msk [vmem:[#allocation2 + $0x130] sm:$0xff] %vm4161_vm13, %v5639_v35  ;;  %6082 = vmatmul.bf16.gmra.mxu0 %v11506_v24  ;;  %v10781_v63 = vpop.f32.mrf.mxu3 }
 0x52d   : > { %7566 = vmatmul.msk.bf16.gmra.mxu2 %vm9251_vm9, %v7565_v46  ;;  %v4066_v46 = vpop.permute.xlu2 %4065 }
 0x52f   : > { %v4124_v33 = vpop.permute.xlu0 %4123  ;;  %5511 = vmatmul.bf16.vlgmr.msra.gmra.mxu3 %v10673_v22 }
 0x530   : > { %v4201_v20 = vsel %vm4195_vm0, %v10448_v47, %v4124_v33  ;;  %v4523_v23 = vpop.f32.mrf.mxu2  ;;  %v4168_v47 = vsel %vm4161_vm13, %v2453_v14, %v10537_v45  ;;  %v11509_v45 = vld [vmem:[#allocation73_spill] sm:$0xff]  ;;  %v11513_v14 = vld [vmem:[#allocation75_spill] sm:$0xff] }
 0x531   : > { %4217 = vst [vmem:[%s8930_s5 + $0x28] sm:$0xff] %v4201_v20  ;;  %v10786_v25 = vadd.f32 %v10689_v19, %v4523_v23  ;;  %v4882_v57 = vpop.f32.mrf.mxu1  ;;  %v5610_v40 = vpop.f32.mrf.mxu0  ;;  %v4185_v22 = vsel %vm4178_vm14, %v4168_v47, %v4062_v42 }
 0x532   : > { %v5640_v5 = vadd.f32 %v5610_v40, %v10162_v59 }
 0x534   : > { %6420 = vst.msk [vmem:[#allocation2 + $0x138] sm:$0xff] %vm4161_vm13, %v5640_v5  ;;  %5356 = vmatmul.bf16.gmra.mxu1 %v10779_v15  ;;  %v10796_v18 = vpop.f32.mrf.mxu3  ;;  %v11512_v5 = vld [vmem:[#allocation80_spill] sm:$0xff] }
 0x537   : > { %v4126_v3 = vpop.permute.xlu0 %4125 }
 0x538   : > { %v4202_v19 = vsel %vm4195_vm0, %v4185_v22, %v4126_v3  ;;  %v4525_v30 = vpop.f32.mrf.mxu2  ;;  %v10839_v3 = vld [vmem:[%s8932_s6 + $0x168] sm:$0xff] }
 0x539   : > { %4218 = vst [vmem:[%s8930_s5 + $0x30] sm:$0xff] %v4202_v19  ;;  %v10800_v59 = vadd.f32 %v10707_v44, %v4525_v30  ;;  %v4884_v54 = vpop.f32.mrf.mxu1  ;;  %v5613_v8 = vpop.f32.mrf.mxu0 }
 0x53a   : > { %v7568_v50 = vpack.c.bf16 %v4884_v54, %v4882_v57  ;;  %v5641_v26 = vadd.f32 %v5613_v8, %v11508_v61  ;;  %v11514_v8 = vld [vmem:[#allocation81_spill] sm:$0xff]  ;;  %v11515_v61 = vld [vmem:[#allocation34_spill] sm:$0xff] }
 0x53c   : > { %6421 = vst.msk [vmem:[#allocation2 + $0x140] sm:$0xff] %vm4161_vm13, %v5641_v26  ;;  %6087 = vmatmul.bf16.gmra.mxu0 %v11509_v45  ;;  %v10812_v44 = vpop.f32.mrf.mxu3  ;;  %v2457_v26 = vmul.f32 0.088388346, %v11515_v61  ;;  %v4070_v45 = vpop.permute.xlu2 %4069 }
 0x53d   : > { %7569 = vmatmul.msk.bf16.gmra.mxu2 %vm9266_vm12, %v7568_v50 }
 0x53f   : > { %v4128_v38 = vpop.permute.xlu0 %4127  ;;  %5516 = vmatmul.bf16.gmra.mxu3 %v10705_v0 }
 0x540   : > { %v4203_v39 = vsel %vm4195_vm0, %v10515_v2, %v4128_v38  ;;  %v4528_v11 = vpop.f32.mrf.mxu2  ;;  %v11511_v2 = vld [vmem:[#allocation79_spill] sm:$0xff] }
 0x541   : > { %4219 = vst [vmem:[%s8930_s5 + $0x38] sm:$0xff] %v4203_v39  ;;  %v10817_v36 = vadd.f32 %v10726_v6, %v4528_v11  ;;  %v4887_v51 = vpop.f32.mrf.mxu1  ;;  %v5615_v13 = vpop.f32.mrf.mxu0  ;;  %v4187_v35 = vsel %vm4178_vm14, %v11511_v2, %v4066_v46  ;;  %v11517_v2 = vld [vmem:[#allocation29_spill] sm:$0xff] }
 0x542   : > { %v5642_v4 = vadd.f32 %v5615_v13, %v11510_v55 }
 0x544   : > { %6422 = vst.msk [vmem:[#allocation2 + $0x148] sm:$0xff] %vm4161_vm13, %v5642_v4  ;;  %5361 = vmatmul.bf16.gmra.mxu1 %v10810_v53  ;;  %v10825_v20 = vpop.f32.mrf.mxu3 }
 0x547   : > { %v4130_v24 = vpop.permute.xlu0 %4129 }
 0x548   : > { %v4204_v0 = vsel %vm4195_vm0, %v4187_v35, %v4130_v24  ;;  %v4530_v33 = vpop.f32.mrf.mxu2  ;;  %v11518_v24 = vld [vmem:[#allocation76_spill] sm:$0xff] }
 0x549   : > { %4220 = vst [vmem:[%s8930_s5 + $0x40] sm:$0xff] %v4204_v0  ;;  %v10829_v6 = vadd.f32 %v10746_v16, %v4530_v33  ;;  %v4889_v23 = vpop.f32.mrf.mxu1  ;;  %v5618_v57 = vpop.f32.mrf.mxu0 }
 0x54a   : > { %v7571_v40 = vpack.c.bf16 %v4889_v23, %v4887_v51  ;;  %v5643_v10 = vadd.f32 %v5618_v57, %v11512_v5 }
 0x54c   : > { %6423 = vst.msk [vmem:[#allocation2 + $0x150] sm:$0xff] %vm4161_vm13, %v5643_v10  ;;  %6092 = vmatmul.bf16.gmra.mxu0 %v11513_v14  ;;  %v10841_v16 = vpop.f32.mrf.mxu3  ;;  %v11519_v14 = vld [vmem:[#allocation78_spill] sm:$0xff] }
 0x54d   : > { %7572 = vmatmul.msk.bf16.gmra.mxu2 %vm9285_vm15, %v7571_v40 }
 0x54f   : > { %v4132_v42 = vpop.permute.xlu0 %4131  ;;  %5521 = vmatmul.bf16.gmra.mxu3 %v10744_v31 }
 0x550   : > { %v4205_v47 = vsel %vm4195_vm0, %v10577_v32, %v4132_v42  ;;  %v4533_v22 = vpop.f32.mrf.mxu2  ;;  %v11516_v32 = vld [vmem:[#allocation54_spill] sm:$0xff] }
 0x551   : > { %4221 = vst [vmem:[%s8930_s5 + $0x48] sm:$0xff] %v4205_v47  ;;  %v10846_v19 = vadd.f32 %v10764_v1, %v4533_v22  ;;  %v4892_v30 = vpop.f32.mrf.mxu1  ;;  %v5620_v54 = vpop.f32.mrf.mxu0  ;;  %v4172_v38 = vsel %vm4161_vm13, %v2457_v26, %v11516_v32  ;;  %v10893_v32 = vld [vmem:[%s8932_s6 + $0x178] sm:$0xff] }
 0x552   : > { %v5644_v50 = vadd.f32 %v5620_v54, %v11514_v8  ;;  %v4189_v31 = vsel %vm4178_vm14, %v4172_v38, %v4070_v45 }
 0x554   : > { %6424 = vst.msk [vmem:[#allocation2 + $0x158] sm:$0xff] %vm4161_vm13, %v5644_v50  ;;  %5366 = vmatmul.bf16.gmra.mxu1 %v10839_v3  ;;  %v10856_v51 = vpop.f32.mrf.mxu3  ;;  %v11520_v50 = vld [vmem:[#allocation21_spill] sm:$0xff] }
 0x557   : > { %v4134_v39 = vpop.permute.xlu1 %4133 }
 0x558   : > { %v4206_v1 = vsel %vm4195_vm0, %v4189_v31, %v4134_v39  ;;  %v4535_v11 = vpop.f32.mrf.mxu2 }
 0x559   : > { %4222 = vst [vmem:[%s8930_s5 + $0x50] sm:$0xff] %v4206_v1  ;;  %v10860_v13 = vadd.f32 %v10781_v63, %v4535_v11  ;;  %v4894_v55 = vpop.f32.mrf.mxu1  ;;  %v5623_v4 = vpop.f32.mrf.mxu0  ;;  %v10870_v63 = vld [vmem:[%s8932_s6 + $0x170] sm:$0xff]  ;;  %v11521_v1 = vld [vmem:[#allocation15_spill] sm:$0xff] }
 0x55a   : > { %v7574_v46 = vpack.c.bf16 %v4894_v55, %v4892_v30  ;;  %v5645_v35 = vadd.f32 %v5623_v4, %v11517_v2 }
 0x55c   : > { %6425 = vst.msk [vmem:[#allocation2 + $0x160] sm:$0xff] %vm4161_vm13, %v5645_v35  ;;  %6097 = vmatmul.bf16.gmra.mxu0 %v11518_v24  ;;  %v4599_v57 = vpop.f32.mrf.mxu3 }
 0x55d   : > { %7575 = vmatmul.msk.bf16.gmra.mxu2 %vm9306_vm2, %v7574_v46 }
 0x55f   : > { %v4136_v0 = vpop.permute.xlu0 %4135  ;;  %5526 = vmatmul.bf16.gmra.mxu3 %v10779_v15 }
 0x560   : > { %v4207_v33 = vsel %vm4195_vm0, %v10613_v49, %v4136_v0  ;;  %v4538_v23 = vpop.f32.mrf.mxu2 }
 0x561   : > { %4223 = vst [vmem:[%s8930_s5 + $0x58] sm:$0xff] %v4207_v33  ;;  %v10875_v40 = vadd.f32 %v10796_v18, %v4538_v23  ;;  %v4897_v5 = vpop.f32.mrf.mxu1  ;;  %v5625_v10 = vpop.f32.mrf.mxu0  ;;  %v10916_v23 = vld [vmem:[%s8932_s6 + $0x1c0] sm:$0xff] }
 0x562   : > { %v5646_v42 = vadd.f32 %v5625_v10, %v11519_v14 }
 0x564   : > { %6426 = vst.msk [vmem:[#allocation2 + $0x168] sm:$0xff] %vm4161_vm13, %v5646_v42  ;;  %5371 = vmatmul.bf16.gmra.mxu1 %v10870_v63  ;;  %v5037_v15 = vpop.f32.mrf.mxu3 }
 0x567   : > { %v4138_v49 = vpop.permute.xlu0 %4137 }
 0x568   : > { %v4208_v47 = vsel %vm4195_vm0, %v10629_v62, %v4138_v49  ;;  %v4540_v22 = vpop.f32.mrf.mxu2 }
 0x569   : > { %4224 = vst [vmem:[%s8930_s5 + $0x60] sm:$0xff] %v4208_v47  ;;  %v10884_v18 = vadd.f32 %v10812_v44, %v4540_v22  ;;  %v4899_v30 = vpop.f32.mrf.mxu1  ;;  %v5628_v54 = vpop.f32.mrf.mxu0 }
 0x56a   : > { %v7577_v8 = vpack.c.bf16 %v4899_v30, %v4897_v5  ;;  %v5647_v61 = vadd.f32 %v5628_v54, %v11520_v50  ;;  %v11522_v30 = vld [vmem:[#allocation44_spill] sm:$0xff] }
 0x56c   : > { %6427 = vst.msk [vmem:[#allocation2 + $0x170] sm:$0xff] %vm4161_vm13, %v5647_v61  ;;  %v5039_v44 = vpop.f32.mrf.mxu3 }
 0x56d   : > { %7578 = vmatmul.msk.bf16.gmra.mxu2 %vm9323_vm7, %v7577_v8 }
 0x56f   : > { %v4140_v26 = vpop.permute.xlu0 %4139  ;;  %5531 = vmatmul.bf16.gmra.mxu3 %v10810_v53 }
 0x570   : > { %v4209_v62 = vsel %vm4195_vm0, %v10642_v27, %v4140_v26  ;;  %v4543_v45 = vpop.f32.mrf.mxu2  ;;  %v11523_v26 = vld [vmem:[#allocation40_spill] sm:$0xff] }
 0x571   : > { %4225 = vst [vmem:[%s8930_s5 + $0x68] sm:$0xff] %v4209_v62  ;;  %v10898_v38 = vadd.f32 %v10825_v20, %v4543_v45  ;;  %v4902_v31 = vpop.f32.mrf.mxu1  ;;  %v5630_v39 = vpop.f32.mrf.mxu0 }
 0x572   : > { %v5648_v11 = vadd.f32 %v5630_v39, %v11521_v1 }
 0x574   : > { %6428 = vst.msk [vmem:[#allocation2 + $0x178] sm:$0xff] %vm4161_vm13, %v5648_v11  ;;  %5376 = vmatmul.bf16.gmra.mxu1 %v10893_v32  ;;  %v5042_v53 = vpop.f32.mrf.mxu3 }
 0x577   : > { %v4142_v27 = vpop.permute.xlu0 %4141 }
 0x578   : > { %v4210_v55 = vsel %vm4195_vm0, %v10657_v29, %v4142_v27  ;;  %v4545_v4 = vpop.f32.mrf.mxu2 }
 0x579   : > { %4226 = vst [vmem:[%s8930_s5 + $0x70] sm:$0xff] %v4210_v55  ;;  %v10907_v20 = vadd.f32 %v10841_v16, %v4545_v4  ;;  %v4904_v46 = vpop.f32.mrf.mxu1  ;;  %v6068_v2 = vpop.f32.mrf.mxu0 }
 0x57a   : > { %v7580_v35 = vpack.c.bf16 %v4904_v46, %v4902_v31  ;;  %v6108_v24 = vadd.f32 %v6068_v2, %v10546_v21  ;;  %v10946_v2 = vld [vmem:[%s8932_s6 + $0x1d0] sm:$0xff] }
 0x57c   : > { %6429 = vst.msk [vmem:[#allocation2 + $0x180] sm:$0xff] %vm4161_vm13, %v6108_v24  ;;  %v5044_v5 = vpop.f32.mrf.mxu3 }
 0x57d   : > { %7581 = vmatmul.msk.bf16.gmra.mxu2 %vm9342_vm11, %v7580_v35 }
 0x57f   : > { %v4144_v0 = vpop.permute.xlu0 %4143  ;;  %5536 = vmatmul.bf16.gmra.mxu3 %v10839_v3 }
 0x580   : > { %v4211_v29 = vsel %vm4195_vm0, %v10670_v7, %v4144_v0  ;;  %v4548_v33 = vpop.f32.mrf.mxu2 }
 0x581   : > { %4227 = vst [vmem:[%s8930_s5 + $0x78] sm:$0xff] %v4211_v29  ;;  %v10921_v16 = vadd.f32 %v10856_v51, %v4548_v33  ;;  %v5342_v21 = vpop.f32.mrf.mxu1  ;;  %v6070_v10 = vpop.f32.mrf.mxu0  ;;  %v11525_v29 = vld [vmem:[#allocation43_spill] sm:$0xff] }
 0x582   : > { %v6109_v14 = vadd.f32 %v6070_v10, %v10549_v56  ;;  %v10933_v56 = vld [vmem:[%s8932_s6 + $0x1c8] sm:$0xff] }
 0x584   : > { %6430 = vst.msk [vmem:[#allocation2 + $0x188] sm:$0xff] %vm4161_vm13, %v6109_v14  ;;  %5816 = vmatmul.bf16.vlgmr.msrb.gmra.mxu1 %v10916_v23  ;;  %v5047_v42 = vpop.f32.mrf.mxu3 }
 0x588   : > { %v4550_v7 = vpop.f32.mrf.mxu2 }
 0x589   : > { %v10926_v49 = vadd.f32 %v4599_v57, %v4550_v7  ;;  %v5344_v47 = vpop.f32.mrf.mxu1  ;;  %v6073_v22 = vpop.f32.mrf.mxu0 }
 0x58a   : > { %v7727_v3 = vpack.c.bf16 %v5344_v47, %v5342_v21  ;;  %v6110_v54 = vadd.f32 %v6073_v22, %v11522_v30 }
 0x58c   : > { %6431 = vst.msk [vmem:[#allocation2 + $0x190] sm:$0xff] %vm4161_vm13, %v6110_v54  ;;  %v5049_v8 = vpop.f32.mrf.mxu3 }
 0x58d   : > { %7728 = vmatmul.msk.bf16.vlgmr.msra.gmra.mxu2 %vm9225_vm3, %v7727_v3 }
 0x58f   : > { %5541 = vmatmul.bf16.gmra.mxu3 %v10870_v63  ;;  %v11524_v63 = vld [vmem:[#allocation48_spill] sm:$0xff] }
 0x590   : > { %v4988_v51 = vpop.f32.mrf.mxu2 }
 0x591   : > { %v5038_v50 = vadd.f32 %v5037_v15, %v4988_v51  ;;  %v5347_v61 = vpop.f32.mrf.mxu1  ;;  %v6075_v57 = vpop.f32.mrf.mxu0  ;;  %v10959_v51 = vld [vmem:[%s8932_s6 + $0x1d8] sm:$0xff] }
 0x592   : > { %v6111_v62 = vadd.f32 %v6075_v57, %v11523_v26  ;;  %v11527_v26 = vld [vmem:[#allocation42_spill] sm:$0xff] }
 0x593   : > { %v5077_v45 = vmul.f32 0.088388346, %v5038_v50 }
 0x594   : > { %6432 = vst.msk [vmem:[#allocation2 + $0x198] sm:$0xff] %vm4161_vm13, %v6111_v62  ;;  %5821 = vmatmul.bf16.gmra.mxu1 %v10933_v56  ;;  %v5052_v39 = vpop.f32.mrf.mxu3 }
 0x595   : > { %6140 = vrot.lane.b32.xlu2 %v5077_v45, %s8417_s12 }
 0x598   : > { %v4990_v31 = vpop.f32.mrf.mxu2 }
 0x599   : > { %v5040_v1 = vadd.f32 %v5039_v44, %v4990_v31  ;;  %v5349_v11 = vpop.f32.mrf.mxu1  ;;  %v6078_v27 = vpop.f32.mrf.mxu0 }
 0x59a   : > { %v7730_v55 = vpack.c.bf16 %v5349_v11, %v5347_v61  ;;  %v6112_v15 = vadd.f32 %v6078_v27, %v11524_v63 }
 0x59b   : > { %v5078_v4 = vmul.f32 0.088388346, %v5040_v1 }
 0x59c   : > { %6433 = vst.msk [vmem:[#allocation2 + $0x1a0] sm:$0xff] %vm4161_vm13, %v6112_v15  ;;  %v5054_v35 = vpop.f32.mrf.mxu3 }
 0x59d   : > { %7731 = vmatmul.msk.bf16.gmra.mxu2 %vm9239_vm6, %v7730_v55  ;;  %6142 = vrot.lane.b32.xlu0 %v5078_v4, %s8417_s12 }
 0x59f   : > { %5546 = vmatmul.bf16.gmra.mxu3 %v10893_v32  ;;  %v11526_v32 = vld [vmem:[#allocation46_spill] sm:$0xff] }
 0x5a0   : > { %v4993_v46 = vpop.f32.mrf.mxu2 }
 0x5a1   : > { %v5043_v44 = vadd.f32 %v5042_v53, %v4993_v46  ;;  %v5352_v24 = vpop.f32.mrf.mxu1  ;;  %v6080_v0 = vpop.f32.mrf.mxu0  ;;  %v10972_v46 = vld [vmem:[%s8932_s6 + $0x1e0] sm:$0xff] }
 0x5a2   : > { %v6113_v33 = vadd.f32 %v6080_v0, %v11525_v29  ;;  %v11529_v29 = vld [vmem:[#allocation45_spill] sm:$0xff] }
 0x5a3   : > { %v5079_v21 = vmul.f32 0.088388346, %v5043_v44 }
 0x5a4   : > { %6434 = vst.msk [vmem:[#allocation2 + $0x1a8] sm:$0xff] %vm4161_vm13, %v6113_v33  ;;  %5826 = vmatmul.bf16.gmra.mxu1 %v10946_v2  ;;  %v5057_v14 = vpop.f32.mrf.mxu3 }
 0x5a5   : > { %6144 = vrot.lane.b32.xlu0 %v5079_v21, %s8417_s12 }
 0x5a8   : > { %v4995_v10 = vpop.f32.mrf.mxu2 }
 0x5a9   : > { %v5045_v7 = vadd.f32 %v5044_v5, %v4995_v10  ;;  %v5354_v47 = vpop.f32.mrf.mxu1  ;;  %v6083_v22 = vpop.f32.mrf.mxu0 }
 0x5aa   : > { %v7733_v3 = vpack.c.bf16 %v5354_v47, %v5352_v24  ;;  %v6114_v53 = vadd.f32 %v6083_v22, %v11526_v32 }
 0x5ab   : > { %v5080_v30 = vmul.f32 0.088388346, %v5045_v7 }
 0x5ac   : > { %6435 = vst.msk [vmem:[#allocation2 + $0x1b0] sm:$0xff] %vm4161_vm13, %v6114_v53  ;;  %v5059_v50 = vpop.f32.mrf.mxu3 }
 0x5ad   : > { %7734 = vmatmul.msk.bf16.gmra.mxu2 %vm9251_vm9, %v7733_v3  ;;  %6146 = vrot.lane.b32.xlu0 %v5080_v30, %s8417_s12 }
 0x5af   : > { %5986 = vmatmul.bf16.vlgmr.msrb.gmra.mxu3 %v10916_v23  ;;  %v11528_v23 = vld [vmem:[#allocation51_spill] sm:$0xff] }
 0x5b0   : > { %v4998_v54 = vpop.f32.mrf.mxu2 }
 0x5b1   : > { %v5048_v5 = vadd.f32 %v5047_v42, %v4998_v54  ;;  %v5357_v61 = vpop.f32.mrf.mxu1  ;;  %v6085_v57 = vpop.f32.mrf.mxu0  ;;  %v8109_v54 = vld [vmem:[%s8932_s6 + $0x1e8] sm:$0xff] }
 0x5b2   : > { %v6115_v62 = vadd.f32 %v6085_v57, %v11527_v26  ;;  %v11531_v26 = vld [vmem:[#allocation50_spill] sm:$0xff] }
 0x5b3   : > { %v5081_v45 = vmul.f32 0.088388346, %v5048_v5 }
 0x5b4   : > { %6436 = vst.msk [vmem:[#allocation2 + $0x1b8] sm:$0xff] %vm4161_vm13, %v6115_v62  ;;  %5831 = vmatmul.bf16.gmra.mxu1 %v10959_v51  ;;  %v5062_v1 = vpop.f32.mrf.mxu3 }
 0x5b5   : > { %6148 = vrot.lane.b32.xlu0 %v5081_v45, %s8417_s12 }
 0x5b8   : > { %v5000_v31 = vpop.f32.mrf.mxu2 }
 0x5b9   : > { %v5050_v11 = vadd.f32 %v5049_v8, %v5000_v31  ;;  %v5359_v27 = vpop.f32.mrf.mxu1  ;;  %v6088_v55 = vpop.f32.mrf.mxu0 }
 0x5ba   : > { %v7736_v63 = vpack.c.bf16 %v5359_v27, %v5357_v61  ;;  %v6116_v42 = vadd.f32 %v6088_v55, %v11528_v23 }
 0x5bb   : > { %v5082_v15 = vmul.f32 0.088388346, %v5050_v11 }
 0x5bc   : > { %6437 = vst.msk [vmem:[#allocation2 + $0x1c0] sm:$0xff] %vm4161_vm13, %v6116_v42  ;;  %v5064_v44 = vpop.f32.mrf.mxu3  ;;  %v11532_v42 = vld [vmem:[#allocation52_spill] sm:$0xff] }
 0x5bd   : > { %7737 = vmatmul.msk.bf16.gmra.mxu2 %vm9266_vm12, %v7736_v63  ;;  %6150 = vrot.lane.b32.xlu0 %v5082_v15, %s8417_s12 }
 0x5bf   : > { %5991 = vmatmul.bf16.gmra.mxu3 %v10933_v56  ;;  %v11530_v56 = vld [vmem:[#allocation47_spill] sm:$0xff] }
 0x5c0   : > { %v5003_v4 = vpop.f32.mrf.mxu2 }
 0x5c1   : > { %v5053_v8 = vadd.f32 %v5052_v39, %v5003_v4  ;;  %v5362_v24 = vpop.f32.mrf.mxu1  ;;  %v6090_v0 = vpop.f32.mrf.mxu0  ;;  %v8110_v4 = vld [vmem:[%s8932_s6 + $0x1f0] sm:$0xff] }
 0x5c2   : > { %v6117_v33 = vadd.f32 %v6090_v0, %v11529_v29  ;;  %v11533_v29 = vld [vmem:[#allocation53_spill] sm:$0xff] }
 0x5c3   : > { %v5083_v21 = vmul.f32 0.088388346, %v5053_v8 }
 0x5c4   : > { %6438 = vst.msk [vmem:[#allocation2 + $0x1c8] sm:$0xff] %vm4161_vm13, %v6117_v33  ;;  %5836 = vmatmul.bf16.gmra.mxu1 %v10972_v46  ;;  %v5067_v7 = vpop.f32.mrf.mxu3 }
 0x5c5   : > { %6152 = vrot.lane.b32.xlu0 %v5083_v21, %s8417_s12 }
 0x5c8   : > { %v5005_v10 = vpop.f32.mrf.mxu2 }
 0x5c9   : > { %v5055_v47 = vadd.f32 %v5054_v35, %v5005_v10  ;;  %v5364_v22 = vpop.f32.mrf.mxu1  ;;  %v6093_v3 = vpop.f32.mrf.mxu0 }
 0x5ca   : > { %v7739_v32 = vpack.c.bf16 %v5364_v22, %v5362_v24  ;;  %v6118_v39 = vadd.f32 %v6093_v3, %v11530_v56 }
 0x5cb   : > { %v5084_v53 = vmul.f32 0.088388346, %v5055_v47 }
 0x5cc   : > { %6439 = vst.msk [vmem:[#allocation2 + $0x1d0] sm:$0xff] %vm4161_vm13, %v6118_v39  ;;  %v5069_v5 = vpop.f32.mrf.mxu3 }
 0x5cd   : > { %7740 = vmatmul.msk.bf16.gmra.mxu2 %vm9285_vm15, %v7739_v32  ;;  %6154 = vrot.lane.b32.xlu1 %v5084_v53, %s8417_s12 }
 0x5cf   : > { %5996 = vmatmul.bf16.gmra.mxu3 %v10946_v2 }
 0x5d0   : > { %v5008_v30 = vpop.f32.mrf.mxu2 }
 0x5d1   : > { %v5058_v61 = vadd.f32 %v5057_v14, %v5008_v30  ;;  %v5367_v35 = vpop.f32.mrf.mxu1  ;;  %v6095_v57 = vpop.f32.mrf.mxu0 }
 0x5d2   : > { %v6119_v62 = vadd.f32 %v6095_v57, %v11531_v26 }
 0x5d3   : > { %v5085_v45 = vmul.f32 0.088388346, %v5058_v61 }
 0x5d4   : > { %6440 = vst.msk [vmem:[#allocation2 + $0x1d8] sm:$0xff] %vm4161_vm13, %v6119_v62  ;;  %5841 = vmatmul.bf16.gmra.mxu1 %v8109_v54  ;;  %v5072_v11 = vpop.f32.mrf.mxu3 }
 0x5d5   : > { %6156 = vrot.lane.b32.xlu0 %v5085_v45, %s8417_s12 }
 0x5d8   : > { %v5010_v31 = vpop.f32.mrf.mxu2 }
 0x5d9   : > { %v5060_v27 = vadd.f32 %v5059_v50, %v5010_v31  ;;  %v5369_v55 = vpop.f32.mrf.mxu1  ;;  %v6098_v63 = vpop.f32.mrf.mxu0 }
 0x5da   : > { %v7742_v23 = vpack.c.bf16 %v5369_v55, %v5367_v35  ;;  %v6120_v2 = vadd.f32 %v6098_v63, %v11532_v42  ;;  %v11534_v63 = vld [vmem:[#allocation77_spill] sm:$0xff] }
 0x5db   : > { %v5086_v14 = vmul.f32 0.088388346, %v5060_v27 }
 0x5dc   : > { %6441 = vst.msk [vmem:[#allocation2 + $0x1e0] sm:$0xff] %vm4161_vm13, %v6120_v2  ;;  %v5074_v8 = vpop.f32.mrf.mxu3 }
 0x5dd   : > { %7743 = vmatmul.msk.bf16.gmra.mxu2 %vm9306_vm2, %v7742_v23  ;;  %6158 = vrot.lane.b32.xlu1 %v5086_v14, %s8417_s12 }
 0x5df   : > { %6001 = vmatmul.bf16.gmra.mxu3 %v10959_v51 }
 0x5e0   : > { %v5013_v15 = vpop.f32.mrf.mxu2 }
 0x5e1   : > { %v5063_v24 = vadd.f32 %v5062_v1, %v5013_v15  ;;  %v5372_v50 = vpop.f32.mrf.mxu1  ;;  %v6100_v0 = vpop.f32.mrf.mxu0  ;;  %v8111_v1 = vld [vmem:[%s8932_s6 + $0x1f8] sm:$0xff] }
 0x5e2   : > { %v6121_v33 = vadd.f32 %v6100_v0, %v11533_v29 }
 0x5e3   : > { %v5087_v21 = vmul.f32 0.088388346, %v5063_v24 }
 0x5e4   : > { %6442 = vst.msk [vmem:[#allocation2 + $0x1e8] sm:$0xff] %vm4161_vm13, %v6121_v33  ;;  %5846 = vmatmul.bf16.gmra.mxu1 %v8110_v4  ;;  %v5512_v47 = vpop.f32.mrf.mxu3 }
 0x5e5   : > { %6160 = vrot.lane.b32.xlu0 %v5087_v21, %s8417_s12  ;;  %v4604_v21 = vmul.f32 0.088388346, %v10751_v60 }
 0x5e8   : > { %v5015_v10 = vpop.f32.mrf.mxu2 }
 0x5e9   : > { %v5065_v22 = vadd.f32 %v5064_v44, %v5015_v10  ;;  %v5374_v3 = vpop.f32.mrf.mxu1 }
 0x5ea   : > { %v7745_v32 = vpack.c.bf16 %v5374_v3, %v5372_v50 }
 0x5eb   : > { %v5088_v56 = vmul.f32 0.088388346, %v5065_v22 }
 0x5ec   : > { %v5514_v39 = vpop.f32.mrf.mxu3 }
 0x5ed   : > { %7746 = vmatmul.msk.bf16.gmra.mxu2 %vm9323_vm7, %v7745_v32  ;;  %6162 = vrot.lane.b32.xlu1 %v5088_v56, %s8417_s12 }
 0x5ef   : > { %6006 = vmatmul.bf16.gmra.mxu3 %v10972_v46 }
 0x5f0   : > { %v5018_v51 = vpop.f32.mrf.mxu2 }
 0x5f1   : > { %v5068_v53 = vadd.f32 %v5067_v7, %v5018_v51  ;;  %v5377_v30 = vpop.f32.mrf.mxu1 }
 0x5f3   : > { %v5089_v61 = vmul.f32 0.088388346, %v5068_v53 }
 0x5f4   : > { %5851 = vmatmul.bf16.gmra.mxu1 %v8111_v1  ;;  %v5517_v35 = vpop.f32.mrf.mxu3 }
 0x5f5   : > { %6164 = vrot.lane.b32.xlu0 %v5089_v61, %s8417_s12 }
 0x5f8   : > { %v5020_v44 = vpop.f32.mrf.mxu2 }
 0x5f9   : > { %v5070_v57 = vadd.f32 %v5069_v5, %v5020_v44  ;;  %v5379_v26 = vpop.f32.mrf.mxu1 }
 0x5fa   : > { %v7748_v62 = vpack.c.bf16 %v5379_v26, %v5377_v30 }
 0x5fb   : > { %v5090_v45 = vmul.f32 0.088388346, %v5070_v57  ;;  %v4606_v57 = vmul.f32 0.088388346, %v10786_v25 }
 0x5fc   : > { %v5519_v27 = vpop.f32.mrf.mxu3 }
 0x5fd   : > { %7749 = vmatmul.msk.bf16.gmra.mxu2 %vm9342_vm11, %v7748_v62  ;;  %6166 = vrot.lane.b32.xlu1 %v5090_v45, %s8417_s12 }
 0x5ff   : > { %6011 = vmatmul.bf16.gmra.mxu3 %v8109_v54  ;;  %v4603_v54 = vmul.f32 0.088388346, %v10730_v43 }
 0x600   : > { %v5023_v31 = vpop.f32.mrf.mxu2 }
 0x601   : > { %v5073_v46 = vadd.f32 %v5072_v11, %v5023_v31  ;;  %v5817_v7 = vpop.f32.mrf.mxu1 }
 0x603   : > { %v5091_v55 = vmul.f32 0.088388346, %v5073_v46 }
 0x604   : > { %6102 = vmatmul.bf16.vlgmr.msra.gmra.mxu1 %v11534_v63  ;;  %v5522_v5 = vpop.f32.mrf.mxu3 }
 0x605   : > { %6168 = vrot.lane.b32.xlu0 %v5091_v55, %s8417_s12 }
 0x608   : > { %v5025_v23 = vpop.f32.mrf.mxu2 }
 0x609   : > { %v5075_v42 = vadd.f32 %v5074_v8, %v5025_v23  ;;  %v5819_v2 = vpop.f32.mrf.mxu1 }
 0x60a   : > { %v7895_v14 = vpack.c.bf16 %v5819_v2, %v5817_v7 }
 0x60b   : > { %v5092_v15 = vmul.f32 0.088388346, %v5075_v42 }
 0x60c   : > { %v5524_v0 = vpop.f32.mrf.mxu3 }
 0x60d   : > { %7896 = vmatmul.msk.bf16.vlgmr.msrb.gmra.mxu2 %vm9225_vm3, %v7895_v14  ;;  %6170 = vrot.lane.b32.xlu1 %v5092_v15, %s8417_s12 }
 0x60f   : > { %v6143_v11 = vpop.permute.xlu0 %6142  ;;  %6016 = vmatmul.bf16.gmra.mxu3 %v8110_v4  ;;  %v4605_v4 = vmul.f32 0.088388346, %v10768_v48 }
 0x610   : > { %v11015_v24 = vsel %vm4161_vm13, %v4603_v54, %v6143_v11  ;;  %v5463_v50 = vpop.f32.mrf.mxu2 }
 0x611   : > { %v5513_v29 = vadd.f32 %v5512_v47, %v5463_v50  ;;  %v5822_v33 = vpop.f32.mrf.mxu1 }
 0x613   : > { %v5552_v8 = vmul.f32 0.088388346, %v5513_v29 }
 0x614   : > { %v5527_v43 = vpop.f32.mrf.mxu3 }
 0x615   : > { %6204 = vrot.lane.b32.xlu0 %v5552_v8, %s8418_s14 }
 0x617   : > { %v6145_v17 = vpop.permute.xlu0 %6144 }
 0x618   : > { %v11020_v10 = vsel %vm4161_vm13, %v4604_v21, %v6145_v17  ;;  %v5465_v22 = vpop.f32.mrf.mxu2 }
 0x619   : > { %v5515_v3 = vadd.f32 %v5514_v39, %v5465_v22  ;;  %v5824_v32 = vpop.f32.mrf.mxu1 }
 0x61a   : > { %v7898_v56 = vpack.c.bf16 %v5824_v32, %v5822_v33 }
 0x61b   : > { %v5553_v51 = vmul.f32 0.088388346, %v5515_v3 }
 0x61c   : > { %v5529_v30 = vpop.f32.mrf.mxu3 }
 0x61d   : > { %7899 = vmatmul.msk.bf16.gmra.mxu2 %vm9239_vm6, %v7898_v56  ;;  %6206 = vrot.lane.b32.xlu1 %v5553_v51, %s8418_s14 }
 0x61f   : > { %v6147_v47 = vpop.permute.xlu0 %6146  ;;  %6021 = vmatmul.bf16.gmra.mxu3 %v8111_v1  ;;  %v4607_v1 = vmul.f32 0.088388346, %v10800_v59 }
 0x620   : > { %v11027_v60 = vsel %vm4161_vm13, %v4605_v4, %v6147_v47  ;;  %v5468_v53 = vpop.f32.mrf.mxu2 }
 0x621   : > { %v5518_v61 = vadd.f32 %v5517_v35, %v5468_v53  ;;  %v5827_v44 = vpop.f32.mrf.mxu1 }
 0x623   : > { %v5554_v39 = vmul.f32 0.088388346, %v5518_v61 }
 0x624   : > { %v5532_v48 = vpop.f32.mrf.mxu3 }
 0x625   : > { %6208 = vrot.lane.b32.xlu0 %v5554_v39, %s8418_s14 }
 0x627   : > { %v6149_v28 = vpop.permute.xlu0 %6148 }
 0x628   : > { %v11032_v26 = vsel %vm4161_vm13, %v4606_v57, %v6149_v28  ;;  %v5470_v62 = vpop.f32.mrf.mxu2 }
 0x629   : > { %v5520_v45 = vadd.f32 %v5519_v27, %v5470_v62  ;;  %v5829_v31 = vpop.f32.mrf.mxu1  ;;  %v4608_v27 = vmul.f32 0.088388346, %v10817_v36  ;;  %v4612_v62 = vmul.f32 0.088388346, %v10875_v40 }
 0x62a   : > { %v7901_v46 = vpack.c.bf16 %v5829_v31, %v5827_v44 }
 0x62b   : > { %v5555_v7 = vmul.f32 0.088388346, %v5520_v45 }
 0x62c   : > { %v5534_v63 = vpop.f32.mrf.mxu3 }
 0x62d   : > { %7902 = vmatmul.msk.bf16.gmra.mxu2 %vm9251_vm9, %v7901_v46  ;;  %6210 = vrot.lane.b32.xlu1 %v5555_v7, %s8418_s14 }
 0x62f   : > { %v6151_v35 = vpop.permute.xlu0 %6150 }
 0x630   : > { %v11039_v25 = vsel %vm4161_vm13, %v4607_v1, %v6151_v35  ;;  %v5473_v55 = vpop.f32.mrf.mxu2 }
 0x631   : > { %v5523_v23 = vadd.f32 %v5522_v5, %v5473_v55  ;;  %v5832_v42 = vpop.f32.mrf.mxu1  ;;  %v4609_v5 = vmul.f32 0.088388346, %v10829_v6 }
 0x633   : > { %v5556_v2 = vmul.f32 0.088388346, %v5523_v23 }
 0x634   : > { %v5537_v54 = vpop.f32.mrf.mxu3 }
 0x635   : > { %6212 = vrot.lane.b32.xlu0 %v5556_v2, %s8418_s14 }
 0x637   : > { %v6153_v14 = vpop.permute.xlu0 %6152 }
 0x638   : > { %v11044_v34 = vsel %vm4161_vm13, %v4608_v27, %v6153_v14  ;;  %v5475_v15 = vpop.f32.mrf.mxu2 }
 0x639   : > { %v5525_v59 = vadd.f32 %v5524_v0, %v5475_v15  ;;  %v5834_v11 = vpop.f32.mrf.mxu1  ;;  %v4610_v0 = vmul.f32 0.088388346, %v10846_v19 }
 0x63a   : > { %v7904_v50 = vpack.c.bf16 %v5834_v11, %v5832_v42 }
 0x63b   : > { %v5557_v29 = vmul.f32 0.088388346, %v5525_v59 }
 0x63c   : > { %v5539_v21 = vpop.f32.mrf.mxu3 }
 0x63d   : > { %7905 = vmatmul.msk.bf16.gmra.mxu2 %vm9266_vm12, %v7904_v50  ;;  %6214 = vrot.lane.b32.xlu2 %v5557_v29, %s8418_s14 }
 0x63f   : > { %v6155_v33 = vpop.permute.xlu1 %6154 }
 0x640   : > { %v11051_v36 = vsel %vm4161_vm13, %v4609_v5, %v6155_v33  ;;  %v5478_v8 = vpop.f32.mrf.mxu2 }
 0x641   : > { %v5528_v17 = vadd.f32 %v5527_v43, %v5478_v8  ;;  %v5837_v22 = vpop.f32.mrf.mxu1  ;;  %v4611_v43 = vmul.f32 0.088388346, %v10860_v13 }
 0x643   : > { %v5558_v3 = vmul.f32 0.088388346, %v5528_v17 }
 0x644   : > { %v5542_v47 = vpop.f32.mrf.mxu3 }
 0x645   : > { %6216 = vrot.lane.b32.xlu1 %v5558_v3, %s8418_s14 }
 0x647   : > { %v6157_v32 = vpop.permute.xlu0 %6156 }
 0x648   : > { %v11056_v41 = vsel %vm4161_vm13, %v4610_v0, %v6157_v32  ;;  %v5480_v56 = vpop.f32.mrf.mxu2 }
 0x649   : > { %v5530_v51 = vadd.f32 %v5529_v30, %v5480_v56  ;;  %v5839_v6 = vpop.f32.mrf.mxu1 }
 0x64a   : > { %v7907_v4 = vpack.c.bf16 %v5839_v6, %v5837_v22 }
 0x64b   : > { %v5559_v53 = vmul.f32 0.088388346, %v5530_v51 }
 0x64c   : > { %v5544_v30 = vpop.f32.mrf.mxu3 }
 0x64d   : > { %7908 = vmatmul.msk.bf16.gmra.mxu2 %vm9285_vm15, %v7907_v4  ;;  %6218 = vrot.lane.b32.xlu0 %v5559_v53, %s8418_s14 }
 0x64f   : > { %v6159_v61 = vpop.permute.xlu1 %6158 }
 0x650   : > { %v11063_v19 = vsel %vm4161_vm13, %v4611_v43, %v6159_v61  ;;  %v5483_v44 = vpop.f32.mrf.mxu2 }
 0x651   : > { %v5533_v39 = vadd.f32 %v5532_v48, %v5483_v44  ;;  %v5842_v57 = vpop.f32.mrf.mxu1  ;;  %v4613_v48 = vmul.f32 0.088388346, %v10884_v18 }
 0x653   : > { %v5560_v28 = vmul.f32 0.088388346, %v5533_v39  ;;  %v11535_v39 = vld [vmem:[#allocation35_spill] sm:$0xff] }
 0x654   : > { %v5547_v35 = vpop.f32.mrf.mxu3 }
 0x655   : > { %6220 = vrot.lane.b32.xlu2 %v5560_v28, %s8418_s14 }
 0x657   : > { %v6161_v45 = vpop.permute.xlu0 %6160 }
 0x658   : > { %v11068_v9 = vsel %vm4161_vm13, %v4612_v62, %v6161_v45  ;;  %v5485_v31 = vpop.f32.mrf.mxu2 }
 0x659   : > { %v5535_v46 = vadd.f32 %v5534_v63, %v5485_v31  ;;  %v5844_v13 = vpop.f32.mrf.mxu1  ;;  %v4614_v63 = vmul.f32 0.088388346, %v10898_v38  ;;  %v11536_v31 = vld [vmem:[#allocation32_spill] sm:$0xff] }
 0x65a   : > { %v7910_v7 = vpack.c.bf16 %v5844_v13, %v5842_v57  ;;  %v11107_v13 = vpop.permute.xlu2 %6140 }
 0x65b   : > { %v5561_v1 = vmul.f32 0.088388346, %v5535_v46 }
 0x65c   : > { %v5549_v59 = vpop.f32.mrf.mxu3 }
 0x65d   : > { %7911 = vmatmul.msk.bf16.gmra.mxu2 %vm9306_vm2, %v7910_v7  ;;  %6222 = vrot.lane.b32.xlu1 %v5561_v1, %s8418_s14 }
 0x65f   : > { %v6163_v55 = vpop.permute.xlu1 %6162 }
 0x660   : > { %v11075_v40 = vsel %vm4161_vm13, %v4613_v48, %v6163_v55  ;;  %v5488_v23 = vpop.f32.mrf.mxu2 }
 0x661   : > { %v5538_v42 = vadd.f32 %v5537_v54, %v5488_v23  ;;  %v5847_v2 = vpop.f32.mrf.mxu1  ;;  %v4615_v54 = vmul.f32 0.088388346, %v10907_v20 }
 0x663   : > { %v5562_v27 = vmul.f32 0.088388346, %v5538_v42 }
 0x664   : > { %v5987_v22 = vpop.f32.mrf.mxu3 }
 0x665   : > { %6224 = vrot.lane.b32.xlu0 %v5562_v27, %s8418_s14 }
 0x667   : > { %v6165_v14 = vpop.permute.xlu0 %6164 }
 0x668   : > { %v11080_v37 = vsel %vm4161_vm13, %v4614_v63, %v6165_v14  ;;  %v5490_v15 = vpop.f32.mrf.mxu2 }
 0x669   : > { %v5540_v18 = vadd.f32 %v5539_v21, %v5490_v15  ;;  %v5849_v11 = vpop.f32.mrf.mxu1  ;;  %v4616_v21 = vmul.f32 0.088388346, %v10921_v16 }
 0x66a   : > { %v7913_v50 = vpack.c.bf16 %v5849_v11, %v5847_v2 }
 0x66b   : > { %v5563_v29 = vmul.f32 0.088388346, %v5540_v18 }
 0x66c   : > { %v5989_v4 = vpop.f32.mrf.mxu3 }
 0x66d   : > { %7914 = vmatmul.msk.bf16.gmra.mxu2 %vm9323_vm7, %v7913_v50  ;;  %6226 = vrot.lane.b32.xlu2 %v5563_v29, %s8418_s14 }
 0x66f   : > { %v6167_v5 = vpop.permute.xlu1 %6166 }
 0x670   : > { %v11087_v38 = vsel %vm4161_vm13, %v4615_v54, %v6167_v5  ;;  %v5493_v33 = vpop.f32.mrf.mxu2 }
 0x671   : > { %v5543_v8 = vadd.f32 %v5542_v47, %v5493_v33  ;;  %v5852_v17 = vpop.f32.mrf.mxu1  ;;  %v4617_v47 = vmul.f32 0.088388346, %v10926_v49 }
 0x673   : > { %v5564_v3 = vmul.f32 0.088388346, %v5543_v8 }
 0x674   : > { %v5992_v12 = vpop.f32.mrf.mxu3 }
 0x675   : > { %6228 = vrot.lane.b32.xlu1 %v5564_v3, %s8418_s14 }
 0x677   : > { %v6169_v0 = vpop.permute.xlu0 %6168 }
 0x678   : > { %v11092_v52 = vsel %vm4161_vm13, %v4616_v21, %v6169_v0  ;;  %v5495_v32 = vpop.f32.mrf.mxu2 }
 0x679   : > { %v5545_v56 = vadd.f32 %v5544_v30, %v5495_v32  ;;  %v5854_v20 = vpop.f32.mrf.mxu1 }
 0x67a   : > { %v7916_v51 = vpack.c.bf16 %v5854_v20, %v5852_v17 }
 0x67b   : > { %v5565_v6 = vmul.f32 0.088388346, %v5545_v56 }
 0x67c   : > { %v5994_v1 = vpop.f32.mrf.mxu3 }
 0x67d   : > { %7917 = vmatmul.msk.bf16.gmra.mxu2 %vm9342_vm11, %v7916_v51  ;;  %6230 = vrot.lane.b32.xlu0 %v5565_v6, %s8418_s14 }
 0x67f   : > { %v6171_v53 = vpop.permute.xlu1 %6170 }
 0x680   : > { %v11099_v16 = vsel %vm4161_vm13, %v4617_v47, %v6171_v53  ;;  %v5498_v43 = vpop.f32.mrf.mxu2 }
 0x681   : > { %v5548_v61 = vadd.f32 %v5547_v35, %v5498_v43  ;;  %v6103_v44 = vpop.f32.mrf.mxu1 }
 0x682   : > { %v6122_v57 = vadd.f32 %v6103_v44, %v11535_v39 }
 0x683   : > { %v5566_v28 = vmul.f32 0.088388346, %v5548_v61 }
 0x684   : > { %6443 = vst.msk [vmem:[#allocation2 + $0x1f0] sm:$0xff] %vm4161_vm13, %v6122_v57  ;;  %v5997_v27 = vpop.f32.mrf.mxu3 }
 0x685   : > { %6232 = vrot.lane.b32.xlu2 %v5566_v28, %s8418_s14 }
 0x688   : > { %v5500_v30 = vpop.f32.mrf.mxu2 }
 0x689   : > { %v5550_v62 = vadd.f32 %v5549_v59, %v5500_v30  ;;  %v6105_v45 = vpop.f32.mrf.mxu1 }
 0x68a   : > { %v6123_v49 = vadd.f32 %v6105_v45, %v11536_v31 }
 0x68b   : > { %v5567_v46 = vmul.f32 0.088388346, %v5550_v62 }
 0x68c   : > { %6444 = vst.msk [vmem:[#allocation2 + $0x1f8] sm:$0xff] %vm4161_vm13, %v6123_v49  ;;  %v5999_v18 = vpop.f32.mrf.mxu3 }
 0x68d   : > { %6234 = vrot.lane.b32.xlu1 %v5567_v46, %s8418_s14 }
 0x68f   : > { %v6207_v3 = vpop.permute.xlu1 %6206 }
 0x690   : > { %v5938_v7 = vpop.f32.mrf.mxu2 }
 0x691   : > { %v5988_v48 = vadd.f32 %v5987_v22, %v5938_v7  ;;  %v11122_v22 = vpop.permute.xlu0 %6204 }
 0x693   : > { %v6027_v35 = vmul.f32 0.088388346, %v5988_v48 }
 0x694   : > { %v6002_v54 = vpop.f32.mrf.mxu3 }
 0x695   : > { %6268 = vrot.lane.b32.xlu0 %v6027_v35, %s8419_s15 }
 0x697   : > { %v6215_v55 = vpop.permute.xlu2 %6214 }
 0x698   : > { %v11112_v23 = vsel %vm4178_vm14, %v11039_v25, %v6215_v55  ;;  %v5940_v42 = vpop.f32.mrf.mxu2 }
 0x699   : > { %v5990_v2 = vadd.f32 %v5989_v4, %v5940_v42  ;;  %v11125_v20 = vpop.permute.xlu0 %6208 }
 0x69b   : > { %v6028_v63 = vmul.f32 0.088388346, %v5990_v2 }
 0x69c   : > { %v6004_v0 = vpop.f32.mrf.mxu3 }
 0x69d   : > { %6270 = vrot.lane.b32.xlu2 %v6028_v63, %s8419_s15 }
 0x69f   : > { %v11127_v51 = vpop.permute.xlu1 %6210 }
 0x6a0   : > { %v5943_v14 = vpop.f32.mrf.mxu2 }
 0x6a1   : > { %v5993_v15 = vadd.f32 %v5992_v12, %v5943_v14 }
 0x6a3   : > { %v6029_v59 = vmul.f32 0.088388346, %v5993_v15 }
 0x6a4   : > { %v6007_v4 = vpop.f32.mrf.mxu3 }
 0x6a5   : > { %6272 = vrot.lane.b32.xlu1 %v6029_v59, %s8419_s15 }
 0x6a7   : > { %v11130_v53 = vpop.permute.xlu0 %6212 }
 0x6a8   : > { %v5945_v11 = vpop.f32.mrf.mxu2 }
 0x6a9   : > { %v5995_v50 = vadd.f32 %v5994_v1, %v5945_v11 }
 0x6ab   : > { %v6030_v29 = vmul.f32 0.088388346, %v5995_v50 }
 0x6ac   : > { %v6009_v12 = vpop.f32.mrf.mxu3 }
 0x6ad   : > { %6274 = vrot.lane.b32.xlu0 %v6030_v29, %s8419_s15 }
 0x6af   : > { %v6221_v25 = vpop.permute.xlu2 %6220 }
 0x6b0   : > { %v11119_v5 = vsel %vm4178_vm14, %v11056_v41, %v6221_v25  ;;  %v5948_v33 = vpop.f32.mrf.mxu2 }
 0x6b1   : > { %v5998_v8 = vadd.f32 %v5997_v27, %v5948_v33 }
 0x6b3   : > { %v6031_v17 = vmul.f32 0.088388346, %v5998_v8 }
 0x6b5   : > { %6276 = vrot.lane.b32.xlu2 %v6031_v17, %s8419_s15 }
 0x6b7   : > { %v11132_v43 = vpop.permute.xlu1 %6216 }
 0x6b8   : > { %v5950_v21 = vpop.f32.mrf.mxu2 }
 0x6b9   : > { %v6000_v32 = vadd.f32 %v5999_v18, %v5950_v21 }
 0x6bb   : > { %v6032_v56 = vmul.f32 0.088388346, %v6000_v32 }
 0x6bd   : > { %6278 = vrot.lane.b32.xlu1 %v6032_v56, %s8419_s15 }
 0x6bf   : > { %v11139_v30 = vpop.permute.xlu0 %6218 }
 0x6c0   : > { %v5953_v41 = vpop.f32.mrf.mxu2 }
 0x6c1   : > { %v6003_v6 = vadd.f32 %v6002_v54, %v5953_v41 }
 0x6c3   : > { %v6033_v47 = vmul.f32 0.088388346, %v6003_v6 }
 0x6c5   : > { %6280 = vrot.lane.b32.xlu0 %v6033_v47, %s8419_s15 }
 0x6c7   : > { %v6227_v61 = vpop.permute.xlu2 %6226 }
 0x6c8   : > { %v11136_v44 = vsel %vm4178_vm14, %v11075_v40, %v6227_v61  ;;  %v5955_v39 = vpop.f32.mrf.mxu2  ;;  %v6012_v40 = vpop.f32.mrf.mxu3 }
 0x6c9   : > { %v6005_v57 = vadd.f32 %v6004_v0, %v5955_v39 }
 0x6cb   : > { %v6034_v28 = vmul.f32 0.088388346, %v6005_v57 }
 0x6cd   : > { %6282 = vrot.lane.b32.xlu2 %v6034_v28, %s8419_s15 }
 0x6cf   : > { %v6223_v62 = vpop.permute.xlu1 %6222 }
 0x6d0   : > { %v11143_v45 = vsel %vm4178_vm14, %v11063_v19, %v6223_v62  ;;  %v5958_v31 = vpop.f32.mrf.mxu2  ;;  %v6014_v27 = vpop.f32.mrf.mxu3 }
 0x6d1   : > { %v6008_v49 = vadd.f32 %v6007_v4, %v5958_v31 }
 0x6d3   : > { %v6035_v46 = vmul.f32 0.088388346, %v6008_v49  ;;  %v6334_v49 = vsel %vm4178_vm14, %v11020_v10, %v11125_v20 }
 0x6d5   : > { %6284 = vrot.lane.b32.xlu1 %v6035_v46, %s8419_s15 }
 0x6d7   : > { %v6225_v7 = vpop.permute.xlu0 %6224 }
 0x6d8   : > { %v11148_v1 = vsel %vm4178_vm14, %v11068_v9, %v6225_v7  ;;  %v5960_v48 = vpop.f32.mrf.mxu2  ;;  %v6017_v11 = vpop.f32.mrf.mxu3  ;;  %v6335_v7 = vsel %vm4178_vm14, %v11027_v60, %v11127_v51  ;;  %v6338_v60 = vsel %vm4178_vm14, %v11044_v34, %v11132_v43 }
 0x6d9   : > { %v6010_v35 = vadd.f32 %v6009_v12, %v5960_v48 }
 0x6db   : > { %v6036_v55 = vmul.f32 0.088388346, %v6010_v35 }
 0x6dd   : > { %6286 = vrot.lane.b32.xlu0 %v6036_v55, %s8419_s15 }
 0x6df   : > { %v6233_v42 = vpop.permute.xlu2 %6232 }
 0x6e0   : > { %v11153_v19 = vsel %vm4178_vm14, %v11092_v52, %v6233_v42  ;;  %v5963_v2 = vpop.f32.mrf.mxu2  ;;  %v6019_v8 = vpop.f32.mrf.mxu3 }
 0x6e1   : > { %v6013_v63 = vadd.f32 %v6012_v40, %v5963_v2 }
 0x6e3   : > { %v6037_v14 = vmul.f32 0.088388346, %v6013_v63 }
 0x6e5   : > { %6288 = vrot.lane.b32.xlu2 %v6037_v14, %s8419_s15 }
 0x6e7   : > { %v6229_v15 = vpop.permute.xlu1 %6228 }
 0x6e8   : > { %v11158_v9 = vsel %vm4178_vm14, %v11080_v37, %v6229_v15  ;;  %v5965_v59 = vpop.f32.mrf.mxu2  ;;  %v6333_v37 = vsel %vm4178_vm14, %v11015_v24, %v6207_v3  ;;  %v4602_v24 = vmul.f32 0.088388346, %v10712_v58  ;;  %v6336_v58 = vsel %vm4178_vm14, %v11032_v26, %v11130_v53 }
 0x6e9   : > { %v6015_v18 = vadd.f32 %v6014_v27, %v5965_v59  ;;  %v6339_v53 = vsel %vm4178_vm14, %v11051_v36, %v11139_v30 }
 0x6ea   : > { %v6316_v3 = vsel %vm4161_vm13, %v4602_v24, %v11107_v13 }
 0x6eb   : > { %v6038_v50 = vmul.f32 0.088388346, %v6015_v18  ;;  %v6332_v39 = vsel %vm4178_vm14, %v6316_v3, %v11122_v22 }
 0x6ed   : > { %6290 = vrot.lane.b32.xlu1 %v6038_v50, %s8419_s15 }
 0x6ef   : > { %v6231_v52 = vpop.permute.xlu0 %6230 }
 0x6f0   : > { %v11163_v29 = vsel %vm4178_vm14, %v11087_v38, %v6231_v52  ;;  %v5968_v54 = vpop.f32.mrf.mxu2  ;;  %v6022_v38 = vpop.f32.mrf.mxu3 }
 0x6f1   : > { %v6018_v25 = vadd.f32 %v6017_v11, %v5968_v54 }
 0x6f3   : > { %v6039_v33 = vmul.f32 0.088388346, %v6018_v25 }
 0x6f5   : > { %6292 = vrot.lane.b32.xlu0 %v6039_v33, %s8419_s15 }
 0x6f7   : > { %v6271_v17 = vpop.permute.xlu2 %6270 }
 0x6f8   : > { %v6349_v21 = vsel %vm4195_vm0, %v6333_v37, %v6271_v17  ;;  %v5970_v0 = vpop.f32.mrf.mxu2  ;;  %v6024_v28 = vpop.f32.mrf.mxu3 }
 0x6f9   : > { %7919 = vst [vmem:[%s8930_s5 + $0x88] sm:$0xff] %v6349_v21  ;;  %v6020_v32 = vadd.f32 %v6019_v8, %v5970_v0 }
 0x6fb   : > { %v6040_v56 = vmul.f32 0.088388346, %v6020_v32 }
 0x6fd   : > { %6294 = vrot.lane.b32.xlu2 %v6040_v56, %s8419_s15 }
 0x6ff   : > { %v6235_v41 = vpop.permute.xlu1 %6234 }
 0x700   : > { %v6347_v6 = vsel %vm4178_vm14, %v11099_v16, %v6235_v41  ;;  %v5973_v4 = vpop.f32.mrf.mxu2 }
 0x701   : > { %v6023_v47 = vadd.f32 %v6022_v38, %v5973_v4 }
 0x703   : > { %v6041_v61 = vmul.f32 0.088388346, %v6023_v47 }
 0x705   : > { %6296 = vrot.lane.b32.xlu1 %v6041_v61, %s8419_s15 }
 0x707   : > { %v6269_v57 = vpop.permute.xlu0 %6268 }
 0x708   : > { %v6348_v12 = vsel %vm4195_vm0, %v6332_v39, %v6269_v57  ;;  %v5975_v16 = vpop.f32.mrf.mxu2 }
 0x709   : > { %7918 = vst [vmem:[%s8930_s5 + $0x80] sm:$0xff] %v6348_v12  ;;  %v6025_v62 = vadd.f32 %v6024_v28, %v5975_v16 }
 0x70b   : > { %v6042_v31 = vmul.f32 0.088388346, %v6025_v62 }
 0x70d   : > { %6298 = vrot.lane.b32.xlu0 %v6042_v31, %s8419_s15 }
 0x70f   : > { %v6277_v13 = vpop.permute.xlu2 %6276 }
 0x710   : > { %v6352_v22 = vsel %vm4195_vm0, %v6336_v58, %v6277_v13 }
 0x711   : > { %7922 = vst [vmem:[%s8930_s5 + $0xa0] sm:$0xff] %v6352_v22 }
 0x717   : > { %v6273_v46 = vpop.permute.xlu1 %6272 }
 0x718   : > { %v6350_v40 = vsel %vm4195_vm0, %v6334_v49, %v6273_v46 }
 0x719   : > { %7920 = vst [vmem:[%s8930_s5 + $0x90] sm:$0xff] %v6350_v40 }
 0x71f   : > { %v6275_v48 = vpop.permute.xlu0 %6274 }
 0x720   : > { %v6351_v26 = vsel %vm4195_vm0, %v6335_v7, %v6275_v48 }
 0x721   : > { %7921 = vst [vmem:[%s8930_s5 + $0x98] sm:$0xff] %v6351_v26 }
 0x727   : > { %v6283_v10 = vpop.permute.xlu2 %6282 }
 0x728   : > { %v6355_v20 = vsel %vm4195_vm0, %v6339_v53, %v6283_v10 }
 0x729   : > { %7925 = vst [vmem:[%s8930_s5 + $0xb8] sm:$0xff] %v6355_v20 }
 0x72f   : > { %v6279_v35 = vpop.permute.xlu1 %6278 }
 0x730   : > { %v6353_v55 = vsel %vm4195_vm0, %v11112_v23, %v6279_v35 }
 0x731   : > { %7923 = vst [vmem:[%s8930_s5 + $0xa8] sm:$0xff] %v6353_v55 }
 0x737   : > { %v6281_v51 = vpop.permute.xlu0 %6280 }
 0x738   : > { %v6354_v42 = vsel %vm4195_vm0, %v6338_v60, %v6281_v51 }
 0x739   : > { %7924 = vst [vmem:[%s8930_s5 + $0xb0] sm:$0xff] %v6354_v42 }
 0x73f   : > { %v6289_v36 = vpop.permute.xlu2 %6288 }
 0x740   : > { %v6358_v30 = vsel %vm4195_vm0, %v11148_v1, %v6289_v36 }
 0x741   : > { %7928 = vst [vmem:[%s8930_s5 + $0xd0] sm:$0xff] %v6358_v30 }
 0x747   : > { %v6285_v2 = vpop.permute.xlu1 %6284 }
 0x748   : > { %v6356_v23 = vsel %vm4195_vm0, %v11119_v5, %v6285_v2 }
 0x749   : > { %7926 = vst [vmem:[%s8930_s5 + $0xc0] sm:$0xff] %v6356_v23 }
 0x74f   : > { %v6287_v27 = vpop.permute.xlu0 %6286 }
 0x750   : > { %v6357_v34 = vsel %vm4195_vm0, %v11143_v45, %v6287_v27 }
 0x751   : > { %7927 = vst [vmem:[%s8930_s5 + $0xc8] sm:$0xff] %v6357_v34 }
 0x757   : > { %v6295_v43 = vpop.permute.xlu2 %6294 }
 0x758   : > { %v6361_v63 = vsel %vm4195_vm0, %v11163_v29, %v6295_v43 }
 0x759   : > { %7931 = vst [vmem:[%s8930_s5 + $0xe8] sm:$0xff] %v6361_v63 }
 0x75f   : > { %v6291_v1 = vpop.permute.xlu1 %6290 }
 0x760   : > { %v6359_v14 = vsel %vm4195_vm0, %v11136_v44, %v6291_v1 }
 0x761   : > { %7929 = vst [vmem:[%s8930_s5 + $0xd8] sm:$0xff] %v6359_v14 }
 0x767   : > { %v6293_v15 = vpop.permute.xlu0 %6292 }
 0x768   : > { %v6360_v5 = vsel %vm4195_vm0, %v11158_v9, %v6293_v15 }
 0x769   : > { %7930 = vst [vmem:[%s8930_s5 + $0xe0] sm:$0xff] %v6360_v5 }
 0x777   : > { %v6297_v59 = vpop.permute.xlu1 %6296 }
 0x778   : > { %v6362_v45 = vsel %vm4195_vm0, %v11153_v19, %v6297_v59 }
 0x779   : > { %7932 = vst [vmem:[%s8930_s5 + $0xf0] sm:$0xff] %v6362_v45 }
 0x77f   : > { %v6299_v18 = vpop.permute.xlu0 %6298 }
 0x780   : > { %v6363_v11 = vsel %vm4195_vm0, %v6347_v6, %v6299_v18 }
 0x781   : > { %7933 = vst [vmem:[%s8930_s5 + $0xf8] sm:$0xff] %v6363_v11 }
 0x782 PF: > { %s13_s18 = sadd.s32 1, %s8414_s18   ;;  %s11537_s12 = smov %s8394_s13 }
 0x783   : > { %p10_p13 = scmp.ge.s32.totalorder %s13_s18, 6   ;;  %s11538_s13 = smov %s8498_s26 }
 0x784   : > { %s11539_s14 = smov %s8406_s16  ;;  %s11540_s15 = smov %s8410_s17 }
 0x785   : > { %s11541_s16 = smov %s11544_s19  ;;  %s11542_s17 = smov %s11548_s20 }
 0x786   :  { %12 = sbr.rel (!%p10_p13) target bundleno = 4 (0x4), region = 235 }

</bundles_post_ra>
